<compile_context>
chip_gen: v6e
topology: v6e:2x2x1
jax: 0.10.0
libtpu: 0.0.40
codegen_flags: <defaults>
</compile_context>

<pallas_src>
import jax
import jax.numpy as jnp
from jax import lax
from jax.experimental import pallas as pl
from jax.experimental.pallas import tpu as pltpu

BN_EPS = 1e-5
SLOPE = 0.2

# Static geometry: 32x32x3 -> 16x16x64 -> 8x8x128 -> 4x4x256 -> 1x1x1
C0, C1, C2, C3 = 3, 64, 128, 256
O1, O2, O3 = 16, 8, 4                       # per-layer output spatial size

# For a stride-2 / pad-1 / 3x3 conv, tap k reads source index 2*o + k - 1:
#   k=0 -> odd-parity subgrid, shifted by -1 ; k=1 -> even, 0 ; k=2 -> odd, 0
TAP_PAR = (1, 0, 1)                         # source parity per tap index
TAP_SH = (1, 0, 0)                          # rows/cols of leading zero shift


# ----------------------------------------------------------------------------
# In-kernel helpers
# ----------------------------------------------------------------------------
def _bn_lrelu(y, g, b):
    # BatchNorm2d train-mode batch statistics over rows (= N*H*W), two-pass,
    # f32, followed by LeakyReLU(0.2).
    m = jnp.mean(y, axis=0, keepdims=True)
    d = y - m
    var = jnp.mean(d * d, axis=0, keepdims=True)
    z = d * lax.rsqrt(var + BN_EPS) * g + b
    return jnp.where(z >= 0.0, z, SLOPE * z)


def _col_mask(hs, ws):
    # (hs*ws, 1) f32 mask that zeroes rows whose output column index is 0
    # (left zero-padding column).  Hoisted out of the per-tap loop.
    wo = lax.broadcasted_iota(jnp.int32, (hs * ws, 1), 0) % ws
    return (wo != 0).astype(jnp.float32)


def _tap_block(sub, sh, sw, ws, wmask):
    """Shifted copy of one raster-ordered (hs*ws, C) parity subgrid for a tap.

    Rows that fall into the zero padding (top `sh` subgrid rows, and the
    leftmost output column when sw == 1) end up exactly zero.
    """
    r, c = sub.shape
    s = sh * ws + sw
    if s:
        sub = jnp.concatenate(
            [jnp.zeros((s, c), sub.dtype), sub[:r - s, :]], axis=0)
    if sw:
        sub = sub * wmask
    return sub


def _conv_slab(act, n, hs, ws, wmask):
    """(hs*ws, 9*C) im2col slab row-block for image `n`.

    `act` holds the previous layer's activations with rows in parity-major
    order (n, parity_h, parity_w, h, w); each (n, ph, pw) subgrid is an
    (hs*ws, C) raster block.  Slab columns are (tap, cin).
    """
    sub_rows = hs * ws
    blocks = []
    for kh in range(3):
        for kw in range(3):
            ph, sh = TAP_PAR[kh], TAP_SH[kh]
            pw, sw = TAP_PAR[kw], TAP_SH[kw]
            base = (n * 4 + ph * 2 + pw) * sub_rows
            blocks.append(
                _tap_block(act[base:base + sub_rows, :], sh, sw, ws, wmask))
    return jnp.concatenate(blocks, axis=1)


# ----------------------------------------------------------------------------
# Fused kernel
# ----------------------------------------------------------------------------
def _make_disc_kernel(N):
    def kernel(p1_ref, w1_ref, g1_ref, b1_ref,
               w2_ref, g2_ref, b2_ref,
               w3_ref, g3_ref, b3_ref,
               perm_ref, w4_ref, o_ref):
        # ---- layer 1: conv-as-matmul (host patches, parity-major rows) -----
        y1 = jnp.dot(p1_ref[...], w1_ref[...],
                     preferred_element_type=jnp.float32)         # (N*256, 64)
        a1 = _bn_lrelu(y1, g1_ref[...], b1_ref[...])

        # ---- layer 2: one K=576 bf16 matmul over an in-kernel im2col slab --
        m2 = _col_mask(O2, O2)
        slab2 = jnp.concatenate(
            [_conv_slab(a1, n, O2, O2, m2) for n in range(N)], axis=0)
        y2 = jnp.dot(slab2.astype(jnp.bfloat16), w2_ref[...],
                     preferred_element_type=jnp.float32)         # (N*64, 128)
        a2 = _bn_lrelu(y2, g2_ref[...], b2_ref[...])

        # ---- de-interleave layer-2 output by parity (64x64 perm per image) -
        a2_bf = a2.astype(jnp.bfloat16)
        a2p = jnp.concatenate(
            [jnp.dot(perm_ref[...], a2_bf[n * 64:(n + 1) * 64, :],
                     preferred_element_type=jnp.float32) for n in range(N)],
            axis=0)                                              # (N*64, 128)

        # ---- layer 3: one K=1152 bf16 matmul --------------------------------
        m3 = _col_mask(O3, O3)
        slab3 = jnp.concatenate(
            [_conv_slab(a2p, n, O3, O3, m3) for n in range(N)], axis=0)
        y3 = jnp.dot(slab3.astype(jnp.bfloat16), w3_ref[...],
                     preferred_element_type=jnp.float32)         # (N*16, 256)
        a3 = _bn_lrelu(y3, g3_ref[...], b3_ref[...])

        # ---- layer 4: 4x4 valid conv, Cout=1 -> mul + reduce + sigmoid -----
        for n in range(N):
            s = jnp.sum(a3[n * 16:(n + 1) * 16, :] * w4_ref[...],
                        keepdims=True)                           # (1, 1)
            o_ref[n:n + 1, :] = 1.0 / (1.0 + jnp.exp(-s))

    return kernel


# ----------------------------------------------------------------------------
# Host-side helpers (tiny, fused by XLA; weights converted once)
# ----------------------------------------------------------------------------
def _im2col_l1(x):
    """(N,3,32,32) -> (N*4*64, 32) bf16 layer-1 conv patches.

    Rows are in parity-major order of the layer-1 OUTPUT grid,
    (n, h1%2, w1%2, h1//2, w1//2), so the kernel can build layer-2's im2col
    slab from contiguous shifted blocks.  Columns are (cin, kh, kw), padded
    27 -> 32.
    """
    N, C, H, W = x.shape
    Ho, Wo = H // 2, W // 2                          # 16, 16
    xp = jnp.pad(x, ((0, 0), (0, 0), (1, 1), (1, 1)))
    taps = []
    for kh in range(3):
        for kw in range(3):
            taps.append(xp[:, :, kh:kh + 2 * Ho:2, kw:kw + 2 * Wo:2])
    p = jnp.stack(taps, 0).reshape(3, 3, N, C, Ho, Wo)
    p = p.transpose(2, 4, 5, 3, 0, 1).reshape(N, Ho, Wo, C * 9)  # cols (c,kh,kw)
    p = p.reshape(N, Ho // 2, 2, Wo // 2, 2, C * 9)
    p = p.transpose(0, 2, 4, 1, 3, 5).reshape(N * 4 * (Ho // 2) * (Wo // 2), C * 9)
    return jnp.pad(p, ((0, 0), (0, 32 - C * 9))).astype(jnp.bfloat16)


def _parity_perm():
    """64x64 0/1 matrix: raster 8x8 rows -> parity-major (ph, pw, ho, wo) rows."""
    idx = []
    for ph in range(2):
        for pw in range(2):
            for ho in range(4):
                for wo in range(4):
                    idx.append((2 * ho + ph) * 8 + (2 * wo + pw))
    src = jnp.array(idx, jnp.int32)
    return (src[:, None] == jnp.arange(64)[None, :]).astype(jnp.bfloat16)


def init_params(key):
    # Torch-layout conv weights (Cout, Cin, KH, KW); BN gamma=1, beta=0.
    def conv_w(k, cout, cin, kh, kw):
        fan_in = cin * kh * kw
        return jax.random.normal(k, (cout, cin, kh, kw), jnp.float32) * (1.0 / fan_in) ** 0.5

    ks = jax.random.split(key, 4)
    return {
        "w1": conv_w(ks[0], C1, C0, 3, 3),
        "g1": jnp.ones((C1,), jnp.float32), "b1": jnp.zeros((C1,), jnp.float32),
        "w2": conv_w(ks[1], C2, C1, 3, 3),
        "g2": jnp.ones((C2,), jnp.float32), "b2": jnp.zeros((C2,), jnp.float32),
        "w3": conv_w(ks[2], C3, C2, 3, 3),
        "g3": jnp.ones((C3,), jnp.float32), "b3": jnp.zeros((C3,), jnp.float32),
        "w4": conv_w(ks[3], 1, C3, 4, 4),
    }


def prepare_params(p):
    """One-time conversion of torch-layout weights into kernel-ready arrays."""
    w1 = p["w1"].reshape(C1, C0 * 9).T                           # (27, 64)
    w1 = jnp.pad(w1, ((0, 32 - C0 * 9), (0, 0))).astype(jnp.bfloat16)

    def im2col_w(w):   # (Cout,Cin,3,3) -> (9*Cin, Cout), row = (kh*3+kw)*Cin + c
        cout, cin = w.shape[0], w.shape[1]
        return w.transpose(2, 3, 1, 0).reshape(9 * cin, cout).astype(jnp.bfloat16)

    w4 = p["w4"].transpose(2, 3, 1, 0).reshape(16, C3).astype(jnp.float32)

    def row(v):
        return v.reshape(1, -1).astype(jnp.float32)

    return {
        "w1": w1, "g1": row(p["g1"]), "b1": row(p["b1"]),
        "w2": im2col_w(p["w2"]), "g2": row(p["g2"]), "b2": row(p["b2"]),
        "w3": im2col_w(p["w3"]), "g3": row(p["g3"]), "b3": row(p["b3"]),
        "w4": w4,
        "perm": _parity_perm(),
    }


@jax.jit
def discriminator_forward(kp, img):
    N = img.shape[0]
    p1 = _im2col_l1(img)                                         # (N*256, 32) bf16

    # Rough advisory cost for XLA's scheduler around the custom call.
    flops = 2 * N * (256 * 32 * 64 + 64 * 576 * 128 + 64 * 64 * 64
                     + 16 * 1152 * 256 + 16 * 256)
    bytes_acc = (p1.size * 2
                 + (32 * 64 + 576 * 128 + 1152 * 256 + 64 * 64) * 2
                 + 16 * 256 * 4 + (64 + 128 + 256) * 2 * 4 + N * 4)

    vmem = pl.BlockSpec(memory_space=pltpu.MemorySpace.VMEM)
    out = pl.pallas_call(
        _make_disc_kernel(N),
        out_shape=jax.ShapeDtypeStruct((N, 1), jnp.float32),
        in_specs=[vmem] * 12,
        out_specs=vmem,
        cost_estimate=pl.CostEstimate(flops=flops, transcendentals=512,
                                      bytes_accessed=bytes_acc),
        compiler_params=pltpu.CompilerParams(vmem_limit_bytes=32 * 1024 * 1024),
    )(p1, kp["w1"], kp["g1"], kp["b1"],
      kp["w2"], kp["g2"], kp["b2"],
      kp["w3"], kp["g3"], kp["b3"],
      kp["perm"], kp["w4"])
    return out


if __name__ == "__main__":
    key = jax.random.PRNGKey(0)
    pkey, xkey = jax.random.split(key)
    params = init_params(pkey)
    kparams = prepare_params(params)

    # 32x32 input so that 32 -> 16 -> 8 -> 4, then the 4x4 valid conv -> 1x1.
    img = jax.random.normal(xkey, (2, 3, 32, 32), jnp.float32)

    out = discriminator_forward(kparams, img)
    jax.block_until_ready(out)
    assert out.shape == (2, 1), out.shape
    assert bool(jnp.all(jnp.isfinite(out)))
    assert bool(jnp.all((out >= 0.0) & (out <= 1.0)))
    print("KERNEL_OK")
</pallas_src>

<mosaic_0001>
module attributes {stable_mosaic.version = 11 : i64} {
  func.func @kernel(%arg0: memref<512x32xbf16, #tpu.memory_space<vmem>>, %arg1: memref<32x64xbf16, #tpu.memory_space<vmem>>, %arg2: memref<1x64xf32, #tpu.memory_space<vmem>>, %arg3: memref<1x64xf32, #tpu.memory_space<vmem>>, %arg4: memref<576x128xbf16, #tpu.memory_space<vmem>>, %arg5: memref<1x128xf32, #tpu.memory_space<vmem>>, %arg6: memref<1x128xf32, #tpu.memory_space<vmem>>, %arg7: memref<1152x256xbf16, #tpu.memory_space<vmem>>, %arg8: memref<1x256xf32, #tpu.memory_space<vmem>>, %arg9: memref<1x256xf32, #tpu.memory_space<vmem>>, %arg10: memref<64x64xbf16, #tpu.memory_space<vmem>>, %arg11: memref<16x256xf32, #tpu.memory_space<vmem>>, %arg12: memref<2x1xf32, #tpu.memory_space<vmem>>) attributes {dimension_semantics = [], scalar_prefetch = 0 : i64, scratch_operands = 0 : i64, tpu.core_type = #tpu.core_type<tc>} {
    %c0 = arith.constant 0 : index
    %c0_0 = arith.constant 0 : index
    %0 = vector.load %arg0[%c0, %c0_0] : memref<512x32xbf16, #tpu.memory_space<vmem>>, vector<512x32xbf16>
    %c0_1 = arith.constant 0 : index
    %c0_2 = arith.constant 0 : index
    %1 = vector.load %arg1[%c0_1, %c0_2] : memref<32x64xbf16, #tpu.memory_space<vmem>>, vector<32x64xbf16>
    %cst = arith.constant dense<0.000000e+00> : vector<512x64xf32>
    %2 = tpu.matmul %0, %1, %cst {dimension_numbers = #tpu.dot_dimension_numbers<[1], [0], [0], [1], [0, 0, 1, 1], [], []>} : vector<512x32xbf16>, vector<32x64xbf16>, vector<512x64xf32> -> vector<512x64xf32>
    %c0_3 = arith.constant 0 : index
    %c0_4 = arith.constant 0 : index
    %3 = vector.load %arg2[%c0_3, %c0_4] : memref<1x64xf32, #tpu.memory_space<vmem>>, vector<1x64xf32>
    %c0_5 = arith.constant 0 : index
    %c0_6 = arith.constant 0 : index
    %4 = vector.load %arg3[%c0_5, %c0_6] : memref<1x64xf32, #tpu.memory_space<vmem>>, vector<1x64xf32>
    %cst_7 = arith.constant dense<0.000000e+00> : vector<64xf32>
    %5 = vector.multi_reduction <add>, %2, %cst_7 [0] : vector<512x64xf32> to vector<64xf32>
    %6 = vector.shape_cast %5 : vector<64xf32> to vector<1x64xf32>
    %cst_8 = arith.constant 5.120000e+02 : f32
    %7 = vector.broadcast %cst_8 : f32 to vector<1x64xf32>
    %8 = arith.divf %6, %7 : vector<1x64xf32>
    %9 = vector.broadcast %8 : vector<1x64xf32> to vector<512x64xf32>
    %10 = arith.subf %2, %9 : vector<512x64xf32>
    %11 = arith.mulf %10, %10 : vector<512x64xf32>
    %cst_9 = arith.constant dense<0.000000e+00> : vector<64xf32>
    %12 = vector.multi_reduction <add>, %11, %cst_9 [0] : vector<512x64xf32> to vector<64xf32>
    %13 = vector.shape_cast %12 : vector<64xf32> to vector<1x64xf32>
    %cst_10 = arith.constant 5.120000e+02 : f32
    %14 = vector.broadcast %cst_10 : f32 to vector<1x64xf32>
    %15 = arith.divf %13, %14 : vector<1x64xf32>
    %cst_11 = arith.constant 9.99999974E-6 : f32
    %16 = vector.broadcast %cst_11 : f32 to vector<1x64xf32>
    %17 = arith.addf %15, %16 : vector<1x64xf32>
    %18 = math.rsqrt %17 : vector<1x64xf32>
    %19 = vector.broadcast %18 : vector<1x64xf32> to vector<512x64xf32>
    %20 = arith.mulf %10, %19 : vector<512x64xf32>
    %21 = vector.broadcast %3 : vector<1x64xf32> to vector<512x64xf32>
    %22 = arith.mulf %20, %21 : vector<512x64xf32>
    %23 = vector.broadcast %4 : vector<1x64xf32> to vector<512x64xf32>
    %24 = arith.addf %22, %23 : vector<512x64xf32>
    %cst_12 = arith.constant 0.000000e+00 : f32
    %25 = vector.broadcast %cst_12 : f32 to vector<512x64xf32>
    %26 = arith.cmpf oge, %24, %25 : vector<512x64xf32>
    %cst_13 = arith.constant 2.000000e-01 : f32
    %27 = vector.broadcast %cst_13 : f32 to vector<512x64xf32>
    %28 = arith.mulf %27, %24 : vector<512x64xf32>
    %29 = arith.select %26, %24, %28 : vector<512x64xi1>, vector<512x64xf32>
    %30 = tpu.iota {dimensions = array<i32: 0>} : vector<64x1xi32>
    %c8_i32 = arith.constant 8 : i32
    %c0_i32 = arith.constant 0 : i32
    %31 = arith.cmpi eq, %c8_i32, %c0_i32 : i32
    %c1_i32 = arith.constant 1 : i32
    %32 = arith.select %31, %c1_i32, %c8_i32 : i32
    %33 = vector.broadcast %32 : i32 to vector<64x1xi32>
    %34 = arith.remsi %30, %33 : vector<64x1xi32>
    %c0_i32_14 = arith.constant 0 : i32
    %35 = vector.broadcast %c0_i32_14 : i32 to vector<64x1xi32>
    %36 = arith.cmpi ne, %34, %35 : vector<64x1xi32>
    %c0_i32_15 = arith.constant 0 : i32
    %37 = vector.broadcast %c0_i32_15 : i32 to vector<64x1xi32>
    %38 = arith.cmpi slt, %34, %37 : vector<64x1xi32>
    %c0_i32_16 = arith.constant 0 : i32
    %39 = arith.cmpi slt, %32, %c0_i32_16 : i32
    %40 = vector.broadcast %39 : i1 to vector<64x1xi1>
    %41 = vector.broadcast %40 : vector<64x1xi1> to vector<64x1xi1>
    %42 = arith.xori %38, %41 : vector<64x1xi1>
    %43 = arith.andi %42, %36 : vector<64x1xi1>
    %44 = vector.broadcast %32 : i32 to vector<64x1xi32>
    %45 = arith.addi %34, %44 : vector<64x1xi32>
    %46 = arith.select %43, %45, %34 : vector<64x1xi1>, vector<64x1xi32>
    %c0_i32_17 = arith.constant 0 : i32
    %47 = vector.broadcast %c0_i32_17 : i32 to vector<64x1xi32>
    %48 = arith.cmpi ne, %46, %47 : vector<64x1xi32>
    %49 = arith.extui %48 : vector<64x1xi1> to vector<64x1xi32>
    %50 = arith.sitofp %49 : vector<64x1xi32> to vector<64x1xf32>
    %51 = vector.extract_strided_slice %29 {offsets = [192, 0], sizes = [64, 64], strides = [1, 1]} : vector<512x64xf32> to vector<64x64xf32>
    %cst_18 = arith.constant 0.000000e+00 : f32
    %52 = vector.broadcast %cst_18 : f32 to vector<9x64xf32>
    %53 = vector.extract_strided_slice %51 {offsets = [0, 0], sizes = [55, 64], strides = [1, 1]} : vector<64x64xf32> to vector<55x64xf32>
    %54 = tpu.concatenate %52, %53 in 0 : vector<9x64xf32>, vector<55x64xf32> -> vector<64x64xf32>
    %55 = vector.broadcast %50 : vector<64x1xf32> to vector<64x64xf32>
    %56 = arith.mulf %54, %55 : vector<64x64xf32>
    %57 = vector.extract_strided_slice %29 {offsets = [128, 0], sizes = [64, 64], strides = [1, 1]} : vector<512x64xf32> to vector<64x64xf32>
    %cst_19 = arith.constant 0.000000e+00 : f32
    %58 = vector.broadcast %cst_19 : f32 to vector<8x64xf32>
    %59 = vector.extract_strided_slice %57 {offsets = [0, 0], sizes = [56, 64], strides = [1, 1]} : vector<64x64xf32> to vector<56x64xf32>
    %60 = tpu.concatenate %58, %59 in 0 : vector<8x64xf32>, vector<56x64xf32> -> vector<64x64xf32>
    %61 = vector.extract_strided_slice %29 {offsets = [192, 0], sizes = [64, 64], strides = [1, 1]} : vector<512x64xf32> to vector<64x64xf32>
    %cst_20 = arith.constant 0.000000e+00 : f32
    %62 = vector.broadcast %cst_20 : f32 to vector<8x64xf32>
    %63 = vector.extract_strided_slice %61 {offsets = [0, 0], sizes = [56, 64], strides = [1, 1]} : vector<64x64xf32> to vector<56x64xf32>
    %64 = tpu.concatenate %62, %63 in 0 : vector<8x64xf32>, vector<56x64xf32> -> vector<64x64xf32>
    %65 = vector.extract_strided_slice %29 {offsets = [64, 0], sizes = [64, 64], strides = [1, 1]} : vector<512x64xf32> to vector<64x64xf32>
    %cst_21 = arith.constant 0.000000e+00 : f32
    %66 = vector.broadcast %cst_21 : f32 to vector<1x64xf32>
    %67 = vector.extract_strided_slice %65 {offsets = [0, 0], sizes = [63, 64], strides = [1, 1]} : vector<64x64xf32> to vector<63x64xf32>
    %68 = tpu.concatenate %66, %67 in 0 : vector<1x64xf32>, vector<63x64xf32> -> vector<64x64xf32>
    %69 = vector.broadcast %50 : vector<64x1xf32> to vector<64x64xf32>
    %70 = arith.mulf %68, %69 : vector<64x64xf32>
    %71 = vector.extract_strided_slice %29 {offsets = [0, 0], sizes = [64, 64], strides = [1, 1]} : vector<512x64xf32> to vector<64x64xf32>
    %72 = vector.extract_strided_slice %29 {offsets = [64, 0], sizes = [64, 64], strides = [1, 1]} : vector<512x64xf32> to vector<64x64xf32>
    %73 = vector.extract_strided_slice %29 {offsets = [192, 0], sizes = [64, 64], strides = [1, 1]} : vector<512x64xf32> to vector<64x64xf32>
    %cst_22 = arith.constant 0.000000e+00 : f32
    %74 = vector.broadcast %cst_22 : f32 to vector<1x64xf32>
    %75 = vector.extract_strided_slice %73 {offsets = [0, 0], sizes = [63, 64], strides = [1, 1]} : vector<64x64xf32> to vector<63x64xf32>
    %76 = tpu.concatenate %74, %75 in 0 : vector<1x64xf32>, vector<63x64xf32> -> vector<64x64xf32>
    %77 = vector.broadcast %50 : vector<64x1xf32> to vector<64x64xf32>
    %78 = arith.mulf %76, %77 : vector<64x64xf32>
    %79 = vector.extract_strided_slice %29 {offsets = [128, 0], sizes = [64, 64], strides = [1, 1]} : vector<512x64xf32> to vector<64x64xf32>
    %80 = vector.extract_strided_slice %29 {offsets = [192, 0], sizes = [64, 64], strides = [1, 1]} : vector<512x64xf32> to vector<64x64xf32>
    %81 = tpu.concatenate %56, %60, %64, %70, %71, %72, %78, %79, %80 in 1 : vector<64x64xf32>, vector<64x64xf32>, vector<64x64xf32>, vector<64x64xf32>, vector<64x64xf32>, vector<64x64xf32>, vector<64x64xf32>, vector<64x64xf32>, vector<64x64xf32> -> vector<64x576xf32>
    %82 = vector.extract_strided_slice %29 {offsets = [448, 0], sizes = [64, 64], strides = [1, 1]} : vector<512x64xf32> to vector<64x64xf32>
    %cst_23 = arith.constant 0.000000e+00 : f32
    %83 = vector.broadcast %cst_23 : f32 to vector<9x64xf32>
    %84 = vector.extract_strided_slice %82 {offsets = [0, 0], sizes = [55, 64], strides = [1, 1]} : vector<64x64xf32> to vector<55x64xf32>
    %85 = tpu.concatenate %83, %84 in 0 : vector<9x64xf32>, vector<55x64xf32> -> vector<64x64xf32>
    %86 = vector.broadcast %50 : vector<64x1xf32> to vector<64x64xf32>
    %87 = arith.mulf %85, %86 : vector<64x64xf32>
    %88 = vector.extract_strided_slice %29 {offsets = [384, 0], sizes = [64, 64], strides = [1, 1]} : vector<512x64xf32> to vector<64x64xf32>
    %cst_24 = arith.constant 0.000000e+00 : f32
    %89 = vector.broadcast %cst_24 : f32 to vector<8x64xf32>
    %90 = vector.extract_strided_slice %88 {offsets = [0, 0], sizes = [56, 64], strides = [1, 1]} : vector<64x64xf32> to vector<56x64xf32>
    %91 = tpu.concatenate %89, %90 in 0 : vector<8x64xf32>, vector<56x64xf32> -> vector<64x64xf32>
    %92 = vector.extract_strided_slice %29 {offsets = [448, 0], sizes = [64, 64], strides = [1, 1]} : vector<512x64xf32> to vector<64x64xf32>
    %cst_25 = arith.constant 0.000000e+00 : f32
    %93 = vector.broadcast %cst_25 : f32 to vector<8x64xf32>
    %94 = vector.extract_strided_slice %92 {offsets = [0, 0], sizes = [56, 64], strides = [1, 1]} : vector<64x64xf32> to vector<56x64xf32>
    %95 = tpu.concatenate %93, %94 in 0 : vector<8x64xf32>, vector<56x64xf32> -> vector<64x64xf32>
    %96 = vector.extract_strided_slice %29 {offsets = [320, 0], sizes = [64, 64], strides = [1, 1]} : vector<512x64xf32> to vector<64x64xf32>
    %cst_26 = arith.constant 0.000000e+00 : f32
    %97 = vector.broadcast %cst_26 : f32 to vector<1x64xf32>
    %98 = vector.extract_strided_slice %96 {offsets = [0, 0], sizes = [63, 64], strides = [1, 1]} : vector<64x64xf32> to vector<63x64xf32>
    %99 = tpu.concatenate %97, %98 in 0 : vector<1x64xf32>, vector<63x64xf32> -> vector<64x64xf32>
    %100 = vector.broadcast %50 : vector<64x1xf32> to vector<64x64xf32>
    %101 = arith.mulf %99, %100 : vector<64x64xf32>
    %102 = vector.extract_strided_slice %29 {offsets = [256, 0], sizes = [64, 64], strides = [1, 1]} : vector<512x64xf32> to vector<64x64xf32>
    %103 = vector.extract_strided_slice %29 {offsets = [320, 0], sizes = [64, 64], strides = [1, 1]} : vector<512x64xf32> to vector<64x64xf32>
    %104 = vector.extract_strided_slice %29 {offsets = [448, 0], sizes = [64, 64], strides = [1, 1]} : vector<512x64xf32> to vector<64x64xf32>
    %cst_27 = arith.constant 0.000000e+00 : f32
    %105 = vector.broadcast %cst_27 : f32 to vector<1x64xf32>
    %106 = vector.extract_strided_slice %104 {offsets = [0, 0], sizes = [63, 64], strides = [1, 1]} : vector<64x64xf32> to vector<63x64xf32>
    %107 = tpu.concatenate %105, %106 in 0 : vector<1x64xf32>, vector<63x64xf32> -> vector<64x64xf32>
    %108 = vector.broadcast %50 : vector<64x1xf32> to vector<64x64xf32>
    %109 = arith.mulf %107, %108 : vector<64x64xf32>
    %110 = vector.extract_strided_slice %29 {offsets = [384, 0], sizes = [64, 64], strides = [1, 1]} : vector<512x64xf32> to vector<64x64xf32>
    %111 = vector.extract_strided_slice %29 {offsets = [448, 0], sizes = [64, 64], strides = [1, 1]} : vector<512x64xf32> to vector<64x64xf32>
    %112 = tpu.concatenate %87, %91, %95, %101, %102, %103, %109, %110, %111 in 1 : vector<64x64xf32>, vector<64x64xf32>, vector<64x64xf32>, vector<64x64xf32>, vector<64x64xf32>, vector<64x64xf32>, vector<64x64xf32>, vector<64x64xf32>, vector<64x64xf32> -> vector<64x576xf32>
    %113 = tpu.concatenate %81, %112 in 0 : vector<64x576xf32>, vector<64x576xf32> -> vector<128x576xf32>
    %114 = arith.truncf %113 : vector<128x576xf32> to vector<128x576xbf16>
    %c0_28 = arith.constant 0 : index
    %c0_29 = arith.constant 0 : index
    %115 = vector.load %arg4[%c0_28, %c0_29] : memref<576x128xbf16, #tpu.memory_space<vmem>>, vector<576x128xbf16>
    %cst_30 = arith.constant dense<0.000000e+00> : vector<128x128xf32>
    %116 = tpu.matmul %114, %115, %cst_30 {dimension_numbers = #tpu.dot_dimension_numbers<[1], [0], [0], [1], [0, 0, 1, 1], [], []>} : vector<128x576xbf16>, vector<576x128xbf16>, vector<128x128xf32> -> vector<128x128xf32>
    %c0_31 = arith.constant 0 : index
    %c0_32 = arith.constant 0 : index
    %117 = vector.load %arg5[%c0_31, %c0_32] : memref<1x128xf32, #tpu.memory_space<vmem>>, vector<1x128xf32>
    %c0_33 = arith.constant 0 : index
    %c0_34 = arith.constant 0 : index
    %118 = vector.load %arg6[%c0_33, %c0_34] : memref<1x128xf32, #tpu.memory_space<vmem>>, vector<1x128xf32>
    %cst_35 = arith.constant dense<0.000000e+00> : vector<128xf32>
    %119 = vector.multi_reduction <add>, %116, %cst_35 [0] : vector<128x128xf32> to vector<128xf32>
    %120 = vector.shape_cast %119 : vector<128xf32> to vector<1x128xf32>
    %cst_36 = arith.constant 1.280000e+02 : f32
    %121 = vector.broadcast %cst_36 : f32 to vector<1x128xf32>
    %122 = arith.divf %120, %121 : vector<1x128xf32>
    %123 = vector.broadcast %122 : vector<1x128xf32> to vector<128x128xf32>
    %124 = arith.subf %116, %123 : vector<128x128xf32>
    %125 = arith.mulf %124, %124 : vector<128x128xf32>
    %cst_37 = arith.constant dense<0.000000e+00> : vector<128xf32>
    %126 = vector.multi_reduction <add>, %125, %cst_37 [0] : vector<128x128xf32> to vector<128xf32>
    %127 = vector.shape_cast %126 : vector<128xf32> to vector<1x128xf32>
    %cst_38 = arith.constant 1.280000e+02 : f32
    %128 = vector.broadcast %cst_38 : f32 to vector<1x128xf32>
    %129 = arith.divf %127, %128 : vector<1x128xf32>
    %cst_39 = arith.constant 9.99999974E-6 : f32
    %130 = vector.broadcast %cst_39 : f32 to vector<1x128xf32>
    %131 = arith.addf %129, %130 : vector<1x128xf32>
    %132 = math.rsqrt %131 : vector<1x128xf32>
    %133 = vector.broadcast %132 : vector<1x128xf32> to vector<128x128xf32>
    %134 = arith.mulf %124, %133 : vector<128x128xf32>
    %135 = vector.broadcast %117 : vector<1x128xf32> to vector<128x128xf32>
    %136 = arith.mulf %134, %135 : vector<128x128xf32>
    %137 = vector.broadcast %118 : vector<1x128xf32> to vector<128x128xf32>
    %138 = arith.addf %136, %137 : vector<128x128xf32>
    %cst_40 = arith.constant 0.000000e+00 : f32
    %139 = vector.broadcast %cst_40 : f32 to vector<128x128xf32>
    %140 = arith.cmpf oge, %138, %139 : vector<128x128xf32>
    %cst_41 = arith.constant 2.000000e-01 : f32
    %141 = vector.broadcast %cst_41 : f32 to vector<128x128xf32>
    %142 = arith.mulf %141, %138 : vector<128x128xf32>
    %143 = arith.select %140, %138, %142 : vector<128x128xi1>, vector<128x128xf32>
    %144 = arith.truncf %143 : vector<128x128xf32> to vector<128x128xbf16>
    %c0_42 = arith.constant 0 : index
    %c0_43 = arith.constant 0 : index
    %145 = vector.load %arg10[%c0_42, %c0_43] : memref<64x64xbf16, #tpu.memory_space<vmem>>, vector<64x64xbf16>
    %146 = vector.extract_strided_slice %144 {offsets = [0, 0], sizes = [64, 128], strides = [1, 1]} : vector<128x128xbf16> to vector<64x128xbf16>
    %cst_44 = arith.constant dense<0.000000e+00> : vector<64x128xf32>
    %147 = tpu.matmul %145, %146, %cst_44 {dimension_numbers = #tpu.dot_dimension_numbers<[1], [0], [0], [1], [0, 0, 1, 1], [], []>} : vector<64x64xbf16>, vector<64x128xbf16>, vector<64x128xf32> -> vector<64x128xf32>
    %c0_45 = arith.constant 0 : index
    %c0_46 = arith.constant 0 : index
    %148 = vector.load %arg10[%c0_45, %c0_46] : memref<64x64xbf16, #tpu.memory_space<vmem>>, vector<64x64xbf16>
    %149 = vector.extract_strided_slice %144 {offsets = [64, 0], sizes = [64, 128], strides = [1, 1]} : vector<128x128xbf16> to vector<64x128xbf16>
    %cst_47 = arith.constant dense<0.000000e+00> : vector<64x128xf32>
    %150 = tpu.matmul %148, %149, %cst_47 {dimension_numbers = #tpu.dot_dimension_numbers<[1], [0], [0], [1], [0, 0, 1, 1], [], []>} : vector<64x64xbf16>, vector<64x128xbf16>, vector<64x128xf32> -> vector<64x128xf32>
    %151 = tpu.concatenate %147, %150 in 0 : vector<64x128xf32>, vector<64x128xf32> -> vector<128x128xf32>
    %152 = tpu.iota {dimensions = array<i32: 0>} : vector<16x1xi32>
    %c4_i32 = arith.constant 4 : i32
    %c0_i32_48 = arith.constant 0 : i32
    %153 = arith.cmpi eq, %c4_i32, %c0_i32_48 : i32
    %c1_i32_49 = arith.constant 1 : i32
    %154 = arith.select %153, %c1_i32_49, %c4_i32 : i32
    %155 = vector.broadcast %154 : i32 to vector<16x1xi32>
    %156 = arith.remsi %152, %155 : vector<16x1xi32>
    %c0_i32_50 = arith.constant 0 : i32
    %157 = vector.broadcast %c0_i32_50 : i32 to vector<16x1xi32>
    %158 = arith.cmpi ne, %156, %157 : vector<16x1xi32>
    %c0_i32_51 = arith.constant 0 : i32
    %159 = vector.broadcast %c0_i32_51 : i32 to vector<16x1xi32>
    %160 = arith.cmpi slt, %156, %159 : vector<16x1xi32>
    %c0_i32_52 = arith.constant 0 : i32
    %161 = arith.cmpi slt, %154, %c0_i32_52 : i32
    %162 = vector.broadcast %161 : i1 to vector<16x1xi1>
    %163 = vector.broadcast %162 : vector<16x1xi1> to vector<16x1xi1>
    %164 = arith.xori %160, %163 : vector<16x1xi1>
    %165 = arith.andi %164, %158 : vector<16x1xi1>
    %166 = vector.broadcast %154 : i32 to vector<16x1xi32>
    %167 = arith.addi %156, %166 : vector<16x1xi32>
    %168 = arith.select %165, %167, %156 : vector<16x1xi1>, vector<16x1xi32>
    %c0_i32_53 = arith.constant 0 : i32
    %169 = vector.broadcast %c0_i32_53 : i32 to vector<16x1xi32>
    %170 = arith.cmpi ne, %168, %169 : vector<16x1xi32>
    %171 = arith.extui %170 : vector<16x1xi1> to vector<16x1xi32>
    %172 = arith.sitofp %171 : vector<16x1xi32> to vector<16x1xf32>
    %173 = vector.extract_strided_slice %151 {offsets = [48, 0], sizes = [16, 128], strides = [1, 1]} : vector<128x128xf32> to vector<16x128xf32>
    %cst_54 = arith.constant 0.000000e+00 : f32
    %174 = vector.broadcast %cst_54 : f32 to vector<5x128xf32>
    %175 = vector.extract_strided_slice %173 {offsets = [0, 0], sizes = [11, 128], strides = [1, 1]} : vector<16x128xf32> to vector<11x128xf32>
    %176 = tpu.concatenate %174, %175 in 0 : vector<5x128xf32>, vector<11x128xf32> -> vector<16x128xf32>
    %177 = vector.broadcast %172 : vector<16x1xf32> to vector<16x128xf32>
    %178 = arith.mulf %176, %177 : vector<16x128xf32>
    %179 = vector.extract_strided_slice %151 {offsets = [32, 0], sizes = [16, 128], strides = [1, 1]} : vector<128x128xf32> to vector<16x128xf32>
    %cst_55 = arith.constant 0.000000e+00 : f32
    %180 = vector.broadcast %cst_55 : f32 to vector<4x128xf32>
    %181 = vector.extract_strided_slice %179 {offsets = [0, 0], sizes = [12, 128], strides = [1, 1]} : vector<16x128xf32> to vector<12x128xf32>
    %182 = tpu.concatenate %180, %181 in 0 : vector<4x128xf32>, vector<12x128xf32> -> vector<16x128xf32>
    %183 = vector.extract_strided_slice %151 {offsets = [48, 0], sizes = [16, 128], strides = [1, 1]} : vector<128x128xf32> to vector<16x128xf32>
    %cst_56 = arith.constant 0.000000e+00 : f32
    %184 = vector.broadcast %cst_56 : f32 to vector<4x128xf32>
    %185 = vector.extract_strided_slice %183 {offsets = [0, 0], sizes = [12, 128], strides = [1, 1]} : vector<16x128xf32> to vector<12x128xf32>
    %186 = tpu.concatenate %184, %185 in 0 : vector<4x128xf32>, vector<12x128xf32> -> vector<16x128xf32>
    %187 = vector.extract_strided_slice %151 {offsets = [16, 0], sizes = [16, 128], strides = [1, 1]} : vector<128x128xf32> to vector<16x128xf32>
    %cst_57 = arith.constant 0.000000e+00 : f32
    %188 = vector.broadcast %cst_57 : f32 to vector<1x128xf32>
    %189 = vector.extract_strided_slice %187 {offsets = [0, 0], sizes = [15, 128], strides = [1, 1]} : vector<16x128xf32> to vector<15x128xf32>
    %190 = tpu.concatenate %188, %189 in 0 : vector<1x128xf32>, vector<15x128xf32> -> vector<16x128xf32>
    %191 = vector.broadcast %172 : vector<16x1xf32> to vector<16x128xf32>
    %192 = arith.mulf %190, %191 : vector<16x128xf32>
    %193 = vector.extract_strided_slice %151 {offsets = [0, 0], sizes = [16, 128], strides = [1, 1]} : vector<128x128xf32> to vector<16x128xf32>
    %194 = vector.extract_strided_slice %151 {offsets = [16, 0], sizes = [16, 128], strides = [1, 1]} : vector<128x128xf32> to vector<16x128xf32>
    %195 = vector.extract_strided_slice %151 {offsets = [48, 0], sizes = [16, 128], strides = [1, 1]} : vector<128x128xf32> to vector<16x128xf32>
    %cst_58 = arith.constant 0.000000e+00 : f32
    %196 = vector.broadcast %cst_58 : f32 to vector<1x128xf32>
    %197 = vector.extract_strided_slice %195 {offsets = [0, 0], sizes = [15, 128], strides = [1, 1]} : vector<16x128xf32> to vector<15x128xf32>
    %198 = tpu.concatenate %196, %197 in 0 : vector<1x128xf32>, vector<15x128xf32> -> vector<16x128xf32>
    %199 = vector.broadcast %172 : vector<16x1xf32> to vector<16x128xf32>
    %200 = arith.mulf %198, %199 : vector<16x128xf32>
    %201 = vector.extract_strided_slice %151 {offsets = [32, 0], sizes = [16, 128], strides = [1, 1]} : vector<128x128xf32> to vector<16x128xf32>
    %202 = vector.extract_strided_slice %151 {offsets = [48, 0], sizes = [16, 128], strides = [1, 1]} : vector<128x128xf32> to vector<16x128xf32>
    %203 = tpu.concatenate %178, %182, %186, %192, %193, %194, %200, %201, %202 in 1 : vector<16x128xf32>, vector<16x128xf32>, vector<16x128xf32>, vector<16x128xf32>, vector<16x128xf32>, vector<16x128xf32>, vector<16x128xf32>, vector<16x128xf32>, vector<16x128xf32> -> vector<16x1152xf32>
    %204 = vector.extract_strided_slice %151 {offsets = [112, 0], sizes = [16, 128], strides = [1, 1]} : vector<128x128xf32> to vector<16x128xf32>
    %cst_59 = arith.constant 0.000000e+00 : f32
    %205 = vector.broadcast %cst_59 : f32 to vector<5x128xf32>
    %206 = vector.extract_strided_slice %204 {offsets = [0, 0], sizes = [11, 128], strides = [1, 1]} : vector<16x128xf32> to vector<11x128xf32>
    %207 = tpu.concatenate %205, %206 in 0 : vector<5x128xf32>, vector<11x128xf32> -> vector<16x128xf32>
    %208 = vector.broadcast %172 : vector<16x1xf32> to vector<16x128xf32>
    %209 = arith.mulf %207, %208 : vector<16x128xf32>
    %210 = vector.extract_strided_slice %151 {offsets = [96, 0], sizes = [16, 128], strides = [1, 1]} : vector<128x128xf32> to vector<16x128xf32>
    %cst_60 = arith.constant 0.000000e+00 : f32
    %211 = vector.broadcast %cst_60 : f32 to vector<4x128xf32>
    %212 = vector.extract_strided_slice %210 {offsets = [0, 0], sizes = [12, 128], strides = [1, 1]} : vector<16x128xf32> to vector<12x128xf32>
    %213 = tpu.concatenate %211, %212 in 0 : vector<4x128xf32>, vector<12x128xf32> -> vector<16x128xf32>
    %214 = vector.extract_strided_slice %151 {offsets = [112, 0], sizes = [16, 128], strides = [1, 1]} : vector<128x128xf32> to vector<16x128xf32>
    %cst_61 = arith.constant 0.000000e+00 : f32
    %215 = vector.broadcast %cst_61 : f32 to vector<4x128xf32>
    %216 = vector.extract_strided_slice %214 {offsets = [0, 0], sizes = [12, 128], strides = [1, 1]} : vector<16x128xf32> to vector<12x128xf32>
    %217 = tpu.concatenate %215, %216 in 0 : vector<4x128xf32>, vector<12x128xf32> -> vector<16x128xf32>
    %218 = vector.extract_strided_slice %151 {offsets = [80, 0], sizes = [16, 128], strides = [1, 1]} : vector<128x128xf32> to vector<16x128xf32>
    %cst_62 = arith.constant 0.000000e+00 : f32
    %219 = vector.broadcast %cst_62 : f32 to vector<1x128xf32>
    %220 = vector.extract_strided_slice %218 {offsets = [0, 0], sizes = [15, 128], strides = [1, 1]} : vector<16x128xf32> to vector<15x128xf32>
    %221 = tpu.concatenate %219, %220 in 0 : vector<1x128xf32>, vector<15x128xf32> -> vector<16x128xf32>
    %222 = vector.broadcast %172 : vector<16x1xf32> to vector<16x128xf32>
    %223 = arith.mulf %221, %222 : vector<16x128xf32>
    %224 = vector.extract_strided_slice %151 {offsets = [64, 0], sizes = [16, 128], strides = [1, 1]} : vector<128x128xf32> to vector<16x128xf32>
    %225 = vector.extract_strided_slice %151 {offsets = [80, 0], sizes = [16, 128], strides = [1, 1]} : vector<128x128xf32> to vector<16x128xf32>
    %226 = vector.extract_strided_slice %151 {offsets = [112, 0], sizes = [16, 128], strides = [1, 1]} : vector<128x128xf32> to vector<16x128xf32>
    %cst_63 = arith.constant 0.000000e+00 : f32
    %227 = vector.broadcast %cst_63 : f32 to vector<1x128xf32>
    %228 = vector.extract_strided_slice %226 {offsets = [0, 0], sizes = [15, 128], strides = [1, 1]} : vector<16x128xf32> to vector<15x128xf32>
    %229 = tpu.concatenate %227, %228 in 0 : vector<1x128xf32>, vector<15x128xf32> -> vector<16x128xf32>
    %230 = vector.broadcast %172 : vector<16x1xf32> to vector<16x128xf32>
    %231 = arith.mulf %229, %230 : vector<16x128xf32>
    %232 = vector.extract_strided_slice %151 {offsets = [96, 0], sizes = [16, 128], strides = [1, 1]} : vector<128x128xf32> to vector<16x128xf32>
    %233 = vector.extract_strided_slice %151 {offsets = [112, 0], sizes = [16, 128], strides = [1, 1]} : vector<128x128xf32> to vector<16x128xf32>
    %234 = tpu.concatenate %209, %213, %217, %223, %224, %225, %231, %232, %233 in 1 : vector<16x128xf32>, vector<16x128xf32>, vector<16x128xf32>, vector<16x128xf32>, vector<16x128xf32>, vector<16x128xf32>, vector<16x128xf32>, vector<16x128xf32>, vector<16x128xf32> -> vector<16x1152xf32>
    %235 = tpu.concatenate %203, %234 in 0 : vector<16x1152xf32>, vector<16x1152xf32> -> vector<32x1152xf32>
    %236 = arith.truncf %235 : vector<32x1152xf32> to vector<32x1152xbf16>
    %c0_64 = arith.constant 0 : index
    %c0_65 = arith.constant 0 : index
    %237 = vector.load %arg7[%c0_64, %c0_65] : memref<1152x256xbf16, #tpu.memory_space<vmem>>, vector<1152x256xbf16>
    %cst_66 = arith.constant dense<0.000000e+00> : vector<32x256xf32>
    %238 = tpu.matmul %236, %237, %cst_66 {dimension_numbers = #tpu.dot_dimension_numbers<[1], [0], [0], [1], [0, 0, 1, 1], [], []>} : vector<32x1152xbf16>, vector<1152x256xbf16>, vector<32x256xf32> -> vector<32x256xf32>
    %c0_67 = arith.constant 0 : index
    %c0_68 = arith.constant 0 : index
    %239 = vector.load %arg8[%c0_67, %c0_68] : memref<1x256xf32, #tpu.memory_space<vmem>>, vector<1x256xf32>
    %c0_69 = arith.constant 0 : index
    %c0_70 = arith.constant 0 : index
    %240 = vector.load %arg9[%c0_69, %c0_70] : memref<1x256xf32, #tpu.memory_space<vmem>>, vector<1x256xf32>
    %cst_71 = arith.constant dense<0.000000e+00> : vector<256xf32>
    %241 = vector.multi_reduction <add>, %238, %cst_71 [0] : vector<32x256xf32> to vector<256xf32>
    %242 = vector.shape_cast %241 : vector<256xf32> to vector<1x256xf32>
    %cst_72 = arith.constant 3.200000e+01 : f32
    %243 = vector.broadcast %cst_72 : f32 to vector<1x256xf32>
    %244 = arith.divf %242, %243 : vector<1x256xf32>
    %245 = vector.broadcast %244 : vector<1x256xf32> to vector<32x256xf32>
    %246 = arith.subf %238, %245 : vector<32x256xf32>
    %247 = arith.mulf %246, %246 : vector<32x256xf32>
    %cst_73 = arith.constant dense<0.000000e+00> : vector<256xf32>
    %248 = vector.multi_reduction <add>, %247, %cst_73 [0] : vector<32x256xf32> to vector<256xf32>
    %249 = vector.shape_cast %248 : vector<256xf32> to vector<1x256xf32>
    %cst_74 = arith.constant 3.200000e+01 : f32
    %250 = vector.broadcast %cst_74 : f32 to vector<1x256xf32>
    %251 = arith.divf %249, %250 : vector<1x256xf32>
    %cst_75 = arith.constant 9.99999974E-6 : f32
    %252 = vector.broadcast %cst_75 : f32 to vector<1x256xf32>
    %253 = arith.addf %251, %252 : vector<1x256xf32>
    %254 = math.rsqrt %253 : vector<1x256xf32>
    %255 = vector.broadcast %254 : vector<1x256xf32> to vector<32x256xf32>
    %256 = arith.mulf %246, %255 : vector<32x256xf32>
    %257 = vector.broadcast %239 : vector<1x256xf32> to vector<32x256xf32>
    %258 = arith.mulf %256, %257 : vector<32x256xf32>
    %259 = vector.broadcast %240 : vector<1x256xf32> to vector<32x256xf32>
    %260 = arith.addf %258, %259 : vector<32x256xf32>
    %cst_76 = arith.constant 0.000000e+00 : f32
    %261 = vector.broadcast %cst_76 : f32 to vector<32x256xf32>
    %262 = arith.cmpf oge, %260, %261 : vector<32x256xf32>
    %cst_77 = arith.constant 2.000000e-01 : f32
    %263 = vector.broadcast %cst_77 : f32 to vector<32x256xf32>
    %264 = arith.mulf %263, %260 : vector<32x256xf32>
    %265 = arith.select %262, %260, %264 : vector<32x256xi1>, vector<32x256xf32>
    %266 = vector.extract_strided_slice %265 {offsets = [0, 0], sizes = [16, 256], strides = [1, 1]} : vector<32x256xf32> to vector<16x256xf32>
    %c0_78 = arith.constant 0 : index
    %c0_79 = arith.constant 0 : index
    %267 = vector.load %arg11[%c0_78, %c0_79] : memref<16x256xf32, #tpu.memory_space<vmem>>, vector<16x256xf32>
    %268 = arith.mulf %266, %267 : vector<16x256xf32>
    %269 = vector.shape_cast %268 : vector<16x256xf32> to vector<1x16x256xf32>
    %cst_80 = arith.constant dense<0.000000e+00> : vector<1xf32>
    %270 = vector.multi_reduction <add>, %269, %cst_80 [1, 2] : vector<1x16x256xf32> to vector<1xf32>
    %271 = vector.shape_cast %270 : vector<1xf32> to vector<1x1x1xf32>
    %272 = vector.extract %271[0, 0, 0] : f32 from vector<1x1x1xf32>
    %273 = vector.broadcast %272 : f32 to vector<1x1xf32>
    %cst_81 = arith.constant 0.000000e+00 : f32
    %274 = vector.broadcast %cst_81 : f32 to vector<1x1xf32>
    %275 = arith.subf %274, %273 : vector<1x1xf32>
    %276 = math.exp %275 : vector<1x1xf32>
    %cst_82 = arith.constant 1.000000e+00 : f32
    %277 = vector.broadcast %cst_82 : f32 to vector<1x1xf32>
    %278 = arith.addf %277, %276 : vector<1x1xf32>
    %cst_83 = arith.constant 1.000000e+00 : f32
    %279 = vector.broadcast %cst_83 : f32 to vector<1x1xf32>
    %280 = arith.divf %279, %278 : vector<1x1xf32>
    %c0_84 = arith.constant 0 : index
    %c0_85 = arith.constant 0 : index
    %281 = vector.load %arg12[%c0_84, %c0_85] : memref<2x1xf32, #tpu.memory_space<vmem>>, vector<1x1xf32>
    tpu.vector_store %arg12[%c0_84, %c0_85], %280 {strides = array<i32>} : memref<2x1xf32, #tpu.memory_space<vmem>>, vector<1x1xf32>,
    %282 = vector.extract_strided_slice %265 {offsets = [16, 0], sizes = [16, 256], strides = [1, 1]} : vector<32x256xf32> to vector<16x256xf32>
    %c0_86 = arith.constant 0 : index
    %c0_87 = arith.constant 0 : index
    %283 = vector.load %arg11[%c0_86, %c0_87] : memref<16x256xf32, #tpu.memory_space<vmem>>, vector<16x256xf32>
    %284 = arith.mulf %282, %283 : vector<16x256xf32>
    %285 = vector.shape_cast %284 : vector<16x256xf32> to vector<1x16x256xf32>
    %cst_88 = arith.constant dense<0.000000e+00> : vector<1xf32>
    %286 = vector.multi_reduction <add>, %285, %cst_88 [1, 2] : vector<1x16x256xf32> to vector<1xf32>
    %287 = vector.shape_cast %286 : vector<1xf32> to vector<1x1x1xf32>
    %288 = vector.extract %287[0, 0, 0] : f32 from vector<1x1x1xf32>
    %289 = vector.broadcast %288 : f32 to vector<1x1xf32>
    %cst_89 = arith.constant 0.000000e+00 : f32
    %290 = vector.broadcast %cst_89 : f32 to vector<1x1xf32>
    %291 = arith.subf %290, %289 : vector<1x1xf32>
    %292 = math.exp %291 : vector<1x1xf32>
    %cst_90 = arith.constant 1.000000e+00 : f32
    %293 = vector.broadcast %cst_90 : f32 to vector<1x1xf32>
    %294 = arith.addf %293, %292 : vector<1x1xf32>
    %cst_91 = arith.constant 1.000000e+00 : f32
    %295 = vector.broadcast %cst_91 : f32 to vector<1x1xf32>
    %296 = arith.divf %295, %294 : vector<1x1xf32>
    %c1 = arith.constant 1 : index
    %c0_92 = arith.constant 0 : index
    %297 = vector.load %arg12[%c1, %c0_92] : memref<2x1xf32, #tpu.memory_space<vmem>>, vector<1x1xf32>
    tpu.vector_store %arg12[%c1, %c0_92], %296 {strides = array<i32>} : memref<2x1xf32, #tpu.memory_space<vmem>>, vector<1x1xf32>,
    return
  }
}

</mosaic_0001>

<bundles_post_ra>
// kernel: discriminator_forward.1
= control target key start
LH: loop header
LB: loop body
LE: loop exit
PB: predicated region body
PF: predicated region fallthrough
CT: control target
= control target key end

     0   :  { %vm282_vm0 = vcmask 261120   ;;  %vm670_vm1 = vcmask 523264   ;;  %s8911_s1 = inlined_call_operand.vmem [shape: bf16[32,64], index: 1, kind: input, shape index: {}]   ;;  %s8912_s0 = inlined_call_operand.vmem [shape: bf16[512,32], index: 0, kind: input, shape index: {}]   ;;  %s8913_s4 = inlined_call_operand.vmem [shape: bf16[576,128], index: 4, kind: input, shape index: {}]   ;;  %s8914_s2 = inlined_call_operand.vmem [shape: f32[1,64], index: 2, kind: input, shape index: {}]   ;;  %s8915_s3 = inlined_call_operand.vmem [shape: f32[1,64], index: 3, kind: input, shape index: {}]   ;;  %s8916_s10 = inlined_call_operand.vmem [shape: bf16[64,64], index: 10, kind: input, shape index: {}]   ;;  %s8917_s7 = inlined_call_operand.vmem [shape: bf16[1152,256], index: 7, kind: input, shape index: {}]   ;;  %s8918_s5 = inlined_call_operand.vmem [shape: f32[1,128], index: 5, kind: input, shape index: {}]   ;;  %s8919_s6 = inlined_call_operand.vmem [shape: f32[1,128], index: 6, kind: input, shape index: {}]   ;;  %s8920_s8 = inlined_call_operand.vmem [shape: f32[1,256], index: 8, kind: input, shape index: {}]   ;;  %s8921_s9 = inlined_call_operand.vmem [shape: f32[1,256], index: 9, kind: input, shape index: {}]   ;;  %s8922_s11 = inlined_call_operand.vmem [shape: f32[16,256], index: 11, kind: input, shape index: {}]   ;;  %s8923_s12 = inlined_call_operand.vmem [shape: f32[2,1], index: 12, kind: output, shape index: {}]  }
   0x1   :  { %v5226_v0 = vld [vmem:[%s8911_s1 + $0x8] sm:$0xff]   ;;  %v5227_v1 = vld [vmem:[%s8911_s1] sm:$0xff]   ;;  %v5230_v4 = vld [vmem:[%s8912_s0 + $0x10] sm:$0xff]  }
   0x2   :  { %4975 = vmatprep.subr.bf16.mxu0 %v5226_v0  ;;  %v5228_v2 = vld [vmem:[%s8912_s0] sm:$0xff]   ;;  %5099 = vmatprep.subr.bf16.mxu1 %v5226_v0  ;;  %v5229_v3 = vld [vmem:[%s8912_s0 + $0x8] sm:$0xff]   ;;  %v5231_v5 = vld [vmem:[%s8912_s0 + $0x18] sm:$0xff]  }
   0x3   :  { %4976 = vmatpush3.bf16.msra.mxu0 %v5226_v0  ;;  %5101 = vmatpush3.bf16.msra.mxu1 %v5226_v0  ;;  %v5232_v6 = vld [vmem:[%s8912_s0 + $0x20] sm:$0xff]   ;;  %v5233_v7 = vld [vmem:[%s8912_s0 + $0x28] sm:$0xff]   ;;  %v5234_v8 = vld [vmem:[%s8912_s0 + $0x30] sm:$0xff]  }
   0x4   :  { %4977 = vmatprep.subr.bf16.mxu0 %v5227_v1  ;;  %4979 = vmatprep.mubr.msk.bf16.mxu0 %vm282_vm0, %v5228_v2  ;;  %v5250_v9 = vld [vmem:[%s8912_s0 + $0xb0] sm:$0xff]   ;;  %v5251_v10 = vld [vmem:[%s8912_s0 + $0xb8] sm:$0xff]   ;;  %v5252_v11 = vld [vmem:[%s8912_s0 + $0xc0] sm:$0xff]  }
   0x5   :  { %5100 = vmatprep.subr.bf16.mxu1 %v5227_v1  ;;  %5023 = vmatprep.mubr.msk.bf16.mxu1 %vm282_vm0, %v5250_v9  ;;  %v5235_v12 = vld [vmem:[%s8912_s0 + $0x38] sm:$0xff]   ;;  %v5236_v13 = vld [vmem:[%s8912_s0 + $0x40] sm:$0xff]   ;;  %v5253_v14 = vld [vmem:[%s8912_s0 + $0xc8] sm:$0xff]  }
   0x6   :  { %v5254_v15 = vld [vmem:[%s8912_s0 + $0xd0] sm:$0xff]   ;;  %v5237_v16 = vld [vmem:[%s8912_s0 + $0x48] sm:$0xff]   ;;  %v5255_v18 = vld [vmem:[%s8912_s0 + $0xd8] sm:$0xff]  }
   0x7   :  { %4978 = vmatpush3.bf16.msra.mxu0 %v5227_v1  ;;  %5102 = vmatpush3.bf16.msra.mxu1 %v5227_v1  ;;  %v5238_v17 = vld [vmem:[%s8912_s0 + $0x50] sm:$0xff]   ;;  %v5256_v19 = vld [vmem:[%s8912_s0 + $0xe0] sm:$0xff]   ;;  %v5239_v20 = vld [vmem:[%s8912_s0 + $0x58] sm:$0xff]  }
   0x8   :  { %v5240_v21 = vld [vmem:[%s8912_s0 + $0x60] sm:$0xff]   ;;  %v5257_v22 = vld [vmem:[%s8912_s0 + $0xe8] sm:$0xff]   ;;  %v5258_v23 = vld [vmem:[%s8912_s0 + $0xf0] sm:$0xff]  }
   0x9   :  { %v5241_v24 = vld [vmem:[%s8912_s0 + $0x68] sm:$0xff]   ;;  %v5242_v25 = vld [vmem:[%s8912_s0 + $0x70] sm:$0xff]   ;;  %v5259_v26 = vld [vmem:[%s8912_s0 + $0xf8] sm:$0xff]  }
   0xa   :  { %4980 = vmatmul.mubr.msk.bf16.vlgmr.msra.gmra.mxu0 %vm282_vm0, %v5229_v3  ;;  %5024 = vmatmul.mubr.msk.bf16.vlgmr.msra.gmra.mxu1 %vm282_vm0, %v5251_v10  ;;  %v5243_v27 = vld [vmem:[%s8912_s0 + $0x78] sm:$0xff]   ;;  %v5244_v28 = vld [vmem:[%s8912_s0 + $0x80] sm:$0xff]   ;;  %v5245_v29 = vld [vmem:[%s8912_s0 + $0x88] sm:$0xff]  }
   0xb   :  { %4983 = vmatprep.mubr.msk.bf16.mxu0 %vm282_vm0, %v5230_v4  ;;  %5027 = vmatprep.mubr.msk.bf16.mxu1 %vm282_vm0, %v5252_v11  ;;  %v5246_v30 = vld [vmem:[%s8912_s0 + $0x90] sm:$0xff]   ;;  %v5247_v31 = vld [vmem:[%s8912_s0 + $0x98] sm:$0xff]   ;;  %v5248_v32 = vld [vmem:[%s8912_s0 + $0xa0] sm:$0xff]  }
   0xc   :  { %v5249_v33 = vld [vmem:[%s8912_s0 + $0xa8] sm:$0xff]   ;;  %s5533_s0 = smov 64  }
  0x12   :  { %4984 = vmatmul.mubr.msk.bf16.gmra.mxu0 %vm282_vm0, %v5231_v5  ;;  %5028 = vmatmul.mubr.msk.bf16.gmra.mxu1 %vm282_vm0, %v5253_v14 }
  0x13   :  { %4987 = vmatprep.mubr.msk.bf16.mxu0 %vm282_vm0, %v5232_v6  ;;  %5031 = vmatprep.mubr.msk.bf16.mxu1 %vm282_vm0, %v5254_v15 }
  0x1a   :  { %4988 = vmatmul.mubr.msk.bf16.gmra.mxu0 %vm282_vm0, %v5233_v7  ;;  %5032 = vmatmul.mubr.msk.bf16.gmra.mxu1 %vm282_vm0, %v5255_v18 }
  0x1b   :  { %4991 = vmatprep.mubr.msk.bf16.mxu0 %vm282_vm0, %v5234_v8  ;;  %5035 = vmatprep.mubr.msk.bf16.mxu1 %vm282_vm0, %v5256_v19 }
  0x22   :  { %4992 = vmatmul.mubr.msk.bf16.gmra.mxu0 %vm282_vm0, %v5235_v12  ;;  %5036 = vmatmul.mubr.msk.bf16.gmra.mxu1 %vm282_vm0, %v5257_v22 }
  0x23   :  { %4995 = vmatprep.mubr.msk.bf16.mxu0 %vm282_vm0, %v5236_v13  ;;  %5039 = vmatprep.mubr.msk.bf16.mxu1 %vm282_vm0, %v5258_v23 }
  0x2a   :  { %4996 = vmatmul.mubr.msk.bf16.gmra.mxu0 %vm282_vm0, %v5237_v16  ;;  %5040 = vmatmul.mubr.msk.bf16.gmra.mxu1 %vm282_vm0, %v5259_v26 }
  0x2b   :  { %4999 = vmatprep.mubr.msk.bf16.mxu0 %vm282_vm0, %v5238_v17 }
  0x32   :  { %5000 = vmatmul.mubr.msk.bf16.gmra.mxu0 %vm282_vm0, %v5239_v20 }
  0x33   :  { %5003 = vmatprep.mubr.msk.bf16.mxu0 %vm282_vm0, %v5240_v21 }
  0x3a   :  { %5004 = vmatmul.mubr.msk.bf16.gmra.mxu0 %vm282_vm0, %v5241_v24 }
  0x3b   :  { %5007 = vmatprep.mubr.msk.bf16.mxu0 %vm282_vm0, %v5242_v25 }
  0x42   :  { %5008 = vmatmul.mubr.msk.bf16.gmra.mxu0 %vm282_vm0, %v5243_v27 }
  0x43   :  { %5011 = vmatprep.mubr.msk.bf16.mxu0 %vm282_vm0, %v5244_v28 }
  0x4a   :  { %5012 = vmatmul.mubr.msk.bf16.gmra.mxu0 %vm282_vm0, %v5245_v29 }
  0x4b   :  { %5015 = vmatprep.mubr.msk.bf16.mxu0 %vm282_vm0, %v5246_v30 }
  0x52   :  { %5016 = vmatmul.mubr.msk.bf16.gmra.mxu0 %vm282_vm0, %v5247_v31 }
  0x53   :  { %5019 = vmatprep.mubr.msk.bf16.mxu0 %vm282_vm0, %v5248_v32 }
  0x5a   :  { %5020 = vmatmul.mubr.msk.bf16.gmra.mxu0 %vm282_vm0, %v5249_v33  ;;  %vm1602_vm0 = vcmask 1040384  }
  0xca   :  { %v5735_v34 = vpop.f32.mrf.mxu0 }
  0xcb   :  { %v674_v42 = vsel %vm670_vm1, %v5735_v34, 0.0 }
  0xcc   :  { %v5737_v35 = vpop.f32.mrf.mxu0 }
  0xcd   :  { %v671_v38 = vsel %vm670_vm1, %v5737_v35, 0.0 }
  0xce   :  { %v5739_v36 = vpop.f32.mrf.mxu0 }
  0xcf   :  { %v676_v45 = vsel %vm670_vm1, %v5739_v36, 0.0 }
  0xd0   :  { %v5741_v37 = vpop.f32.mrf.mxu0 }
  0xd1   :  { %v672_v39 = vsel %vm670_vm1, %v5741_v37, 0.0 }
  0xd2   :  { %v673_v40 = vadd.f32 %v672_v39, %v671_v38  ;;  %v5747_v41 = vpop.f32.mrf.mxu0 }
  0xd3   :  { %v682_v54 = vsel %vm670_vm1, %v5747_v41, 0.0 }
  0xd4   :  { %v675_v43 = vadd.f32 %v674_v42, %v673_v40  ;;  %v5751_v44 = vpop.f32.mrf.mxu0 }
  0xd5   :  { %v678_v48 = vsel %vm670_vm1, %v5751_v44, 0.0 }
  0xd6   :  { %v677_v46 = vadd.f32 %v676_v45, %v675_v43  ;;  %v5755_v47 = vpop.f32.mrf.mxu0 }
  0xd7   :  { %v684_v57 = vsel %vm670_vm1, %v5755_v47, 0.0 }
  0xd8   :  { %v679_v49 = vadd.f32 %v678_v48, %v677_v46  ;;  %v5759_v50 = vpop.f32.mrf.mxu0 }
  0xd9   :  { %v680_v51 = vsel %vm670_vm1, %v5759_v50, 0.0 }
  0xda   :  { %v681_v52 = vadd.f32 %v680_v51, %v679_v49  ;;  %v5763_v53 = vpop.f32.mrf.mxu0 }
  0xdb   :  { %v690_v2 = vsel %vm670_vm1, %v5763_v53, 0.0 }
  0xdc   :  { %v683_v55 = vadd.f32 %v682_v54, %v681_v52  ;;  %v5767_v56 = vpop.f32.mrf.mxu0  ;;  %v5837_v52 = vpop.f32.mrf.mxu1 }
  0xdd   :  { %v686_v60 = vsel %vm670_vm1, %v5767_v56, 0.0  ;;  %9019 = vst [vmem:[#allocation2_spill] sm:$0xff] %v5837_v52 }
  0xde   :  { %v685_v58 = vadd.f32 %v684_v57, %v683_v55  ;;  %v5771_v59 = vpop.f32.mrf.mxu0 }
  0xdf   :  { %v692_v5 = vsel %vm670_vm1, %v5771_v59, 0.0 }
  0xe0   :  { %v687_v61 = vadd.f32 %v686_v60, %v685_v58  ;;  %v5775_v62 = vpop.f32.mrf.mxu0 }
  0xe1   :  { %v688_v63 = vsel %vm670_vm1, %v5775_v62, 0.0 }
  0xe2   :  { %v689_v0 = vadd.f32 %v688_v63, %v687_v61  ;;  %v5779_v1 = vpop.f32.mrf.mxu0  ;;  %v5847_v63 = vpop.f32.mrf.mxu1 }
  0xe3   :  { %v698_v14 = vsel %vm670_vm1, %v5779_v1, 0.0  ;;  %9020 = vst [vmem:[#allocation3_spill] sm:$0xff] %v5847_v63 }
  0xe4   :  { %v691_v3 = vadd.f32 %v690_v2, %v689_v0  ;;  %v5783_v4 = vpop.f32.mrf.mxu0 }
  0xe5   :  { %v694_v8 = vsel %vm670_vm1, %v5783_v4, 0.0 }
  0xe6   :  { %v693_v6 = vadd.f32 %v692_v5, %v691_v3  ;;  %v5787_v7 = vpop.f32.mrf.mxu0 }
  0xe7   :  { %v700_v17 = vsel %vm670_vm1, %v5787_v7, 0.0 }
  0xe8   :  { %v695_v9 = vadd.f32 %v694_v8, %v693_v6  ;;  %v5791_v10 = vpop.f32.mrf.mxu0 }
  0xe9   :  { %v696_v11 = vsel %vm670_vm1, %v5791_v10, 0.0 }
  0xea   :  { %v697_v12 = vadd.f32 %v696_v11, %v695_v9  ;;  %v5795_v13 = vpop.f32.mrf.mxu0  ;;  %v5857_v9 = vpop.f32.mrf.mxu1 }
  0xeb   :  { %v706_v26 = vsel %vm670_vm1, %v5795_v13, 0.0 }
  0xec   :  { %v699_v15 = vadd.f32 %v698_v14, %v697_v12  ;;  %v5799_v16 = vpop.f32.mrf.mxu0 }
  0xed   :  { %v702_v20 = vsel %vm670_vm1, %v5799_v16, 0.0 }
  0xee   :  { %v701_v18 = vadd.f32 %v700_v17, %v699_v15  ;;  %v5803_v19 = vpop.f32.mrf.mxu0 }
  0xef   :  { %v708_v29 = vsel %vm670_vm1, %v5803_v19, 0.0 }
  0xf0   :  { %v703_v21 = vadd.f32 %v702_v20, %v701_v18  ;;  %v5807_v22 = vpop.f32.mrf.mxu0  ;;  %v5867_v20 = vpop.f32.mrf.mxu1 }
  0xf1   :  { %v704_v23 = vsel %vm670_vm1, %v5807_v22, 0.0 }
  0xf2   :  { %v705_v24 = vadd.f32 %v704_v23, %v703_v21  ;;  %v5811_v25 = vpop.f32.mrf.mxu0 }
  0xf3   :  { %v714_v43 = vsel %vm670_vm1, %v5811_v25, 0.0 }
  0xf4   :  { %v707_v27 = vadd.f32 %v706_v26, %v705_v24  ;;  %v5815_v28 = vpop.f32.mrf.mxu0 }
  0xf5   :  { %v710_v32 = vsel %vm670_vm1, %v5815_v28, 0.0 }
  0xf6   :  { %v709_v30 = vadd.f32 %v708_v29, %v707_v27  ;;  %v5819_v31 = vpop.f32.mrf.mxu0 }
  0xf7   :  { %v716_v48 = vsel %vm670_vm1, %v5819_v31, 0.0 }
  0xf8   :  { %v711_v33 = vadd.f32 %v710_v32, %v709_v30  ;;  %v5823_v38 = vpop.f32.mrf.mxu0  ;;  %v5877_v30 = vpop.f32.mrf.mxu1 }
  0xf9   :  { %v712_v39 = vsel %vm670_vm1, %v5823_v38, 0.0  ;;  %9021 = vst [vmem:[#allocation4_spill] sm:$0xff] %v5877_v30 }
  0xfa   :  { %v713_v40 = vadd.f32 %v712_v39, %v711_v33  ;;  %v5827_v42 = vpop.f32.mrf.mxu0 }
  0xfb   :  { %v722_v0 = vsel %vm670_vm1, %v5827_v42, 0.0 }
  0xfc   :  { %v715_v45 = vadd.f32 %v714_v43, %v713_v40  ;;  %v5831_v46 = vpop.f32.mrf.mxu0 }
  0xfd   :  { %v718_v54 = vsel %vm670_vm1, %v5831_v46, 0.0 }
  0xfe   :  { %v717_v49 = vadd.f32 %v716_v48, %v715_v45  ;;  %v5835_v51 = vpop.f32.mrf.mxu0  ;;  %v5887_v48 = vpop.f32.mrf.mxu1 }
  0xff   :  { %v724_v5 = vsel %vm670_vm1, %v5835_v51, 0.0  ;;  %9022 = vst [vmem:[#allocation5_spill] sm:$0xff] %v5887_v48 }
 0x100   :  { %v719_v55 = vadd.f32 %v718_v54, %v717_v49  ;;  %v5841_v57 = vpop.f32.mrf.mxu0 }
 0x101   :  { %v720_v58 = vsel %vm670_vm1, %v5841_v57, 0.0 }
 0x102   :  { %v721_v60 = vadd.f32 %v720_v58, %v719_v55  ;;  %v5845_v61 = vpop.f32.mrf.mxu0 }
 0x103   :  { %v730_v21 = vsel %vm670_vm1, %v5845_v61, 0.0 }
 0x104   :  { %v723_v2 = vadd.f32 %v722_v0, %v721_v60  ;;  %v5851_v3 = vpop.f32.mrf.mxu0 }
 0x105   :  { %v726_v11 = vsel %vm670_vm1, %v5851_v3, 0.0 }
 0x106   :  { %v725_v6 = vadd.f32 %v724_v5, %v723_v2  ;;  %v5855_v8 = vpop.f32.mrf.mxu0  ;;  %v5897_v2 = vpop.f32.mrf.mxu1 }
 0x107   :  { %v732_v26 = vsel %vm670_vm1, %v5855_v8, 0.0 }
 0x108   :  { %v727_v12 = vadd.f32 %v726_v11, %v725_v6  ;;  %v5861_v14 = vpop.f32.mrf.mxu0 }
 0x109   :  { %v728_v15 = vsel %vm670_vm1, %v5861_v14, 0.0 }
 0x10a   :  { %v729_v17 = vadd.f32 %v728_v15, %v727_v12  ;;  %v5865_v18 = vpop.f32.mrf.mxu0 }
 0x10b   :  { %v738_v49 = vsel %vm670_vm1, %v5865_v18, 0.0 }
 0x10c   :  { %v731_v23 = vadd.f32 %v730_v21, %v729_v17  ;;  %v5871_v24 = vpop.f32.mrf.mxu0  ;;  %v5907_v21 = vpop.f32.mrf.mxu1 }
 0x10d   :  { %v734_v32 = vsel %vm670_vm1, %v5871_v24, 0.0 }
 0x10e   :  { %v733_v27 = vadd.f32 %v732_v26, %v731_v23  ;;  %v5875_v29 = vpop.f32.mrf.mxu0 }
 0x10f   :  { %v740_v58 = vsel %vm670_vm1, %v5875_v29, 0.0 }
 0x110   :  { %v735_v33 = vadd.f32 %v734_v32, %v733_v27  ;;  %v5881_v39 = vpop.f32.mrf.mxu0 }
 0x111   :  { %v736_v40 = vsel %vm670_vm1, %v5881_v39, 0.0 }
 0x112   :  { %v737_v43 = vadd.f32 %v736_v40, %v735_v33  ;;  %v5885_v45 = vpop.f32.mrf.mxu0 }
 0x113   :  { %v746_v23 = vsel %vm670_vm1, %v5885_v45, 0.0 }
 0x114   :  { %v739_v54 = vadd.f32 %v738_v49, %v737_v43  ;;  %v5891_v55 = vpop.f32.mrf.mxu0  ;;  %v5917_v43 = vpop.f32.mrf.mxu1 }
 0x115   :  { %v742_v5 = vsel %vm670_vm1, %v5891_v55, 0.0  ;;  %9024 = vst [vmem:[#allocation7_spill] sm:$0xff] %v5917_v43 }
 0x116   :  { %v741_v60 = vadd.f32 %v740_v58, %v739_v54  ;;  %v5895_v0 = vpop.f32.mrf.mxu0 }
 0x117   :  { %v748_v32 = vsel %vm670_vm1, %v5895_v0, 0.0 }
 0x118   :  { %v743_v6 = vadd.f32 %v742_v5, %v741_v60  ;;  %v5901_v11 = vpop.f32.mrf.mxu0 }
 0x119   :  { %v744_v12 = vsel %vm670_vm1, %v5901_v11, 0.0 }
 0x11a   :  { %v745_v15 = vadd.f32 %v744_v12, %v743_v6  ;;  %v5905_v17 = vpop.f32.mrf.mxu0  ;;  %v5925_v6 = vpop.f32.mrf.mxu1 }
 0x11b   :  { %9023 = vst [vmem:[#allocation6_spill] sm:$0xff] %v5905_v17  ;;  %9026 = vst [vmem:[#allocation9_spill] sm:$0xff] %v5925_v6  ;;  %v754_v12 = vsel %vm670_vm1, %v5905_v17, 0.0  ;;  %v762_v17 = vsel %vm670_vm1, %v5837_v52, 0.0  ;;  %v770_v52 = vsel %vm670_vm1, %v5877_v30, 0.0  ;;  %v778_v30 = vsel %vm670_vm1, %v5917_v43, 0.0 }
 0x11c   :  { %v747_v26 = vadd.f32 %v746_v23, %v745_v15  ;;  %v5911_v27 = vpop.f32.mrf.mxu0 }
 0x11d   :  { %v750_v49 = vsel %vm670_vm1, %v5911_v27, 0.0 }
 0x11e   :  { %v749_v33 = vadd.f32 %v748_v32, %v747_v26  ;;  %v5915_v40 = vpop.f32.mrf.mxu0  ;;  %v5931_v32 = vpop.f32.mrf.mxu1 }
 0x11f   :  { %v756_v23 = vsel %vm670_vm1, %v5915_v40, 0.0  ;;  %9027 = vst [vmem:[#allocation10_spill] sm:$0xff] %v5931_v32 }
 0x120   :  { %v751_v54 = vadd.f32 %v750_v49, %v749_v33  ;;  %v5921_v58 = vpop.f32.mrf.mxu0  ;;  %v758_v33 = vsel %vm670_vm1, %v5847_v63, 0.0  ;;  %v766_v63 = vsel %vm670_vm1, %v5887_v48, 0.0  ;;  %v774_v48 = vsel %vm670_vm1, %v5925_v6, 0.0 }
 0x121   :  { %9025 = vst [vmem:[#allocation8_spill] sm:$0xff] %v5921_v58  ;;  %v752_v60 = vsel %vm670_vm1, %v5921_v58, 0.0  ;;  %v760_v58 = vsel %vm670_vm1, %v5867_v20, 0.0 }
 0x122   :  { %v753_v5 = vadd.f32 %v752_v60, %v751_v54  ;;  %v5937_v60 = vpop.f32.mrf.mxu1 }
 0x124   :  { %v755_v15 = vadd.f32 %v754_v12, %v753_v5  ;;  %v764_v12 = vsel %vm670_vm1, %v5857_v9, 0.0 }
 0x126   :  { %v757_v26 = vadd.f32 %v756_v23, %v755_v15  ;;  %v5943_v23 = vpop.f32.mrf.mxu1 }
 0x127   :  { %9028 = vst [vmem:[#allocation11_spill] sm:$0xff] %v5943_v23  ;;  %v786_v43 = vsel %vm670_vm1, %v5943_v23, 0.0 }
 0x128   :  { %v759_v49 = vadd.f32 %v758_v33, %v757_v26  ;;  %v768_v33 = vsel %vm670_vm1, %v5907_v21, 0.0 }
 0x12a   :  { %v761_v54 = vadd.f32 %v760_v58, %v759_v49  ;;  %v5949_v49 = vpop.f32.mrf.mxu1 }
 0x12b   :  { %9029 = vst [vmem:[#allocation12_spill] sm:$0xff] %v5949_v49  ;;  %v782_v6 = vsel %vm670_vm1, %v5949_v49, 0.0 }
 0x12c   :  { %v763_v5 = vadd.f32 %v762_v17, %v761_v54  ;;  %v772_v54 = vsel %vm670_vm1, %v5897_v2, 0.0 }
 0x12e   :  { %v765_v15 = vadd.f32 %v764_v12, %v763_v5  ;;  %v5955_v12 = vpop.f32.mrf.mxu1 }
 0x12f   :  { %9030 = vst [vmem:[#allocation13_spill] sm:$0xff] %v5955_v12 }
 0x130   :  { %v767_v26 = vadd.f32 %v766_v63, %v765_v15  ;;  %v776_v15 = vsel %vm670_vm1, %v5937_v60, 0.0 }
 0x132   :  { %v769_v58 = vadd.f32 %v768_v33, %v767_v26  ;;  %v5961_v33 = vpop.f32.mrf.mxu1 }
 0x133   :  { %9031 = vst [vmem:[#allocation14_spill] sm:$0xff] %v5961_v33 }
 0x134   :  { %v771_v17 = vadd.f32 %v770_v52, %v769_v58  ;;  %v780_v58 = vsel %vm670_vm1, %v5931_v32, 0.0 }
 0x136   :  { %v773_v5 = vadd.f32 %v772_v54, %v771_v17  ;;  %v5967_v54 = vpop.f32.mrf.mxu1 }
 0x137   :  { %v794_v23 = vsel %vm670_vm1, %v5967_v54, 0.0 }
 0x138   :  { %v775_v63 = vadd.f32 %v774_v48, %v773_v5  ;;  %v784_v5 = vsel %vm670_vm1, %v5961_v33, 0.0 }
 0x13a   :  { %v777_v26 = vadd.f32 %v776_v15, %v775_v63  ;;  %v5973_v15 = vpop.f32.mrf.mxu1 }
 0x13b   :  { %9032 = vst [vmem:[#allocation15_spill] sm:$0xff] %v5973_v15  ;;  %v790_v49 = vsel %vm670_vm1, %v5973_v15, 0.0 }
 0x13c   :  { %v779_v52 = vadd.f32 %v778_v30, %v777_v26  ;;  %v788_v26 = vsel %vm670_vm1, %v5955_v12, 0.0 }
 0x13e   :  { %v781_v17 = vadd.f32 %v780_v58, %v779_v52  ;;  %v5979_v58 = vpop.f32.mrf.mxu1 }
 0x140   :  { %v783_v48 = vadd.f32 %v782_v6, %v781_v17  ;;  %v5983_v17 = vpop.f32.mrf.mxu1 }
 0x141   :  { %9033 = vst [vmem:[#allocation16_spill] sm:$0xff] %v5983_v17 }
 0x142   :  { %v785_v63 = vadd.f32 %v784_v5, %v783_v48  ;;  %v792_v48 = vsel %vm670_vm1, %v5983_v17, 0.0 }
 0x144   :  { %v787_v30 = vadd.f32 %v786_v43, %v785_v63  ;;  %v796_v63 = vsel %vm670_vm1, %v5979_v58, 0.0 }
 0x146   :  { %v789_v52 = vadd.f32 %v788_v26, %v787_v30 }
 0x148   :  { %v791_v6 = vadd.f32 %v790_v49, %v789_v52 }
 0x14a   :  { %v793_v5 = vadd.f32 %v792_v48, %v791_v6 }
 0x14c   :  { %v795_v43 = vadd.f32 %v794_v23, %v793_v5 }
 0x14e   :  { %v797_v30 = vadd.f32 %v796_v63, %v795_v43 }
 0x150   :  { %v798_v26 = vrot.slane %v797_v30, 4 }
 0x152   :  { %v799_v12 = vadd.f32 %v798_v26, %v797_v30 }
 0x154   :  { %v800_v33 = vrot.slane %v799_v12, 2 }
 0x156   :  { %v801_v32 = vadd.f32 %v800_v33, %v799_v12 }
 0x158   :  { %v802_v15 = vrot.slane %v801_v32, 1 }
 0x15a   :  { %v803_v49 = vadd.f32 %v802_v15, %v801_v32 }
 0x15c   :  { %v5991_v52 = vmul.f32 0.001953125, %v803_v49 }
 0x15e   :  { %v5995_v17 = vsub.f32 %v5737_v35, %v5991_v52  ;;  %v5999_v6 = vsub.f32 %v5741_v37, %v5991_v52  ;;  %v6003_v23 = vsub.f32 %v5735_v34, %v5991_v52  ;;  %v6007_v48 = vsub.f32 %v5739_v36, %v5991_v52 }
 0x15f   :  { %v6015_v35 = vsub.f32 %v5751_v44, %v5991_v52  ;;  %v6021_v34 = vsub.f32 %v5759_v50, %v5991_v52  ;;  %v6029_v43 = vsub.f32 %v5747_v41, %v5991_v52  ;;  %v6036_v50 = vsub.f32 %v5755_v47, %v5991_v52 }
 0x160   :  { %v870_v32 = vmul.f32 %v5995_v17, %v5995_v17  ;;  %v871_v12 = vmul.f32 %v5999_v6, %v5999_v6  ;;  %v872_v37 = vmul.f32 %v6003_v23, %v6003_v23  ;;  %v873_v36 = vmul.f32 %v6007_v48, %v6007_v48 }
 0x161   :  { %v874_v44 = vmul.f32 %v6015_v35, %v6015_v35  ;;  %v875_v26 = vmul.f32 %v6021_v34, %v6021_v34  ;;  %v6043_v41 = vsub.f32 %v5767_v56, %v5991_v52  ;;  %v6050_v47 = vsub.f32 %v5775_v62, %v5991_v52 }
 0x162   :  { %v934_v33 = vsel %vm670_vm1, %v870_v32, 0.0  ;;  %v935_v15 = vsel %vm670_vm1, %v871_v12, 0.0  ;;  %v937_v63 = vsel %vm670_vm1, %v872_v37, 0.0  ;;  %v939_v49 = vsel %vm670_vm1, %v873_v36, 0.0 }
 0x163   :  { %v936_v5 = vadd.f32 %v935_v15, %v934_v33  ;;  %v876_v12 = vmul.f32 %v6029_v43, %v6029_v43  ;;  %v941_v37 = vsel %vm670_vm1, %v874_v44, 0.0  ;;  %v877_v15 = vmul.f32 %v6036_v50, %v6036_v50 }
 0x164   :  { %v943_v36 = vsel %vm670_vm1, %v875_v26, 0.0  ;;  %v6057_v56 = vsub.f32 %v5763_v53, %v5991_v52  ;;  %v6064_v62 = vsub.f32 %v5771_v59, %v5991_v52  ;;  %v6071_v53 = vsub.f32 %v5783_v4, %v5991_v52 }
 0x165   :  { %v938_v30 = vadd.f32 %v937_v63, %v936_v5  ;;  %v878_v63 = vmul.f32 %v6043_v41, %v6043_v41  ;;  %v945_v44 = vsel %vm670_vm1, %v876_v12, 0.0  ;;  %v947_v26 = vsel %vm670_vm1, %v877_v15, 0.0 }
 0x166   :  { %v6078_v59 = vsub.f32 %v5791_v10, %v5991_v52  ;;  %v6085_v4 = vsub.f32 %v5779_v1, %v5991_v52  ;;  %v6092_v10 = vsub.f32 %v5787_v7, %v5991_v52  ;;  %v6099_v1 = vsub.f32 %v5799_v16, %v5991_v52 }
 0x167   :  { %v940_v32 = vadd.f32 %v939_v49, %v938_v30  ;;  %v879_v49 = vmul.f32 %v6050_v47, %v6050_v47  ;;  %v949_v12 = vsel %vm670_vm1, %v878_v63, 0.0  ;;  %v6106_v7 = vsub.f32 %v5807_v22, %v5991_v52 }
 0x168   :  { %v6113_v16 = vsub.f32 %v5795_v13, %v5991_v52  ;;  %v6132_v13 = vsub.f32 %v5811_v25, %v5991_v52  ;;  %v6151_v25 = vsub.f32 %v5827_v42, %v5991_v52  ;;  %v6170_v42 = vsub.f32 %v5845_v61, %v5991_v52 }
 0x169   :  { %v942_v33 = vadd.f32 %v941_v37, %v940_v32  ;;  %v880_v37 = vmul.f32 %v6057_v56, %v6057_v56  ;;  %v951_v15 = vsel %vm670_vm1, %v879_v49, 0.0 }
 0x16a   :  { %9035 = vst [vmem:[#allocation18_spill] sm:$0xff] %v6132_v13  ;;  %9039 = vst [vmem:[#allocation22_spill] sm:$0xff] %v6151_v25 }
 0x16b   :  { %v944_v5 = vadd.f32 %v943_v36, %v942_v33  ;;  %v881_v36 = vmul.f32 %v6064_v62, %v6064_v62  ;;  %v953_v63 = vsel %vm670_vm1, %v880_v37, 0.0  ;;  %9043 = vst [vmem:[#allocation26_spill] sm:$0xff] %v6170_v42 }
 0x16d   :  { %v946_v30 = vadd.f32 %v945_v44, %v944_v5  ;;  %v882_v44 = vmul.f32 %v6071_v53, %v6071_v53  ;;  %v955_v49 = vsel %vm670_vm1, %v881_v36, 0.0 }
 0x16f   :  { %v948_v32 = vadd.f32 %v947_v26, %v946_v30  ;;  %v883_v26 = vmul.f32 %v6078_v59, %v6078_v59  ;;  %v957_v37 = vsel %vm670_vm1, %v882_v44, 0.0  ;;  %v886_v44 = vmul.f32 %v6099_v1, %v6099_v1 }
 0x171   :  { %v950_v33 = vadd.f32 %v949_v12, %v948_v32  ;;  %v884_v12 = vmul.f32 %v6085_v4, %v6085_v4  ;;  %v959_v36 = vsel %vm670_vm1, %v883_v26, 0.0  ;;  %v6128_v26 = vsub.f32 %v5823_v38, %v5991_v52 }
 0x172   :  { %v6147_v38 = vsub.f32 %v5841_v57, %v5991_v52  ;;  %v888_v57 = vmul.f32 %v6113_v16, %v6113_v16 }
 0x173   :  { %v952_v5 = vadd.f32 %v951_v15, %v950_v33  ;;  %v885_v15 = vmul.f32 %v6092_v10, %v6092_v10  ;;  %v961_v22 = vsel %vm670_vm1, %v884_v12, 0.0  ;;  %9034 = vst [vmem:[#allocation17_spill] sm:$0xff] %v6128_v26 }
 0x174   :  { %9038 = vst [vmem:[#allocation21_spill] sm:$0xff] %v6147_v38 }
 0x175   :  { %v954_v30 = vadd.f32 %v953_v63, %v952_v5  ;;  %v6117_v63 = vsub.f32 %v5803_v19, %v5991_v52  ;;  %v6136_v19 = vsub.f32 %v5819_v31, %v5991_v52  ;;  %v963_v12 = vsel %vm670_vm1, %v885_v15, 0.0 }
 0x176   :  { %v6155_v31 = vsub.f32 %v5835_v51, %v5991_v52  ;;  %v965_v15 = vsel %vm670_vm1, %v886_v44, 0.0  ;;  %v6174_v51 = vsub.f32 %v5855_v8, %v5991_v52  ;;  %v891_v8 = vmul.f32 %v6128_v26, %v6128_v26 }
 0x177   :  { %v956_v32 = vadd.f32 %v955_v49, %v954_v30  ;;  %v6124_v30 = vsub.f32 %v5815_v28, %v5991_v52  ;;  %9036 = vst [vmem:[#allocation19_spill] sm:$0xff] %v6136_v19  ;;  %v887_v28 = vmul.f32 %v6106_v7, %v6106_v7 }
 0x178   :  { %9040 = vst [vmem:[#allocation23_spill] sm:$0xff] %v6155_v31  ;;  %9044 = vst [vmem:[#allocation27_spill] sm:$0xff] %v6174_v51 }
 0x179   :  { %v958_v33 = vadd.f32 %v957_v37, %v956_v32  ;;  %v6140_v32 = vsub.f32 %v5831_v46, %v5991_v52  ;;  %v6159_v46 = vsub.f32 %v5851_v3, %v5991_v52  ;;  %v6178_v3 = vsub.f32 %v5871_v24, %v5991_v52 }
 0x17a   :  { %v890_v61 = vmul.f32 %v6124_v30, %v6124_v30  ;;  %v967_v44 = vsel %vm670_vm1, %v887_v28, 0.0  ;;  %v892_v24 = vmul.f32 %v6132_v13, %v6132_v13  ;;  %v969_v28 = vsel %vm670_vm1, %v888_v57, 0.0 }
 0x17b   :  { %v960_v5 = vadd.f32 %v959_v36, %v958_v33  ;;  %9037 = vst [vmem:[#allocation20_spill] sm:$0xff] %v6140_v32  ;;  %9041 = vst [vmem:[#allocation24_spill] sm:$0xff] %v6159_v46  ;;  %v6163_v33 = vsub.f32 %v5861_v14, %v5991_v52  ;;  %v6182_v14 = vsub.f32 %v5881_v39, %v5991_v52 }
 0x17c   :  { %9045 = vst [vmem:[#allocation28_spill] sm:$0xff] %v6178_v3  ;;  %v894_v39 = vmul.f32 %v6140_v32, %v6140_v32  ;;  %v898_v13 = vmul.f32 %v6159_v46, %v6159_v46  ;;  %v900_v32 = vmul.f32 %v6170_v42, %v6170_v42  ;;  %v973_v46 = vsel %vm670_vm1, %v890_v61, 0.0 }
 0x17d   :  { %v962_v49 = vadd.f32 %v961_v22, %v960_v5  ;;  %9042 = vst [vmem:[#allocation25_spill] sm:$0xff] %v6163_v33  ;;  %9046 = vst [vmem:[#allocation29_spill] sm:$0xff] %v6182_v14  ;;  %v889_v5 = vmul.f32 %v6117_v63, %v6117_v63  ;;  %v893_v22 = vmul.f32 %v6136_v19, %v6136_v19 }
 0x17e   :  { %v981_v42 = vsel %vm670_vm1, %v894_v39, 0.0  ;;  %v993_v61 = vsel %vm670_vm1, %v900_v32, 0.0 }
 0x17f   :  { %v964_v37 = vadd.f32 %v963_v12, %v962_v49  ;;  %v895_v12 = vmul.f32 %v6147_v38, %v6147_v38  ;;  %v901_v38 = vmul.f32 %v6174_v51, %v6174_v51  ;;  %v971_v57 = vsel %vm670_vm1, %v889_v5, 0.0 }
 0x181   :  { %v966_v36 = vadd.f32 %v965_v15, %v964_v37  ;;  %v896_v37 = vmul.f32 %v6151_v25, %v6151_v25  ;;  %v897_v15 = vmul.f32 %v6155_v31, %v6155_v31  ;;  %v902_v25 = vmul.f32 %v6178_v3, %v6178_v3 }
 0x182   :  { %v903_v31 = vmul.f32 %v6182_v14, %v6182_v14  ;;  %v983_v51 = vsel %vm670_vm1, %v895_v12, 0.0  ;;  %v989_v14 = vsel %vm670_vm1, %v898_v13, 0.0 }
 0x183   :  { %v968_v49 = vadd.f32 %v967_v44, %v966_v36  ;;  %v899_v36 = vmul.f32 %v6163_v33, %v6163_v33  ;;  %v975_v33 = vsel %vm670_vm1, %v891_v8, 0.0  ;;  %v985_v3 = vsel %vm670_vm1, %v896_v37, 0.0 }
 0x184   :  { %v987_v5 = vsel %vm670_vm1, %v897_v15, 0.0  ;;  %v995_v8 = vsel %vm670_vm1, %v901_v38, 0.0  ;;  %v999_v39 = vsel %vm670_vm1, %v903_v31, 0.0  ;;  %v6236_v38 = vsub.f32 %v5865_v18, %v5991_v52 }
 0x185   :  { %v970_v44 = vadd.f32 %v969_v28, %v968_v49  ;;  %v977_v49 = vsel %vm670_vm1, %v892_v24, 0.0  ;;  %v979_v28 = vsel %vm670_vm1, %v893_v22, 0.0  ;;  %v997_v24 = vsel %vm670_vm1, %v902_v25, 0.0 }
 0x186   :  { %v6240_v25 = vsub.f32 %v5875_v29, %v5991_v52  ;;  %v6256_v29 = vsub.f32 %v5885_v45, %v5991_v52  ;;  %v6270_v45 = vsub.f32 %v5911_v27, %v5991_v52 }
 0x187   :  { %v972_v19 = vadd.f32 %v971_v57, %v970_v44  ;;  %v991_v44 = vsel %vm670_vm1, %v899_v36, 0.0 }
 0x188   :  { %v905_v18 = vmul.f32 %v6240_v25, %v6240_v25 }
 0x189   :  { %v974_v26 = vadd.f32 %v973_v46, %v972_v19  ;;  %v5260_v19 = vld [vmem:[%s8913_s4 + $0x118] sm:$0xff]  }
 0x18a   :  { %5043 = vmatprep.subr.bf16.mxu0 %v5260_v19 }
 0x18b   :  { %v976_v22 = vadd.f32 %v975_v33, %v974_v26  ;;  %5044 = vmatpush3.bf16.msra.mxu0 %v5260_v19  ;;  %v6244_v33 = vsub.f32 %v5891_v55, %v5991_v52 }
 0x18d   :  { %v978_v46 = vadd.f32 %v977_v49, %v976_v22  ;;  %v906_v55 = vmul.f32 %v6244_v33, %v6244_v33 }
 0x18f   :  { %v980_v12 = vadd.f32 %v979_v28, %v978_v46 }
 0x191   :  { %v982_v13 = vadd.f32 %v981_v42, %v980_v12  ;;  %v904_v42 = vmul.f32 %v6236_v38, %v6236_v38 }
 0x193   :  { %v984_v37 = vadd.f32 %v983_v51, %v982_v13  ;;  %v1001_v49 = vsel %vm670_vm1, %v904_v42, 0.0  ;;  %v9048_v13 = vld [vmem:[#allocation6_spill] sm:$0xff] }
 0x195   :  { %v986_v15 = vadd.f32 %v985_v3, %v984_v37  ;;  %v6250_v3 = vsub.f32 %v5901_v11, %v5991_v52  ;;  %v6287_v37 = vsub.f32 %v9048_v13, %v5991_v52 }
 0x197   :  { %v988_v36 = vadd.f32 %v987_v5, %v986_v15  ;;  %v6263_v5 = vsub.f32 %v5895_v0, %v5991_v52  ;;  %v907_v11 = vmul.f32 %v6250_v3, %v6250_v3  ;;  %v5261_v0 = vld [vmem:[%s8913_s4 + $0x110] sm:$0xff]   ;;  %v910_v15 = vmul.f32 %v6270_v45, %v6270_v45 }
 0x198   :  { %5045 = vmatprep.subr.bf16.mxu0 %v5261_v0 }
 0x199   :  { %v990_v32 = vadd.f32 %v989_v14, %v988_v36  ;;  %v909_v46 = vmul.f32 %v6263_v5, %v6263_v5  ;;  %v1007_v27 = vsel %vm670_vm1, %v907_v11, 0.0  ;;  %5046 = vmatpush3.bf16.msra.mxu0 %v5261_v0 }
 0x19b   :  { %v992_v57 = vadd.f32 %v991_v44, %v990_v32  ;;  %v1003_v44 = vsel %vm670_vm1, %v905_v18, 0.0 }
 0x19d   :  { %v994_v26 = vadd.f32 %v993_v61, %v992_v57  ;;  %v6294_v57 = vsub.f32 %v5915_v40, %v5991_v52  ;;  %v6308_v40 = vsub.f32 %v5867_v20, %v5991_v52  ;;  %v6322_v20 = vsub.f32 %v5857_v9, %v5991_v52  ;;  %v5262_v9 = vld [vmem:[%s8913_s4 + $0x108] sm:$0xff]  }
 0x19e   :  { %5047 = vmatprep.subr.bf16.mxu0 %v5262_v9 }
 0x19f   :  { %v996_v31 = vadd.f32 %v995_v8, %v994_v26  ;;  %v908_v8 = vmul.f32 %v6256_v29, %v6256_v29  ;;  %5048 = vmatpush3.bf16.msra.mxu0 %v5262_v9  ;;  %v9055_v9 = vld [vmem:[#allocation7_spill] sm:$0xff] }
 0x1a1   :  { %v998_v51 = vadd.f32 %v997_v24, %v996_v31  ;;  %v1005_v24 = vsel %vm670_vm1, %v906_v55, 0.0  ;;  %v1009_v36 = vsel %vm670_vm1, %v908_v8, 0.0  ;;  %v1011_v31 = vsel %vm670_vm1, %v909_v46, 0.0 }
 0x1a2   :  { %v1013_v55 = vsel %vm670_vm1, %v910_v15, 0.0 }
 0x1a3   :  { %v1000_v14 = vadd.f32 %v999_v39, %v998_v51  ;;  %v9047_v39 = vld [vmem:[#allocation8_spill] sm:$0xff]  ;;  %v9049_v51 = vld [vmem:[#allocation3_spill] sm:$0xff] }
 0x1a4   :  { %v6280_v19 = vsub.f32 %v9047_v39, %v5991_v52  ;;  %v6301_v18 = vsub.f32 %v9049_v51, %v5991_v52  ;;  %v915_v39 = vmul.f32 %v6308_v40, %v6308_v40 }
 0x1a5   :  { %v1002_v28 = vadd.f32 %v1001_v49, %v1000_v14  ;;  %v912_v14 = vmul.f32 %v6287_v37, %v6287_v37 }
 0x1a6   :  { %v911_v26 = vmul.f32 %v6280_v19, %v6280_v19 }
 0x1a7   :  { %v1004_v61 = vadd.f32 %v1003_v44, %v1002_v28  ;;  %v913_v28 = vmul.f32 %v6294_v57, %v6294_v57 }
 0x1a8   :  { %v1015_v11 = vsel %vm670_vm1, %v911_v26, 0.0  ;;  %v6339_v26 = vsub.f32 %v5907_v21, %v5991_v52  ;;  %v5263_v21 = vld [vmem:[%s8913_s4 + $0x100] sm:$0xff]  }
 0x1a9   :  { %v1006_v22 = vadd.f32 %v1005_v24, %v1004_v61  ;;  %v9050_v61 = vld [vmem:[#allocation2_spill] sm:$0xff]  ;;  %v914_v24 = vmul.f32 %v6301_v18, %v6301_v18  ;;  %v1019_v46 = vsel %vm670_vm1, %v913_v28, 0.0  ;;  %5049 = vmatprep.subr.bf16.mxu0 %v5263_v21 }
 0x1aa   :  { %v6315_v8 = vsub.f32 %v9050_v61, %v5991_v52  ;;  %v919_v61 = vmul.f32 %v6339_v26, %v6339_v26  ;;  %5050 = vmatpush3.bf16.msra.mxu0 %v5263_v21 }
 0x1ab   :  { %v1008_v12 = vadd.f32 %v1007_v27, %v1006_v22  ;;  %v1017_v22 = vsel %vm670_vm1, %v912_v14, 0.0  ;;  %v9052_v14 = vld [vmem:[#allocation4_spill] sm:$0xff] }
 0x1ac   :  { %v916_v15 = vmul.f32 %v6315_v8, %v6315_v8 }
 0x1ad   :  { %v1010_v32 = vadd.f32 %v1009_v36, %v1008_v12  ;;  %v9051_v12 = vld [vmem:[#allocation5_spill] sm:$0xff]  ;;  %v1021_v36 = vsel %vm670_vm1, %v914_v24, 0.0 }
 0x1ae   :  { %v6329_v13 = vsub.f32 %v9051_v12, %v5991_v52  ;;  %v1025_v28 = vsel %vm670_vm1, %v916_v15, 0.0 }
 0x1af   :  { %v1012_v42 = vadd.f32 %v1011_v31, %v1010_v32  ;;  %v917_v31 = vmul.f32 %v6322_v20, %v6322_v20 }
 0x1b1   :  { %v1014_v49 = vadd.f32 %v1013_v55, %v1012_v42  ;;  %v1023_v42 = vsel %vm670_vm1, %v915_v39, 0.0  ;;  %v6346_v55 = vsub.f32 %v9052_v14, %v5991_v52  ;;  %v1027_v24 = vsel %vm670_vm1, %v917_v31, 0.0 }
 0x1b2   :  { %v6377_v31 = vsub.f32 %v9055_v9, %v5991_v52  ;;  %v9063_v9 = vld [vmem:[#allocation11_spill] sm:$0xff] }
 0x1b3   :  { %v1016_v44 = vadd.f32 %v1015_v11, %v1014_v49  ;;  %v918_v49 = vmul.f32 %v6329_v13, %v6329_v13 }
 0x1b4   :  { %9056 = vst [vmem:[#allocation6_spill] sm:$0xff] %v6377_v31 }
 0x1b5   :  { %v1018_v0 = vadd.f32 %v1017_v22, %v1016_v44  ;;  %v6356_v44 = vsub.f32 %v5897_v2, %v5991_v52  ;;  %v6370_v2 = vsub.f32 %v5937_v60, %v5991_v52 }
 0x1b7   :  { %v1020_v27 = vadd.f32 %v1019_v46, %v1018_v0  ;;  %v9053_v0 = vld [vmem:[#allocation9_spill] sm:$0xff]  ;;  %v920_v46 = vmul.f32 %v6346_v55, %v6346_v55  ;;  %9054 = vst [vmem:[#allocation8_spill] sm:$0xff] %v6370_v2  ;;  %v921_v15 = vmul.f32 %v6356_v44, %v6356_v44 }
 0x1b8   :  { %v6363_v39 = vsub.f32 %v9053_v0, %v5991_v52 }
 0x1b9   :  { %v1022_v32 = vadd.f32 %v1021_v36, %v1020_v27  ;;  %v1029_v27 = vsel %vm670_vm1, %v918_v49, 0.0  ;;  %v1031_v36 = vsel %vm670_vm1, %v919_v61, 0.0  ;;  %v9057_v49 = vld [vmem:[#allocation10_spill] sm:$0xff]  ;;  %v9059_v61 = vld [vmem:[#allocation12_spill] sm:$0xff] }
 0x1ba   :  { %v6384_v60 = vsub.f32 %v9057_v49, %v5991_v52 }
 0x1bb   :  { %v1024_v51 = vadd.f32 %v1023_v42, %v1022_v32  ;;  %v922_v42 = vmul.f32 %v6363_v39, %v6363_v39 }
 0x1bc   :  { %9058 = vst [vmem:[#allocation3_spill] sm:$0xff] %v6384_v60 }
 0x1bd   :  { %v1026_v11 = vadd.f32 %v1025_v28, %v1024_v51  ;;  %v1033_v51 = vsel %vm670_vm1, %v920_v46, 0.0  ;;  %v923_v28 = vmul.f32 %v6370_v2, %v6370_v2  ;;  %v1037_v0 = vsel %vm670_vm1, %v922_v42, 0.0 }
 0x1bf   :  { %v1028_v22 = vadd.f32 %v1027_v24, %v1026_v11  ;;  %v1035_v11 = vsel %vm670_vm1, %v921_v15, 0.0  ;;  %v6391_v24 = vsub.f32 %v9059_v61, %v5991_v52  ;;  %v1039_v15 = vsel %vm670_vm1, %v923_v28, 0.0 }
 0x1c1   :  { %v1030_v12 = vadd.f32 %v1029_v27, %v1028_v22  ;;  %9060 = vst [vmem:[#allocation2_spill] sm:$0xff] %v6391_v24  ;;  %v924_v22 = vmul.f32 %v6377_v31, %v6377_v31  ;;  %v9061_v27 = vld [vmem:[#allocation14_spill] sm:$0xff] }
 0x1c3   :  { %v1032_v32 = vadd.f32 %v1031_v36, %v1030_v12  ;;  %v6398_v12 = vsub.f32 %v9061_v27, %v5991_v52  ;;  %v925_v36 = vmul.f32 %v6384_v60, %v6384_v60  ;;  %v1041_v42 = vsel %vm670_vm1, %v924_v22, 0.0 }
 0x1c5   :  { %v1034_v14 = vadd.f32 %v1033_v51, %v1032_v32  ;;  %9062 = vst [vmem:[#allocation5_spill] sm:$0xff] %v6398_v12  ;;  %v6405_v51 = vsub.f32 %v9063_v9, %v5991_v52  ;;  %v927_v61 = vmul.f32 %v6398_v12, %v6398_v12  ;;  %v1043_v28 = vsel %vm670_vm1, %v925_v36, 0.0  ;;  %v9067_v9 = vld [vmem:[#allocation16_spill] sm:$0xff] }
 0x1c7   :  { %v1036_v21 = vadd.f32 %v1035_v11, %v1034_v14  ;;  %v926_v14 = vmul.f32 %v6391_v24, %v6391_v24  ;;  %v9064_v11 = vld [vmem:[#allocation13_spill] sm:$0xff]  ;;  %v1047_v12 = vsel %vm670_vm1, %v927_v61, 0.0 }
 0x1c9   :  { %v1038_v46 = vadd.f32 %v1037_v0, %v1036_v21  ;;  %v6412_v21 = vsub.f32 %v9064_v11, %v5991_v52  ;;  %v1045_v22 = vsel %vm670_vm1, %v926_v14, 0.0 }
 0x1cb   :  { %v1040_v32 = vadd.f32 %v1039_v15, %v1038_v46  ;;  %9065 = vst [vmem:[#allocation4_spill] sm:$0xff] %v6412_v21  ;;  %v9066_v46 = vld [vmem:[#allocation15_spill] sm:$0xff]  ;;  %v928_v15 = vmul.f32 %v6405_v51, %v6405_v51  ;;  %v929_v11 = vmul.f32 %v6412_v21, %v6412_v21 }
 0x1cc   :  { %v6419_v27 = vsub.f32 %v9066_v46, %v5991_v52 }
 0x1cd   :  { %v1042_v49 = vadd.f32 %v1041_v42, %v1040_v32  ;;  %v867_v42 = vsub.f32 %v9067_v9, %v5991_v52  ;;  %v1049_v46 = vsel %vm670_vm1, %v928_v15, 0.0  ;;  %v1051_v9 = vsel %vm670_vm1, %v929_v11, 0.0 }
 0x1cf   :  { %v1044_v0 = vadd.f32 %v1043_v28, %v1042_v49  ;;  %v6431_v49 = vsub.f32 %v5967_v54, %v5991_v52  ;;  %v930_v28 = vmul.f32 %v6419_v27, %v6419_v27 }
 0x1d1   :  { %v1046_v32 = vadd.f32 %v1045_v22, %v1044_v0  ;;  %v6438_v0 = vsub.f32 %v5979_v58, %v5991_v52  ;;  %v931_v22 = vmul.f32 %v867_v42, %v867_v42  ;;  %v1053_v54 = vsel %vm670_vm1, %v930_v28, 0.0 }
 0x1d3   :  { %v1048_v36 = vadd.f32 %v1047_v12, %v1046_v32  ;;  %9068 = vst [vmem:[#allocation9_spill] sm:$0xff] %v6438_v0  ;;  %v932_v12 = vmul.f32 %v6431_v49, %v6431_v49  ;;  %v933_v32 = vmul.f32 %v6438_v0, %v6438_v0  ;;  %v1055_v15 = vsel %vm670_vm1, %v931_v22, 0.0 }
 0x1d5   :  { %v1050_v14 = vadd.f32 %v1049_v46, %v1048_v36  ;;  %v1057_v46 = vsel %vm670_vm1, %v932_v12, 0.0  ;;  %v1059_v52 = vsel %vm670_vm1, %v933_v32, 0.0 }
 0x1d7   :  { %v1052_v21 = vadd.f32 %v1051_v9, %v1050_v14 }
 0x1d9   :  { %v1054_v61 = vadd.f32 %v1053_v54, %v1052_v21  ;;  %v1466_v54 = vlaneseq }
 0x1db   :  { %v1056_v36 = vadd.f32 %v1055_v15, %v1054_v61  ;;  %v6449_v0 = vshrl.u32 %v1466_v54, 7  ;;  %v5264_v54 = vld [vmem:[%s8913_s4 + $0x78] sm:$0xff]  }
 0x1dc   :  { %4819 = vmatprep.subr.bf16.mxu1 %v5264_v54 }
 0x1dd   :  { %v1058_v58 = vadd.f32 %v1057_v46, %v1056_v36  ;;  %9069 = vst [vmem:[#allocation7_spill] sm:$0xff] %v6449_v0  ;;  %v1469_v22 = vadd.s32 16, %v6449_v0  ;;  %v1470_v12 = vadd.s32 24, %v6449_v0  ;;  %v6454_v61 = vadd.s32 8, %v6449_v0 }
 0x1de   :  { %v1471_v32 = vadd.s32 32, %v6449_v0  ;;  %v1473_v15 = vadd.s32 48, %v6449_v0 }
 0x1df   :  { %v1060_v24 = vadd.f32 %v1059_v52, %v1058_v58  ;;  %9070 = vst [vmem:[#allocation10_spill] sm:$0xff] %v6454_v61  ;;  %v1500_v36 = vand.u32 7, %v1470_v12  ;;  %v1486_v46 = vand.u32 7, %v6454_v61  ;;  %v1479_v58 = vand.u32 7, %v6449_v0 }
 0x1e0   :  { %v1507_v52 = vand.u32 7, %v1471_v32 }
 0x1e1   :  { %v1061_v11 = vrot.slane %v1060_v24, 4  ;;  %vm1574_vm3 = vcmp.ne.s32.totalorder %v1500_v36, 0  ;;  %vm1572_vm4 = vcmp.ne.s32.totalorder %v1486_v46, 0  ;;  %vm1571_vm5 = vcmp.ne.s32.totalorder %v1479_v58, 0  ;;  %v5267_v46 = vld [vmem:[%s8913_s4 + $0x30] sm:$0xff]  }
 0x1e2   :  { %vm1575_vm6 = vcmp.ne.s32.totalorder %v1507_v52, 0 }
 0x1e3   :  { %v1062_v14 = vadd.f32 %v1061_v11, %v1060_v24  ;;  %v1472_v24 = vadd.s32 40, %v6449_v0 }
 0x1e5   :  { %v1063_v9 = vrot.slane %v1062_v14, 2  ;;  %v1514_v11 = vand.u32 7, %v1472_v24  ;;  %v6487_v24 = vld [vmem:[%s8915_s3] ss:$0 sm:$0xff] }
 0x1e6   :  { %9073 = vst [vmem:[#allocation12_spill] sm:$0xff] %v6487_v24 }
 0x1e7   :  { %v1064_v60 = vadd.f32 %v1063_v9, %v1062_v14  ;;  %v1521_v14 = vand.u32 7, %v1473_v15  ;;  %vm1576_vm7 = vcmp.ne.s32.totalorder %v1514_v11, 0  ;;  %v8962_v15 = vmov 0.0  }
 0x1e8   :  { %v6496_v36 = vsel %vm1572_vm4, 1.0, %v8962_v15  ;;  %v6502_v58 = vsel %vm1571_vm5, 1.0, %v8962_v15  ;;  %v6505_v52 = vsel %vm1575_vm6, 1.0, %v8962_v15  ;;  %v6508_v11 = vsel %vm1576_vm7, 1.0, %v8962_v15 }
 0x1e9   :  { %v1065_v31 = vrot.slane %v1064_v60, 1  ;;  %vm1577_vm8 = vcmp.ne.s32.totalorder %v1521_v14, 0  ;;  %9076 = vst [vmem:[#allocation13_spill] sm:$0xff] %v6496_v36  ;;  %9077 = vst [vmem:[#allocation15_spill] sm:$0xff] %v6502_v58  ;;  %v9092_v58 = vld [vmem:[#allocation24_spill] sm:$0xff] }
 0x1ea   :  { %9078 = vst [vmem:[#allocation16_spill] sm:$0xff] %v6505_v52  ;;  %9079 = vst [vmem:[#allocation30_spill] sm:$0xff] %v6508_v11  ;;  %v6511_v14 = vsel %vm1577_vm8, 1.0, %v8962_v15  ;;  %v9089_v11 = vld [vmem:[#allocation22_spill] sm:$0xff]  ;;  %v9090_v52 = vld [vmem:[#allocation23_spill] sm:$0xff] }
 0x1eb   :  { %v1066_v2 = vadd.f32 %v1065_v31, %v1064_v60  ;;  %v1493_v60 = vand.u32 7, %v1469_v22  ;;  %v5265_v22 = vld [vmem:[%s8913_s4 + $0x38] sm:$0xff]   ;;  %9080 = vst [vmem:[#allocation31_spill] sm:$0xff] %v6511_v14  ;;  %v9087_v14 = vld [vmem:[#allocation20_spill] sm:$0xff] }
 0x1ec   :  { %4820 = vmatpush3.bf16.msra.mxu1 %v5265_v22 }
 0x1ed   :  { %v1067_v28 = vmul.f32 0.001953125, %v1066_v2  ;;  %v1474_v2 = vadd.s32 56, %v6449_v0  ;;  %vm1573_vm2 = vcmp.ne.s32.totalorder %v1493_v60, 0  ;;  %v6493_v60 = vsel %vm1574_vm3, 1.0, %v8962_v15 }
 0x1ee   :  { %9075 = vst [vmem:[#allocation11_spill] sm:$0xff] %v6493_v60 }
 0x1ef   :  { %v1068_v21 = vadd.f32 1e-05, %v1067_v28  ;;  %v1528_v28 = vand.u32 7, %v1474_v2  ;;  %v6490_v2 = vsel %vm1573_vm2, 1.0, %v8962_v15 }
 0x1f0   :  { %9074 = vst [vmem:[#allocation14_spill] sm:$0xff] %v6490_v2 }
 0x1f1   :  { %5516 = vrsqrt.f32 %v1068_v21  ;;  %v6468_v21 = vld [vmem:[%s8914_s2] ss:$0 sm:$0xff]  ;;  %vm6480_vm9 = vcmp.ne.s32.totalorder %v1528_v28, 0 }
 0x1f2   :  { %v6525_v0 = vsel %vm6480_vm9, 1.0, %v8962_v15 }
 0x1f3   :  { %9081 = vst [vmem:[#allocation32_spill] sm:$0xff] %v6525_v0 }
 0x1fe   :  { %v6460_v31 = vpop.eup %5516 }
 0x1ff   :  { %v1131_v9 = vmul.f32 %v6460_v31, %v867_v42  ;;  %v5266_v42 = vld [vmem:[%s8913_s4 + $0x70] sm:$0xff]   ;;  %v1070_v28 = vmul.f32 %v6460_v31, %v5995_v17  ;;  %v1071_v54 = vmul.f32 %v6460_v31, %v5999_v6  ;;  %v1072_v22 = vmul.f32 %v6460_v31, %v6003_v23 }
 0x200   :  { %4821 = vmatprep.subr.bf16.mxu1 %v5266_v42  ;;  %v1073_v61 = vmul.f32 %v6460_v31, %v6007_v48  ;;  %v1074_v17 = vmul.f32 %v6460_v31, %v6015_v35  ;;  %v1075_v6 = vmul.f32 %v6460_v31, %v6021_v34  ;;  %v1076_v23 = vmul.f32 %v6460_v31, %v6029_v43  ;;  %v5269_v48 = vld [vmem:[%s8913_s4 + $0x28] sm:$0xff]  }
 0x201   :  { %v1201_v12 = vmul.f32 %v6468_v21, %v1131_v9  ;;  %v5268_v9 = vld [vmem:[%s8913_s4 + $0x68] sm:$0xff]   ;;  %v1077_v32 = vmul.f32 %v6460_v31, %v6036_v50  ;;  %v6542_v15 = vmul.f32 %v6460_v31, %v6043_v41  ;;  %4822 = vmatpush3.bf16.msra.mxu1 %v5267_v46  ;;  %v6553_v35 = vmul.f32 %v6460_v31, %v6057_v56  ;;  %v5270_v41 = vld [vmem:[%s8913_s4 + $0x60] sm:$0xff]  }
 0x202   :  { %v6557_v34 = vmul.f32 %v6460_v31, %v6064_v62  ;;  %v6561_v43 = vmul.f32 %v6460_v31, %v6071_v53  ;;  %v6565_v50 = vmul.f32 %v6460_v31, %v6078_v59  ;;  %4823 = vmatprep.subr.bf16.mxu1 %v5268_v9  ;;  %v6576_v56 = vmul.f32 %v6460_v31, %v6092_v10 }
 0x203   :  { %v6528_v42 = vadd.f32 %v6487_v24, %v1201_v12  ;;  %v6546_v12 = vmul.f32 %v6460_v31, %v6050_v47  ;;  %v6572_v47 = vmul.f32 %v6460_v31, %v6085_v4  ;;  %v6580_v62 = vmul.f32 %v6460_v31, %v6099_v1  ;;  %v9084_v1 = vld [vmem:[#allocation17_spill] sm:$0xff] }
 0x204   :  { %v6584_v53 = vmul.f32 %v6460_v31, %v6106_v7  ;;  %v6591_v46 = vmul.f32 %v6460_v31, %v6113_v16  ;;  %v6595_v4 = vmul.f32 %v6460_v31, %v6117_v63  ;;  %v6599_v10 = vmul.f32 %v6460_v31, %v6124_v30  ;;  %v9085_v7 = vld [vmem:[#allocation18_spill] sm:$0xff] }
 0x205   :  { %9082 = vst [vmem:[#allocation33_spill] sm:$0xff] %v6528_v42  ;;  %v6587_v59 = vmul.f32 0.2, %v6528_v42  ;;  %v6603_v9 = vmul.f32 %v6460_v31, %v9084_v1  ;;  %v6607_v0 = vmul.f32 %v6460_v31, %v9085_v7  ;;  %v6615_v63 = vmul.f32 %v6460_v31, %v9087_v14  ;;  %4824 = vmatpush3.bf16.msra.mxu1 %v5269_v48  ;;  %v5271_v30 = vld [vmem:[%s8913_s4 + $0x20] sm:$0xff]   ;;  %v9088_v42 = vld [vmem:[#allocation21_spill] sm:$0xff] }
 0x206   :  { %v6622_v1 = vmul.f32 %v6460_v31, %v9088_v42  ;;  %v6626_v7 = vmul.f32 %v6460_v31, %v9089_v11  ;;  %v6634_v14 = vmul.f32 %v6460_v31, %v6405_v51  ;;  %4825 = vmatprep.subr.bf16.mxu1 %v5270_v41  ;;  %v5272_v48 = vld [vmem:[%s8913_s4 + $0x58] sm:$0xff]   ;;  %v6641_v42 = vmul.f32 %v6460_v31, %v9092_v58 }
 0x207   :  { %9083 = vst [vmem:[#allocation34_spill] sm:$0xff] %v6587_v59  ;;  %v9086_v59 = vld [vmem:[#allocation19_spill] sm:$0xff]  ;;  %v6645_v11 = vmul.f32 %v6460_v31, %v6419_v27  ;;  %v6652_v51 = vmul.f32 %v6468_v21, %v1070_v28  ;;  %v6655_v41 = vmul.f32 %v6468_v21, %v1071_v54  ;;  %v6658_v36 = vmul.f32 %v6468_v21, %v1072_v22  ;;  %v9095_v27 = vld [vmem:[#allocation25_spill] sm:$0xff]  ;;  %v9096_v22 = vld [vmem:[#allocation26_spill] sm:$0xff] }
 0x208   :  { %v6611_v16 = vmul.f32 %v6460_v31, %v9086_v59  ;;  %v6630_v59 = vmul.f32 %v6460_v31, %v9090_v52  ;;  %9091 = vst [vmem:[#allocation17_spill] sm:$0xff] %v6634_v14  ;;  %v6649_v52 = vmul.f32 %v6460_v31, %v6431_v49  ;;  %v6661_v58 = vmul.f32 %v6468_v21, %v1073_v61  ;;  %v5273_v61 = vld [vmem:[%s8913_s4 + $0x18] sm:$0xff]  }
 0x209   :  { %9093 = vst [vmem:[#allocation18_spill] sm:$0xff] %v6645_v11  ;;  %v6664_v60 = vmul.f32 %v6468_v21, %v1074_v17  ;;  %v6668_v2 = vmul.f32 %v6460_v31, %v9095_v27  ;;  %v6671_v49 = vmul.f32 %v6468_v21, %v1075_v6  ;;  %v6674_v28 = vmul.f32 %v6468_v21, %v1076_v23  ;;  %v9097_v27 = vld [vmem:[#allocation27_spill] sm:$0xff]  ;;  %v9099_v6 = vld [vmem:[#allocation28_spill] sm:$0xff]  ;;  %v9100_v11 = vld [vmem:[#allocation29_spill] sm:$0xff] }
 0x20a   :  { %9094 = vst [vmem:[#allocation19_spill] sm:$0xff] %v6649_v52  ;;  %v6677_v54 = vmul.f32 %v6468_v21, %v1077_v32  ;;  %4826 = vmatpush3.bf16.msra.mxu1 %v5271_v30  ;;  %v6684_v17 = vmul.f32 %v6460_v31, %v9096_v22  ;;  %v6688_v52 = vmul.f32 %v6460_v31, %v9097_v27  ;;  %v5274_v30 = vld [vmem:[%s8913_s4 + $0x50] sm:$0xff]  }
 0x20b   :  { %v1102_v23 = vmul.f32 %v6460_v31, %v9099_v6  ;;  %v1103_v32 = vmul.f32 %v6460_v31, %v9100_v11  ;;  %4827 = vmatprep.subr.bf16.mxu1 %v5272_v48  ;;  %v1104_v14 = vmul.f32 %v6460_v31, %v6236_v38  ;;  %v1105_v22 = vmul.f32 %v6460_v31, %v6240_v25 }
 0x20c   :  { %9098 = vst [vmem:[#allocation20_spill] sm:$0xff] %v6688_v52  ;;  %v1106_v27 = vmul.f32 %v6460_v31, %v6244_v33  ;;  %v1107_v6 = vmul.f32 %v6460_v31, %v6250_v3  ;;  %v1108_v11 = vmul.f32 %v6460_v31, %v6256_v29  ;;  %v1109_v48 = vmul.f32 %v6460_v31, %v6263_v5  ;;  %v5275_v5 = vld [vmem:[%s8913_s4 + $0x10] sm:$0xff]  }
 0x20d   :  { %v6711_v52 = vmul.f32 %v6460_v31, %v6270_v45  ;;  %v6715_v38 = vmul.f32 %v6460_v31, %v6280_v19  ;;  %v6719_v25 = vmul.f32 %v6460_v31, %v6287_v37  ;;  %v6723_v33 = vmul.f32 %v6460_v31, %v6294_v57 }
 0x20e   :  { %v6727_v3 = vmul.f32 %v6460_v31, %v6301_v18  ;;  %v6731_v29 = vmul.f32 %v6460_v31, %v6308_v40  ;;  %4828 = vmatpush3.bf16.msra.mxu1 %v5273_v61  ;;  %v1116_v45 = vmul.f32 %v6460_v31, %v6315_v8  ;;  %v1117_v19 = vmul.f32 %v6460_v31, %v6322_v20 }
 0x20f   :  { %v1118_v37 = vmul.f32 %v6460_v31, %v6329_v13  ;;  %v1119_v57 = vmul.f32 %v6460_v31, %v6339_v26  ;;  %4829 = vmatprep.subr.bf16.mxu1 %v5274_v30  ;;  %v1120_v18 = vmul.f32 %v6460_v31, %v6346_v55  ;;  %v1121_v40 = vmul.f32 %v6460_v31, %v6356_v44  ;;  %v9104_v30 = vld [vmem:[#allocation8_spill] sm:$0xff] }
 0x210   :  { %v1122_v61 = vmul.f32 %v6460_v31, %v6363_v39  ;;  %v6751_v8 = vmul.f32 %v6468_v21, %v1102_v23  ;;  %v6754_v20 = vmul.f32 %v6468_v21, %v1103_v32  ;;  %v6757_v13 = vmul.f32 %v6468_v21, %v1104_v14  ;;  %v9107_v14 = vld [vmem:[#allocation6_spill] sm:$0xff] }
 0x211   :  { %v6760_v26 = vmul.f32 %v6468_v21, %v1105_v22  ;;  %v6763_v55 = vmul.f32 %v6468_v21, %v1106_v27  ;;  %v1123_v44 = vmul.f32 %v6460_v31, %v9104_v30  ;;  %v6768_v39 = vmul.f32 %v6468_v21, %v1107_v6  ;;  %v9110_v30 = vld [vmem:[#allocation5_spill] sm:$0xff] }
 0x212   :  { %9101 = vst [vmem:[#allocation21_spill] sm:$0xff] %v6757_v13  ;;  %v6771_v23 = vmul.f32 %v6468_v21, %v1108_v11  ;;  %v6774_v32 = vmul.f32 %v6468_v21, %v1109_v48  ;;  %4830 = vmatpush3.bf16.msra.mxu1 %v5275_v5  ;;  %v1124_v22 = vmul.f32 %v6460_v31, %v9107_v14 }
 0x213   :  { %9102 = vst [vmem:[#allocation22_spill] sm:$0xff] %v6760_v26  ;;  %9103 = vst [vmem:[#allocation23_spill] sm:$0xff] %v6763_v55  ;;  %v9108_v26 = vld [vmem:[#allocation3_spill] sm:$0xff]  ;;  %v9109_v55 = vld [vmem:[#allocation2_spill] sm:$0xff]  ;;  %v1127_v6 = vmul.f32 %v6460_v31, %v9110_v30  ;;  %v6792_v5 = vmul.f32 %v6468_v21, %v6542_v15  ;;  %v6804_v14 = vmul.f32 %v6468_v21, %v6557_v34 }
 0x214   :  { %9105 = vst [vmem:[#allocation24_spill] sm:$0xff] %v6768_v39  ;;  %9106 = vst [vmem:[#allocation25_spill] sm:$0xff] %v6771_v23  ;;  %v1125_v27 = vmul.f32 %v6460_v31, %v9108_v26  ;;  %v1126_v13 = vmul.f32 %v6460_v31, %v9109_v55  ;;  %v9111_v39 = vld [vmem:[#allocation4_spill] sm:$0xff]  ;;  %v9112_v23 = vld [vmem:[#allocation9_spill] sm:$0xff]  ;;  %v6796_v26 = vmul.f32 %v6468_v21, %v6546_v12 }
 0x215   :  { %v1129_v11 = vmul.f32 %v6460_v31, %v9111_v39  ;;  %v6788_v48 = vmul.f32 %v6460_v31, %v9112_v23  ;;  %v6800_v55 = vmul.f32 %v6468_v21, %v6553_v35  ;;  %v6808_v31 = vmul.f32 %v6468_v21, %v6561_v43  ;;  %v9122_v23 = vld [vmem:[#allocation20_spill] sm:$0xff] }
 0x216   :  { %v6812_v15 = vmul.f32 %v6468_v21, %v6565_v50  ;;  %v6816_v12 = vmul.f32 %v6468_v21, %v6572_v47  ;;  %v6820_v35 = vmul.f32 %v6468_v21, %v6576_v56  ;;  %v6824_v34 = vmul.f32 %v6468_v21, %v6580_v62 }
 0x217   :  { %v6828_v43 = vmul.f32 %v6468_v21, %v6584_v53  ;;  %v6832_v50 = vmul.f32 %v6468_v21, %v6591_v46  ;;  %v6836_v47 = vmul.f32 %v6468_v21, %v6595_v4  ;;  %v6840_v56 = vmul.f32 %v6468_v21, %v6599_v10 }
 0x218   :  { %v6844_v62 = vmul.f32 %v6468_v21, %v6603_v9  ;;  %v6848_v53 = vmul.f32 %v6468_v21, %v6607_v0  ;;  %v6852_v46 = vmul.f32 %v6468_v21, %v6611_v16  ;;  %v6856_v4 = vadd.f32 %v6487_v24, %v6652_v51 }
 0x219   :  { %v6860_v10 = vadd.f32 %v6487_v24, %v6655_v41  ;;  %v6864_v9 = vadd.f32 %v6487_v24, %v6658_v36  ;;  %v6868_v0 = vadd.f32 %v6487_v24, %v6661_v58  ;;  %v6872_v16 = vadd.f32 %v6487_v24, %v6664_v60 }
 0x21a   :  { %9113 = vst [vmem:[#allocation26_spill] sm:$0xff] %v6852_v46  ;;  %9114 = vst [vmem:[#allocation27_spill] sm:$0xff] %v6856_v4  ;;  %v6876_v51 = vadd.f32 %v6487_v24, %v6671_v49  ;;  %v1164_v41 = vmul.f32 %v6468_v21, %v6615_v63  ;;  %v1165_v39 = vmul.f32 %v6468_v21, %v6622_v1 }
 0x21b   :  { %9115 = vst [vmem:[#allocation28_spill] sm:$0xff] %v6860_v10  ;;  %9116 = vst [vmem:[#allocation29_spill] sm:$0xff] %v6864_v9  ;;  %v6884_v36 = vadd.f32 %v6487_v24, %v6674_v28  ;;  %v6888_v58 = vadd.f32 %v6487_v24, %v6677_v54  ;;  %v1166_v60 = vmul.f32 %v6468_v21, %v6626_v7 }
 0x21c   :  { %9117 = vst [vmem:[#allocation8_spill] sm:$0xff] %v6868_v0  ;;  %9118 = vst [vmem:[#allocation6_spill] sm:$0xff] %v6872_v16  ;;  %v1167_v49 = vmul.f32 %v6468_v21, %v6630_v59  ;;  %v1168_v63 = vmul.f32 %v6468_v21, %v6641_v42  ;;  %v1169_v1 = vmul.f32 %v6468_v21, %v6668_v2 }
 0x21d   :  { %9119 = vst [vmem:[#allocation3_spill] sm:$0xff] %v6876_v51  ;;  %9120 = vst [vmem:[#allocation2_spill] sm:$0xff] %v6884_v36  ;;  %v1170_v28 = vmul.f32 %v6468_v21, %v6684_v17  ;;  %v1171_v30 = vmul.f32 %v6468_v21, %v9122_v23  ;;  %v1180_v54 = vmul.f32 %v6468_v21, %v6711_v52 }
 0x21e   :  { %9121 = vst [vmem:[#allocation5_spill] sm:$0xff] %v6888_v58  ;;  %v1181_v7 = vmul.f32 %v6468_v21, %v6715_v38  ;;  %v1182_v59 = vmul.f32 %v6468_v21, %v6719_v25  ;;  %v1183_v42 = vmul.f32 %v6468_v21, %v6723_v33  ;;  %v1184_v2 = vmul.f32 %v6468_v21, %v6727_v3 }
 0x21f   :  { %v1185_v17 = vmul.f32 %v6468_v21, %v6731_v29  ;;  %v1186_v23 = vmul.f32 %v6468_v21, %v1116_v45  ;;  %v1187_v51 = vmul.f32 %v6468_v21, %v1117_v19  ;;  %v1188_v52 = vmul.f32 %v6468_v21, %v1118_v37  ;;  %v9126_v37 = vld [vmem:[#allocation21_spill] sm:$0xff] }
 0x220   :  { %v1189_v38 = vmul.f32 %v6468_v21, %v1119_v57  ;;  %v1190_v16 = vmul.f32 %v6468_v21, %v1120_v18  ;;  %v1191_v25 = vmul.f32 %v6468_v21, %v1121_v40  ;;  %v1192_v33 = vmul.f32 %v6468_v21, %v1122_v61  ;;  %v9128_v18 = vld [vmem:[#allocation22_spill] sm:$0xff]  ;;  %v9130_v61 = vld [vmem:[#allocation23_spill] sm:$0xff] }
 0x221   :  { %v1193_v0 = vmul.f32 %v6468_v21, %v1123_v44  ;;  %v1194_v3 = vmul.f32 %v6468_v21, %v1124_v22  ;;  %v6924_v29 = vmul.f32 %v6468_v21, %v1125_v27  ;;  %v6928_v45 = vadd.f32 %v6487_v24, %v6751_v8  ;;  %v9132_v22 = vld [vmem:[#allocation24_spill] sm:$0xff] }
 0x222   :  { %v6932_v19 = vadd.f32 %v6487_v24, %v6754_v20  ;;  %v6936_v57 = vadd.f32 %v6487_v24, %v9126_v37  ;;  %v6940_v40 = vadd.f32 %v6487_v24, %v9128_v18  ;;  %v6944_v44 = vadd.f32 %v6487_v24, %v9130_v61 }
 0x223   :  { %9123 = vst [vmem:[#allocation4_spill] sm:$0xff] %v6924_v29  ;;  %9124 = vst [vmem:[#allocation9_spill] sm:$0xff] %v6928_v45  ;;  %v6948_v8 = vadd.f32 %v6487_v24, %v9132_v22  ;;  %v1196_v27 = vmul.f32 %v6468_v21, %v1126_v13  ;;  %v1197_v20 = vmul.f32 %v6468_v21, %v1127_v6 }
 0x224   :  { %9125 = vst [vmem:[#allocation20_spill] sm:$0xff] %v6932_v19  ;;  %9127 = vst [vmem:[#allocation21_spill] sm:$0xff] %v6936_v57  ;;  %v9134_v19 = vld [vmem:[#allocation25_spill] sm:$0xff]  ;;  %v6958_v18 = vadd.f32 %v6487_v24, %v6774_v32  ;;  %v9138_v57 = vld [vmem:[#allocation18_spill] sm:$0xff]  ;;  %v1203_v6 = vmul.f32 %v6468_v21, %v6788_v48  ;;  %v6975_v32 = vadd.f32 %v6487_v24, %v6796_v26 }
 0x225   :  { %9129 = vst [vmem:[#allocation22_spill] sm:$0xff] %v6940_v40  ;;  %9131 = vst [vmem:[#allocation23_spill] sm:$0xff] %v6944_v44  ;;  %v6954_v37 = vadd.f32 %v6487_v24, %v9134_v19  ;;  %v9137_v40 = vld [vmem:[#allocation17_spill] sm:$0xff]  ;;  %v1199_v44 = vmul.f32 %v6468_v21, %v1129_v11  ;;  %v1200_v22 = vmul.f32 %v6468_v21, %v9138_v57 }
 0x226   :  { %9133 = vst [vmem:[#allocation24_spill] sm:$0xff] %v6948_v8  ;;  %9136 = vst [vmem:[#allocation35_spill] sm:$0xff] %v6958_v18  ;;  %v1198_v61 = vmul.f32 %v6468_v21, %v9137_v40  ;;  %v9139_v8 = vld [vmem:[#allocation19_spill] sm:$0xff]  ;;  %v6971_v19 = vadd.f32 %v6487_v24, %v6792_v5  ;;  %v6979_v11 = vadd.f32 %v6487_v24, %v6800_v55  ;;  %vm1283_vm7 = vcmp.ge.f32.partialorder %v6975_v32, 0.0 }
 0x227   :  { %9135 = vst [vmem:[#allocation25_spill] sm:$0xff] %v6954_v37  ;;  %v1202_v13 = vmul.f32 %v6468_v21, %v9139_v8  ;;  %v6983_v57 = vadd.f32 %v6487_v24, %v6804_v14  ;;  %v6987_v40 = vadd.f32 %v6487_v24, %v6808_v31  ;;  %v6991_v21 = vadd.f32 %v6487_v24, %v6812_v15 }
 0x228   :  { %v6995_v48 = vadd.f32 %v6487_v24, %v6816_v12  ;;  %v6999_v5 = vadd.f32 %v6487_v24, %v6820_v35  ;;  %v7003_v26 = vadd.f32 %v6487_v24, %v6824_v34  ;;  %v7007_v55 = vadd.f32 %v6487_v24, %v6828_v43 }
 0x229   :  { %v7011_v14 = vadd.f32 %v6487_v24, %v6832_v50  ;;  %v7015_v31 = vadd.f32 %v6487_v24, %v6836_v47  ;;  %v7019_v15 = vadd.f32 %v6487_v24, %v6840_v56  ;;  %v7023_v12 = vadd.f32 %v6487_v24, %v6844_v62 }
 0x22a   :  { %v7027_v35 = vadd.f32 %v6487_v24, %v6848_v53  ;;  %v7030_v34 = vadd.f32 %v6487_v24, %v1164_v41  ;;  %v7033_v43 = vadd.f32 %v6487_v24, %v1165_v39  ;;  %v1236_v50 = vadd.f32 %v6487_v24, %v1166_v60 }
 0x22b   :  { %v1237_v47 = vadd.f32 %v6487_v24, %v1167_v49  ;;  %v7038_v56 = vadd.f32 %v6487_v24, %v1168_v63  ;;  %v7041_v62 = vadd.f32 %v6487_v24, %v1169_v1  ;;  %v7044_v8 = vadd.f32 %v6487_v24, %v1170_v28 }
 0x22c   :  { %v7047_v53 = vadd.f32 %v6487_v24, %v1171_v30  ;;  %v7050_v41 = vadd.f32 %v6487_v24, %v1180_v54  ;;  %v7053_v39 = vadd.f32 %v6487_v24, %v1181_v7  ;;  %v7056_v60 = vadd.f32 %v6487_v24, %v1182_v59 }
 0x22d   :  { %v7059_v49 = vadd.f32 %v6487_v24, %v1183_v42  ;;  %v7062_v63 = vadd.f32 %v6487_v24, %v1184_v2  ;;  %v7065_v1 = vadd.f32 %v6487_v24, %v1185_v17  ;;  %v7068_v28 = vadd.f32 %v6487_v24, %v1186_v23 }
 0x22e   :  { %v7071_v30 = vadd.f32 %v6487_v24, %v1187_v51  ;;  %v7074_v54 = vadd.f32 %v6487_v24, %v1188_v52  ;;  %v7077_v7 = vadd.f32 %v6487_v24, %v1189_v38  ;;  %v7080_v59 = vadd.f32 %v6487_v24, %v1190_v16 }
 0x22f   :  { %v7083_v42 = vadd.f32 %v6487_v24, %v1191_v25  ;;  %v7086_v2 = vadd.f32 %v6487_v24, %v1192_v33  ;;  %v7089_v17 = vadd.f32 %v6487_v24, %v1193_v0  ;;  %v7092_v51 = vadd.f32 %v6487_v24, %v1194_v3 }
 0x230   :  { %v7095_v23 = vadd.f32 %v6487_v24, %v1196_v27  ;;  %v7098_v52 = vadd.f32 %v6487_v24, %v1197_v20  ;;  %v7101_v16 = vadd.f32 %v6487_v24, %v1198_v61  ;;  %vm1286_vm10 = vcmp.ge.f32.partialorder %v6987_v40, 0.0 }
 0x231   :  { %9140 = vst [vmem:[#allocation17_spill] sm:$0xff] %v7086_v2  ;;  %9141 = vst [vmem:[#allocation18_spill] sm:$0xff] %v7089_v17  ;;  %vm1287_vm11 = vcmp.ge.f32.partialorder %v6991_v21, 0.0  ;;  %vm1288_vm12 = vcmp.ge.f32.partialorder %v6995_v48, 0.0  ;;  %vm1289_vm13 = vcmp.ge.f32.partialorder %v6999_v5, 0.0  ;;  %vm1300_vm14 = vcmp.ge.f32.partialorder %v1236_v50, 0.0 }
 0x232   :  { %9142 = vst [vmem:[#allocation19_spill] sm:$0xff] %v7092_v51  ;;  %vm1301_vm15 = vcmp.ge.f32.partialorder %v1237_v47, 0.0  ;;  %v7108_v0 = vadd.f32 %v6487_v24, %v1199_v44  ;;  %v7111_v38 = vmul.f32 0.2, %v6971_v19  ;;  %v1347_v25 = vmul.f32 0.2, %v6975_v32 }
 0x233   :  { %v1350_v33 = vmul.f32 0.2, %v6987_v40  ;;  %v7116_v3 = vadd.f32 %v6487_v24, %v1200_v22  ;;  %v1351_v27 = vmul.f32 0.2, %v6991_v21  ;;  %v1364_v20 = vmul.f32 0.2, %v1236_v50 }
 0x234   :  { %v1365_v61 = vmul.f32 0.2, %v1237_v47  ;;  %v7120_v37 = vadd.f32 %v6487_v24, %v1202_v13  ;;  %v1348_v44 = vmul.f32 0.2, %v6979_v11  ;;  %v1349_v45 = vmul.f32 0.2, %v6983_v57 }
 0x235   :  { %v1352_v9 = vmul.f32 0.2, %v6995_v48  ;;  %v7126_v18 = vadd.f32 %v6487_v24, %v1203_v6  ;;  %v1353_v58 = vmul.f32 0.2, %v6999_v5  ;;  %v1362_v22 = vmul.f32 0.2, %v7030_v34 }
 0x236   :  { %v1363_v36 = vmul.f32 0.2, %v7033_v43  ;;  %v1366_v10 = vmul.f32 0.2, %v7038_v56  ;;  %v1367_v13 = vmul.f32 0.2, %v7041_v62  ;;  %v7137_v46 = vsel %vm1286_vm10, %v6987_v40, %v1350_v33 }
 0x237   :  { %v1368_v4 = vmul.f32 0.2, %v7044_v8  ;;  %v1369_v6 = vmul.f32 0.2, %v7047_v53  ;;  %v7143_v24 = vsel %vm1287_vm11, %v6991_v21, %v1351_v27  ;;  %v7146_v29 = vsel %vm1300_vm14, %v1236_v50, %v1364_v20 }
 0x238   :  { %9143 = vst [vmem:[#allocation36_spill] sm:$0xff] %v7146_v29  ;;  %v7149_v51 = vsel %vm1301_vm15, %v1237_v47, %v1365_v61  ;;  %v7152_v17 = vmul.f32 0.2, %v7050_v41  ;;  %v7155_v40 = vmul.f32 0.2, %v7053_v39  ;;  %v7163_v21 = vsel %vm1288_vm12, %v6995_v48, %v1352_v9 }
 0x239   :  { %9144 = vst [vmem:[#allocation37_spill] sm:$0xff] %v7149_v51  ;;  %v7158_v33 = vmul.f32 0.2, %v7056_v60  ;;  %v7166_v50 = vmul.f32 0.2, %v7059_v49  ;;  %v7177_v20 = vsel %vm1289_vm13, %v6999_v5, %v1353_v58  ;;  %v2023_v9 = vpack.c.bf16 %v7149_v51, %v7146_v29 }
 0x23a   :  { %v7169_v47 = vmul.f32 0.2, %v7062_v63  ;;  %v7172_v27 = vmul.f32 0.2, %v7065_v1  ;;  %v7180_v61 = vmul.f32 0.2, %v7068_v28 }
 0x23b   :  { %vm1298_vm2 = vcmp.ge.f32.partialorder %v7030_v34, 0.0  ;;  %vm1299_vm3 = vcmp.ge.f32.partialorder %v7033_v43, 0.0  ;;  %vm1302_vm4 = vcmp.ge.f32.partialorder %v7038_v56, 0.0  ;;  %vm1303_vm5 = vcmp.ge.f32.partialorder %v7041_v62, 0.0 }
 0x23c   :  { %v7187_v48 = vsel %vm1298_vm2, %v7030_v34, %v1362_v22  ;;  %v7190_v2 = vsel %vm1299_vm3, %v7033_v43, %v1363_v36  ;;  %v7195_v58 = vmul.f32 0.2, %v7071_v30  ;;  %v7198_v5 = vmul.f32 0.2, %v7095_v23  ;;  %v5276_v43 = vld [vmem:[%s8913_s4 + $0x48] sm:$0xff]  }
 0x23d   :  { %9145 = vst [vmem:[#allocation38_spill] sm:$0xff] %v7187_v48  ;;  %9146 = vst [vmem:[#allocation39_spill] sm:$0xff] %v7190_v2  ;;  %v2018_v51 = vpack.c.bf16 %v7190_v2, %v7187_v48  ;;  %v7203_v29 = vsel %vm1302_vm4, %v7038_v56, %v1366_v10  ;;  %vm1315_vm6 = vcmp.ge.f32.partialorder %v7053_v39, 0.0  ;;  %v7207_v36 = vmul.f32 0.2, %v7098_v52  ;;  %v5277_v10 = vld [vmem:[%s8913_s4 + $0x8] sm:$0xff]   ;;  %4831 = vmatprep.subr.bf16.mxu1 %v5276_v43 }
 0x23e   :  { %9147 = vst [vmem:[#allocation40_spill] sm:$0xff] %v7203_v29  ;;  %v7210_v34 = vsel %vm1303_vm5, %v7041_v62, %v1367_v13  ;;  %vm1284_vm8 = vcmp.ge.f32.partialorder %v6979_v11, 0.0  ;;  %v7221_v56 = vmul.f32 0.2, %v7101_v16  ;;  %vm1285_vm9 = vcmp.ge.f32.partialorder %v6983_v57, 0.0  ;;  %4832 = vmatpush3.bf16.msra.mxu1 %v5277_v10  ;;  %v5278_v43 = vld [vmem:[%s8913_s4 + $0x40] sm:$0xff]  }
 0x23f   :  { %9148 = vst [vmem:[#allocation41_spill] sm:$0xff] %v7210_v34  ;;  %5051 = vmatprep.mubr.msk.bf16.mxu0 %vm670_vm1, %v2018_v51  ;;  %v2028_v62 = vpack.c.bf16 %v7210_v34, %v7203_v29  ;;  %v7228_v22 = vsel %vm1283_vm7, %v6975_v32, %v1347_v25  ;;  %v7232_v13 = vsel %vm1284_vm8, %v6979_v11, %v1348_v44  ;;  %vm1282_vm10 = vcmp.ge.f32.partialorder %v6971_v19, 0.0 }
 0x240   :  { %9149 = vst [vmem:[#allocation42_spill] sm:$0xff] %v7228_v22  ;;  %5052 = vmatmul.mubr.msk.bf16.vlgmr.msra.gmra.mxu0 %vm670_vm1, %v2023_v9  ;;  %9150 = vst [vmem:[#allocation43_spill] sm:$0xff] %v7232_v13  ;;  %v7235_v2 = vsel %vm1285_vm9, %v6983_v57, %v1349_v45  ;;  %v1641_v48 = vrot.slane %v7228_v22, 7  ;;  %v1643_v51 = vrot.slane %v7232_v13, 7  ;;  %v7244_v25 = vsel %vm1282_vm10, %v6971_v19, %v7111_v38 }
 0x241   :  { %5055 = vmatprep.mubr.msk.bf16.mxu0 %vm670_vm1, %v2028_v62  ;;  %v9007_v32 = vrot.slane %v7235_v2, 7  ;;  %9151 = vst [vmem:[#allocation44_spill] sm:$0xff] %v7244_v25  ;;  %vm1304_vm11 = vcmp.ge.f32.partialorder %v7044_v8, 0.0  ;;  %v7248_v45 = vmul.f32 0.2, %v7108_v0  ;;  %v1640_v11 = vrot.slane %v7244_v25, 7  ;;  %4833 = vmatprep.subr.bf16.mxu1 %v5278_v43 }
 0x242   :  { %vm1305_vm12 = vcmp.ge.f32.partialorder %v7047_v53, 0.0  ;;  %v7253_v57 = vsel %vm1304_vm11, %v7044_v8, %v1368_v4  ;;  %v7256_v44 = vmul.f32 0.2, %v7116_v3  ;;  %v1644_v9 = vsel %vm1602_vm0, %v1641_v48, %v1643_v51  ;;  %v5279_v4 = vld [vmem:[%s8913_s4] sm:$0xff]   ;;  %v9154_v62 = vld [vmem:[#allocation11_spill] sm:$0xff] }
 0x243   :  { %v1646_v19 = vsel %vm1602_vm0, %v1643_v51, %v9007_v32  ;;  %v7263_v38 = vsel %vm1305_vm12, %v7047_v53, %v1369_v6  ;;  %vm1316_vm13 = vcmp.ge.f32.partialorder %v7056_v60, 0.0  ;;  %v9153_v8 = vld [vmem:[#allocation14_spill] sm:$0xff]  ;;  %v1642_v29 = vsel %vm1602_vm0, %v1640_v11, %v1641_v48  ;;  %v9155_v53 = vld [vmem:[#allocation13_spill] sm:$0xff]  ;;  %4834 = vmatpush3.bf16.msra.mxu1 %v5279_v4  ;;  %v9157_v43 = vld [vmem:[#allocation15_spill] sm:$0xff] }
 0x244   :  { %9152 = vst [vmem:[#allocation45_spill] sm:$0xff] %v7263_v38  ;;  %v1666_v10 = vmul.f32 %v9153_v8, %v1644_v9  ;;  %v1667_v34 = vmul.f32 %v9154_v62, %v1646_v19  ;;  %vm1291_vm14 = vcmp.ge.f32.partialorder %v7007_v55, 0.0  ;;  %v1665_v6 = vmul.f32 %v9155_v53, %v1642_v29 }
 0x245   :  { %v2033_v51 = vpack.c.bf16 %v7263_v38, %v7253_v57  ;;  %vm1292_vm15 = vcmp.ge.f32.partialorder %v7011_v14, 0.0  ;;  %v1355_v32 = vmul.f32 0.2, %v7007_v55  ;;  %v1356_v25 = vmul.f32 0.2, %v7011_v14 }
 0x246   :  { %v5121_v22 = vpack.i.bf16 %v1667_v34, %v1666_v10  ;;  %vm1290_vm2 = vcmp.ge.f32.partialorder %v7003_v26, 0.0  ;;  %v1354_v9 = vmul.f32 0.2, %v7003_v26  ;;  %v9156_v48 = vmov 0.0  }
 0x247   :  { %v5111_v19 = vpack.i.bf16 %v9156_v48, %v1665_v6  ;;  %v1419_v29 = vsel %vm1291_vm14, %v7007_v55, %v1355_v32  ;;  %v1663_v13 = vsel %vm1602_vm0, 0.0, %v1640_v11  ;;  %vm1330_vm3 = vcmp.ge.f32.partialorder %v7095_v23, 0.0  ;;  %v5289_v48 = vld [vmem:[%s8913_s4 + $0x98] sm:$0xff]  }
 0x248   :  { %v7289_v38 = vmul.f32 0.2, %v7120_v37  ;;  %5122 = vrot.lane.b32.xlu1 %v5121_v22, %s5533_s0  ;;  %5056 = vmatmul.mubr.msk.bf16.gmra.mxu0 %vm670_vm1, %v2033_v51  ;;  %v1420_v34 = vsel %vm1292_vm15, %v7011_v14, %v1356_v25  ;;  %v1664_v4 = vmul.f32 %v9157_v43, %v1663_v13  ;;  %vm1331_vm4 = vcmp.ge.f32.partialorder %v7098_v52, 0.0 }
 0x249   :  { %vm1317_vm5 = vcmp.ge.f32.partialorder %v7059_v49, 0.0  ;;  %vm1318_vm7 = vcmp.ge.f32.partialorder %v7062_v63, 0.0  ;;  %v7304_v55 = vsel %vm1315_vm6, %v7053_v39, %v7155_v40  ;;  %5112 = vrot.lane.b32.xlu0 %v5111_v19, %s5533_s0  ;;  %v1418_v14 = vsel %vm1290_vm2, %v7003_v26, %v1354_v9 }
 0x24a   :  { %v7312_v22 = vsel %vm1330_vm3, %v7095_v23, %v7198_v5  ;;  %v7316_v13 = vsel %vm1331_vm4, %v7098_v52, %v7207_v36  ;;  %v5126_v32 = vpack.i.bf16 %v1420_v34, %v1419_v29  ;;  %v5116_v25 = vpack.i.bf16 %v1664_v4, %v1418_v14  ;;  %v9159_v29 = vld [vmem:[#allocation16_spill] sm:$0xff] }
 0x24b   :  { %v2038_v39 = vpack.c.bf16 %v7316_v13, %v7312_v22  ;;  %vm1293_vm6 = vcmp.ge.f32.partialorder %v7015_v31, 0.0  ;;  %vm1294_vm8 = vcmp.ge.f32.partialorder %v7019_v15, 0.0  ;;  %v1357_v40 = vmul.f32 0.2, %v7015_v31 }
 0x24c   :  { %v1358_v26 = vmul.f32 0.2, %v7019_v15  ;;  %v1647_v23 = vrot.slane %v7137_v46, 7  ;;  %vm1319_vm9 = vcmp.ge.f32.partialorder %v7065_v1, 0.0  ;;  %v1401_v52 = vmul.f32 0.2, %v7126_v18  ;;  %5127 = vrot.lane.b32.xlu1 %v5126_v32, %s5533_s0 }
 0x24d   :  { %5059 = vmatprep.mubr.msk.bf16.mxu0 %vm670_vm1, %v2038_v39  ;;  %v1649_v5 = vrot.slane %v7143_v24, 7  ;;  %vm1332_vm10 = vcmp.ge.f32.partialorder %v7101_v16, 0.0  ;;  %vm1333_vm11 = vcmp.ge.f32.partialorder %v7108_v0, 0.0  ;;  %vm1320_vm12 = vcmp.ge.f32.partialorder %v7068_v28, 0.0  ;;  %5117 = vrot.lane.b32.xlu0 %v5116_v25, %s5533_s0 }
 0x24e   :  { %v1421_v36 = vsel %vm1293_vm6, %v7015_v31, %v1357_v40  ;;  %v1422_v11 = vsel %vm1294_vm8, %v7019_v15, %v1358_v26  ;;  %v9158_v10 = vrot.slane %v7235_v2, 7  ;;  %v7341_v51 = vsel %vm1332_vm10, %v7101_v16, %v7221_v56  ;;  %v9160_v15 = vld [vmem:[#allocation30_spill] sm:$0xff] }
 0x24f   :  { %v5136_v9 = vpack.i.bf16 %v1422_v11, %v1421_v36  ;;  %v1650_v19 = vsel %vm1602_vm0, %v1647_v23, %v1649_v5  ;;  %v7347_v4 = vsel %vm1333_vm11, %v7108_v0, %v7248_v45  ;;  %v7353_v31 = vsel %vm1316_vm13, %v7056_v60, %v7158_v33  ;;  %v9161_v33 = vld [vmem:[#allocation33_spill] sm:$0xff]  ;;  %v9162_v11 = vld [vmem:[#allocation31_spill] sm:$0xff] }
 0x250   :  { %v1648_v6 = vsel %vm1602_vm0, %v9158_v10, %v1647_v23  ;;  %v1669_v14 = vmul.f32 %v9160_v15, %v1650_v19  ;;  %v2043_v16 = vpack.c.bf16 %v7347_v4, %v7341_v51  ;;  %vm1295_vm14 = vcmp.ge.f32.partialorder %v7023_v12, 0.0 }
 0x251   :  { %v1668_v34 = vmul.f32 %v9159_v29, %v1648_v6  ;;  %5137 = vrot.lane.b32.xlu1 %v5136_v9, %s5533_s0  ;;  %vm1296_vm15 = vcmp.ge.f32.partialorder %v7027_v35, 0.0  ;;  %v1359_v0 = vmul.f32 0.2, %v7023_v12  ;;  %v1360_v56 = vmul.f32 0.2, %v7027_v35  ;;  %v9163_v6 = vld [vmem:[#allocation34_spill] sm:$0xff] }
 0x252   :  { %v1651_v45 = vrot.slane %v7163_v21, 7  ;;  %5060 = vmatmul.mubr.msk.bf16.gmra.mxu0 %vm670_vm1, %v2043_v16  ;;  %v1653_v60 = vrot.slane %v7177_v20, 7  ;;  %vm1334_vm13 = vcmp.ge.f32.partialorder %v7116_v3, 0.0  ;;  %vm1335_vm2 = vcmp.ge.f32.partialorder %v9161_v33, 0.0 }
 0x253   :  { %v5131_v32 = vpack.i.bf16 %v1669_v14, %v1668_v34  ;;  %vm1321_vm3 = vcmp.ge.f32.partialorder %v7071_v30, 0.0  ;;  %v1423_v25 = vsel %vm1295_vm14, %v7023_v12, %v1359_v0  ;;  %v1424_v39 = vsel %vm1296_vm15, %v7027_v35, %v1360_v56 }
 0x254   :  { %v1652_v40 = vsel %vm1602_vm0, %v1649_v5, %v1651_v45  ;;  %v7374_v26 = vsel %vm1334_vm13, %v7116_v3, %v7256_v44  ;;  %v5146_v23 = vpack.i.bf16 %v1424_v39, %v1423_v25  ;;  %v1654_v36 = vsel %vm1602_vm0, %v1651_v45, %v1653_v60  ;;  %v9164_v3 = vld [vmem:[#allocation32_spill] sm:$0xff]  ;;  %v9165_v45 = vld [vmem:[#allocation17_spill] sm:$0xff] }
 0x255   :  { %5132 = vrot.lane.b32.xlu0 %v5131_v32, %s5533_s0  ;;  %v1670_v10 = vmul.f32 %v9162_v11, %v1652_v40  ;;  %v7381_v9 = vsel %vm1335_vm2, %v9161_v33, %v9163_v6  ;;  %v7387_v12 = vsel %vm1317_vm5, %v7059_v49, %v7166_v50  ;;  %v7393_v35 = vsel %vm1318_vm7, %v7062_v63, %v7169_v47  ;;  %vm7572_vm2 = vmneg %vm670_vm1 }
 0x256   :  { %v1671_v44 = vmul.f32 %v9164_v3, %v1654_v36  ;;  %v2048_v5 = vpack.c.bf16 %v7381_v9, %v7374_v26  ;;  %5147 = vrot.lane.b32.xlu1 %v5146_v23, %s5533_s0  ;;  %vm1314_vm4 = vcmp.ge.f32.partialorder %v7050_v41, 0.0  ;;  %vm1322_vm6 = vcmp.ge.f32.partialorder %v7074_v54, 0.0 }
 0x257   :  { %v1386_v49 = vmul.f32 0.2, %v7074_v54  ;;  %v1852_v50 = vrot.slane %v7304_v55, 7  ;;  %v7406_v63 = vsel %vm1314_vm4, %v7050_v41, %v7152_v17  ;;  %vm1336_vm5 = vcmp.ge.f32.partialorder %v7120_v37, 0.0 }
 0x258   :  { %v5141_v19 = vpack.i.bf16 %v1671_v44, %v1670_v10  ;;  %5063 = vmatprep.mubr.msk.bf16.mxu0 %vm670_vm1, %v2048_v5  ;;  %vm1337_vm7 = vcmp.ge.f32.partialorder %v7126_v18, 0.0  ;;  %v7414_v47 = vsel %vm1319_vm9, %v7065_v1, %v7172_v27  ;;  %v1851_v34 = vrot.slane %v7406_v63, 7  ;;  %v9166_v44 = vld [vmem:[#allocation18_spill] sm:$0xff] }
 0x259   :  { %v7419_v14 = vsel %vm1336_vm5, %v7120_v37, %v7289_v38  ;;  %v7422_v16 = vsel %vm1337_vm7, %v7126_v18, %v1401_v52  ;;  %v7428_v41 = vsel %vm1320_vm12, %v7068_v28, %v7180_v61  ;;  %v1450_v1 = vsel %vm1322_vm6, %v7074_v54, %v1386_v49  ;;  %v5280_v28 = vld [vmem:[%s8913_s4 + $0xf8] sm:$0xff]  }
 0x25a   :  { %5142 = vrot.lane.b32.xlu0 %v5141_v19, %s5533_s0  ;;  %v2053_v17 = vpack.c.bf16 %v7422_v16, %v7419_v14  ;;  %vm1323_vm8 = vcmp.ge.f32.partialorder %v7077_v7, 0.0  ;;  %v1874_v37 = vsel %vm1602_vm0, 0.0, %v1851_v34  ;;  %v1853_v18 = vsel %vm1602_vm0, %v1851_v34, %v1852_v50  ;;  %4883 = vmatprep.subr.bf16.mxu1 %v5280_v28  ;;  %v9167_v34 = vld [vmem:[#allocation19_spill] sm:$0xff] }
 0x25b   :  { %vm1324_vm9 = vcmp.ge.f32.partialorder %v7080_v59, 0.0  ;;  %v1387_v27 = vmul.f32 0.2, %v7077_v7  ;;  %v1875_v61 = vmul.f32 %v9157_v43, %v1874_v37  ;;  %v1876_v54 = vmul.f32 %v9155_v53, %v1853_v18  ;;  %v9168_v37 = vld [vmem:[#allocation4_spill] sm:$0xff] }
 0x25c   :  { %5064 = vmatmul.mubr.msk.bf16.gmra.mxu0 %vm670_vm1, %v2053_v17  ;;  %v1388_v38 = vmul.f32 0.2, %v7080_v59  ;;  %v1854_v52 = vrot.slane %v7353_v31, 7  ;;  %v1856_v56 = vrot.slane %v7387_v12, 7  ;;  %vm1325_vm10 = vcmp.ge.f32.partialorder %v7083_v42, 0.0  ;;  %v9169_v18 = vld [vmem:[#allocation12_spill] sm:$0xff] }
 0x25d   :  { %v1451_v0 = vsel %vm1323_vm8, %v7077_v7, %v1387_v27  ;;  %vm1326_vm11 = vcmp.ge.f32.partialorder %v9165_v45, 0.0  ;;  %1931 = vrot.lane.b32.xlu1 %v1875_v61, %s5533_s0  ;;  %v5151_v32 = vpack.i.bf16 %v1450_v1, %v1876_v54  ;;  %v1389_v25 = vmul.f32 0.2, %v7083_v42 }
 0x25e   :  { %v1452_v60 = vsel %vm1324_vm9, %v7080_v59, %v1388_v38  ;;  %v1855_v33 = vsel %vm1602_vm0, %v1852_v50, %v1854_v52  ;;  %v7459_v7 = vsel %vm1321_vm3, %v7071_v30, %v7195_v58  ;;  %v1857_v39 = vsel %vm1602_vm0, %v1854_v52, %v1856_v56  ;;  %v9170_v38 = vld [vmem:[#allocation26_spill] sm:$0xff] }
 0x25f   :  { %v1877_v40 = vmul.f32 %v9153_v8, %v1855_v33  ;;  %v1390_v23 = vmul.f32 0.2, %v9165_v45  ;;  %5152 = vrot.lane.b32.xlu0 %v5151_v32, %s5533_s0  ;;  %v5161_v36 = vpack.i.bf16 %v1452_v60, %v1451_v0  ;;  %v1878_v59 = vmul.f32 %v9154_v62, %v1857_v39 }
 0x260   :  { %v1858_v10 = vrot.slane %v7393_v35, 7  ;;  %v1860_v6 = vrot.slane %v7414_v47, 7  ;;  %v1453_v30 = vsel %vm1325_vm10, %v7083_v42, %v1389_v25  ;;  %vm1327_vm12 = vcmp.ge.f32.partialorder %v9166_v44, 0.0 }
 0x261   :  { %v1454_v58 = vsel %vm1326_vm11, %v9165_v45, %v1390_v23  ;;  %v1391_v5 = vmul.f32 0.2, %v9166_v44  ;;  %5162 = vrot.lane.b32.xlu1 %v5161_v36, %s5533_s0  ;;  %v5156_v49 = vpack.i.bf16 %v1878_v59, %v1877_v40  ;;  %vm1328_vm14 = vcmp.ge.f32.partialorder %v9167_v34, 0.0 }
 0x262   :  { %v1859_v50 = vsel %vm1602_vm0, %v1856_v56, %v1858_v10  ;;  %v1861_v19 = vsel %vm1602_vm0, %v1858_v10, %v1860_v6  ;;  %v1392_v17 = vmul.f32 0.2, %v9167_v34  ;;  %v1265_v27 = vadd.f32 %v9169_v18, %v9168_v37  ;;  %v9171_v10 = vld [vmem:[#allocation43_spill] sm:$0xff]  ;;  %v9178_v37 = vld [vmem:[#allocation37_spill] sm:$0xff] }
 0x263   :  { %v1879_v1 = vmul.f32 %v9159_v29, %v1859_v50  ;;  %v1880_v42 = vmul.f32 %v9160_v15, %v1861_v19  ;;  %5157 = vrot.lane.b32.xlu0 %v5156_v49, %s5533_s0  ;;  %v5171_v28 = vpack.i.bf16 %v1454_v58, %v1453_v30  ;;  %v1862_v61 = vrot.slane %v7428_v41, 7 }
 0x264   :  { %v1864_v54 = vrot.slane %v7459_v7, 7  ;;  %v1233_v52 = vadd.f32 %v9169_v18, %v9170_v38  ;;  %v1455_v0 = vsel %vm1327_vm12, %v9166_v44, %v1391_v5  ;;  %v1456_v56 = vsel %vm1328_vm14, %v9167_v34, %v1392_v17  ;;  %v9172_v44 = vld [vmem:[#allocation44_spill] sm:$0xff]  ;;  %v9173_v5 = vld [vmem:[#allocation42_spill] sm:$0xff]  ;;  %v9179_v18 = vld [vmem:[#allocation39_spill] sm:$0xff] }
 0x265   :  { %5172 = vrot.lane.b32.xlu1 %v5171_v28, %s5533_s0  ;;  %v5166_v45 = vpack.i.bf16 %v1880_v42, %v1879_v1  ;;  %v1863_v32 = vsel %vm1602_vm0, %v1860_v6, %v1862_v61  ;;  %v5181_v39 = vpack.i.bf16 %v1456_v56, %v1455_v0  ;;  %vm1329_vm15 = vcmp.ge.f32.partialorder %v1265_v27, 0.0  ;;  %v9180_v28 = vld [vmem:[#allocation40_spill] sm:$0xff]  ;;  %v9183_v0 = vld [vmem:[#allocation41_spill] sm:$0xff] }
 0x266   :  { %v1865_v60 = vsel %vm1602_vm0, %v1862_v61, %v1864_v54  ;;  %v1881_v33 = vmul.f32 %v9162_v11, %v1863_v32  ;;  %v1361_v40 = vmul.f32 0.2, %v1233_v52  ;;  %v1393_v23 = vmul.f32 0.2, %v1265_v27  ;;  %v9182_v38 = vld [vmem:[#allocation28_spill] sm:$0xff] }
 0x267   :  { %v1882_v25 = vmul.f32 %v9164_v3, %v1865_v60  ;;  %5167 = vrot.lane.b32.xlu0 %v5166_v45, %s5533_s0  ;;  %vm1297_vm13 = vcmp.ge.f32.partialorder %v1233_v52, 0.0  ;;  %v5191_v6 = vpack.i.bf16 %v7235_v2, %v9171_v10  ;;  %v5186_v49 = vpack.i.bf16 %v9173_v5, %v9172_v44  ;;  %v9174_v2 = vld [vmem:[#allocation45_spill] sm:$0xff] }
 0x268   :  { %v1457_v59 = vsel %vm1329_vm15, %v1265_v27, %v1393_v23  ;;  %v1425_v58 = vsel %vm1297_vm13, %v1233_v52, %v1361_v40  ;;  %v5196_v19 = vpack.i.bf16 %v7143_v24, %v7137_v46  ;;  %v1614_v34 = vrot.slane %v7253_v57, 7 }
 0x269   :  { %5182 = vrot.lane.b32.xlu1 %v5181_v39, %s5533_s0  ;;  %v5176_v36 = vpack.i.bf16 %v1882_v25, %v1881_v33  ;;  %v5221_v30 = vpack.i.bf16 %v7428_v41, %v1457_v59  ;;  %v5201_v50 = vpack.i.bf16 %v7163_v21, %v1425_v58  ;;  %v1673_v1 = vrot.slane %v9174_v2, 7 }
 0x26a   :  { %v5206_v41 = vpack.i.bf16 %v7304_v55, %v7406_v63  ;;  %v5216_v21 = vpack.i.bf16 %v7414_v47, %v7393_v35  ;;  %v5211_v55 = vpack.i.bf16 %v7387_v12, %v7353_v31  ;;  %v1826_v63 = vrot.slane %v7419_v14, 7  ;;  %v9176_v47 = vld [vmem:[#allocation38_spill] sm:$0xff]  ;;  %v9177_v12 = vld [vmem:[#allocation36_spill] sm:$0xff] }
 0x26b   :  { %5177 = vrot.lane.b32.xlu0 %v5176_v36, %s5533_s0  ;;  %v1674_v24 = vsel %vm1602_vm0, %v1614_v34, %v1673_v1  ;;  %v1884_v42 = vrot.slane %v7422_v16, 7  ;;  %v1603_v31 = vrot.slane %v9176_v47, 7  ;;  %v1606_v17 = vrot.slane %v9177_v12, 7 }
 0x26c   :  { %v7527_v46 = vmul.f32 %v9164_v3, %v1674_v24  ;;  %v1608_v16 = vrot.slane %v9178_v37, 7  ;;  %v1604_v27 = vrot.slane %v9179_v18, 7  ;;  %v1610_v61 = vrot.slane %v9180_v28, 7 }
 0x26d   :  { %5192 = vrot.lane.b32.xlu1 %v5191_v6, %s5533_s0  ;;  %v7553_v52 = vmul.f32 0.2, %v9182_v38  ;;  %v1612_v56 = vrot.slane %v9183_v0, 7  ;;  %v1815_v45 = vrot.slane %v7312_v22, 7  ;;  %v1623_v32 = vsel %vm1602_vm0, 0.0, %v1603_v31 }
 0x26e   :  { %v1816_v60 = vrot.slane %v7316_v13, 7  ;;  %v1605_v25 = vsel %vm1602_vm0, %v1603_v31, %v1604_v27  ;;  %v1607_v39 = vsel %vm1602_vm0, %v1604_v27, %v1606_v17  ;;  %v1609_v40 = vsel %vm1602_vm0, %v1606_v17, %v1608_v16 }
 0x26f   :  { %5187 = vrot.lane.b32.xlu0 %v5186_v49, %s5533_s0  ;;  %v1818_v23 = vrot.slane %v7341_v51, 7  ;;  %v1624_v59 = vmul.f32 0.0, %v9157_v43  ;;  %v7565_v6 = vsel %vm1602_vm0, %v1608_v16, %v1610_v61  ;;  %v1625_v44 = vmul.f32 %v9155_v53, %v1623_v32 }
 0x270   :  { %v1626_v49 = vmul.f32 %v9153_v8, %v1605_v25  ;;  %v1677_v24 = vmul.f32 %v9155_v53, %v1605_v25  ;;  %v1679_v16 = vmul.f32 %v9154_v62, %v1609_v40  ;;  %vm5534_vm3 = vmmov 1  }
 0x271   :  { %5202 = vrot.lane.b32.xlu1 %v5201_v50, %s5533_s0  ;;  %v1627_v50 = vmul.f32 %v9154_v62, %v1607_v39  ;;  %vm7594_vm4 = vmpackc.low %vm5534_vm3, %vm7572_vm2  ;;  %vm1275_vm5 = vcmp.ge.f32.partialorder %v9182_v38, 0.0 }
 0x273   :  { %5197 = vrot.lane.b32.xlu0 %v5196_v19, %s5533_s0  ;;  %v1628_v19 = vmul.f32 %v9159_v29, %v1609_v40 }
 0x275   :  { %5207 = vrot.lane.b32.xlu1 %v5206_v41, %s5533_s0  ;;  %v1629_v41 = vmul.f32 %v9160_v15, %v7565_v6 }
 0x277   :  { %1762 = vrot.lane.b32.xlu0 %v7177_v20, %s5533_s0  ;;  %v1885_v20 = vsel %vm1602_vm0, %v1826_v63, %v1884_v42 }
 0x278   :  { %v7542_v35 = vmul.f32 %v9164_v3, %v1885_v20 }
 0x279   :  { %5217 = vrot.lane.b32.xlu1 %v5216_v21, %s5533_s0  ;;  %v1676_v21 = vmul.f32 %v9157_v43, %v1623_v32 }
 0x27a   :  { %9175 = vst [vmem:[#allocation14_spill] sm:$0xff] %v7542_v35 }
 0x27b   :  { %5212 = vrot.lane.b32.xlu0 %v5211_v55, %s5533_s0  ;;  %v1678_v55 = vmul.f32 %v9153_v8, %v1607_v39 }
 0x27d   :  { %1969 = vrot.lane.b32.xlu1 %v7459_v7, %s5533_s0  ;;  %v9181_v7 = vld [vmem:[#allocation27_spill] sm:$0xff] }
 0x27e   :  { %v7550_v54 = vmul.f32 0.2, %v9181_v7  ;;  %vm1274_vm6 = vcmp.ge.f32.partialorder %v9181_v7, 0.0 }
 0x27f   :  { %5222 = vrot.lane.b32.xlu0 %v5221_v30, %s5533_s0 }
 0x2ba   :  { %v5123_v33 = vpop.permute.xlu1 %5122 }
 0x2bb   :  { %v5124_v36 = vunpack.i.l.bf16 %v5123_v33  ;;  %v5113_v10 = vpop.permute.xlu0 %5112  ;;  %v5125_v30 = vunpack.i.h.bf16 %v5123_v33 }
 0x2bc   :  { %v5115_v58 = vunpack.i.h.bf16 %v5113_v10  ;;  %v5114_v5 = vunpack.i.l.bf16 %v5113_v10 }
 0x2bd   :  { %v1786_v17 = vsel %vm670_vm1, %v9179_v18, %v5124_v36  ;;  %v1787_v32 = vsel %vm670_vm1, %v9177_v12, %v5125_v30 }
 0x2be   :  { %v5128_v2 = vpop.permute.xlu1 %5127  ;;  %v7585_v27 = vsel %vm670_vm1, %v1624_v59, %v5115_v58  ;;  %v1785_v25 = vsel %vm670_vm1, %v9176_v47, %v5114_v5  ;;  %v5281_v58 = vld [vmem:[%s8913_s4 + $0xb8] sm:$0xff]  }
 0x2bf   :  { %v5130_v42 = vunpack.i.h.bf16 %v5128_v2  ;;  %v5129_v20 = vunpack.i.l.bf16 %v5128_v2  ;;  %v5118_v31 = vpop.permute.xlu0 %5117 }
 0x2c0   :  { %v5120_v33 = vunpack.i.h.bf16 %v5118_v31  ;;  %v5119_v10 = vunpack.i.l.bf16 %v5118_v31  ;;  %v7629_v31 = vsel %vm1602_vm0, %v1612_v56, %v1614_v34 }
 0x2c1   :  { %v7599_v18 = vsel %vm670_vm1, %v1626_v49, %v5129_v20  ;;  %v7602_v40 = vsel %vm670_vm1, %v1627_v50, %v5130_v42  ;;  %v7605_v36 = vsel %vm670_vm1, %v1677_v24, %v5129_v20  ;;  %v1820_v24 = vrot.slane %v7347_v4, 7 }
 0x2c2   :  { %9188 = vst [vmem:[#allocation11_spill] sm:$0xff] %v7605_v36  ;;  %v1777_v12 = vsel %vm670_vm1, %v1625_v44, %v5119_v10  ;;  %v4595_v47 = vpack.c.bf16 %v1785_v25, %v5120_v33  ;;  %v2019_v30 = vpack.c.bf16 %v7602_v40, %v7599_v18  ;;  %v7614_v5 = vsel %vm670_vm1, %v1676_v21, %v5119_v10  ;;  %v5282_v44 = vld [vmem:[%s8913_s4 + $0xf0] sm:$0xff]  }
 0x2c3   :  { %v5138_v59 = vpop.permute.xlu1 %5137  ;;  %9189 = vst [vmem:[#allocation13_spill] sm:$0xff] %v7614_v5  ;;  %v2014_v49 = vpack.c.bf16 %v1777_v12, %v7585_v27  ;;  %v2020_v20 = vpack.c.bf16 %v1787_v32, %v1786_v17  ;;  %v1613_v21 = vsel %vm1602_vm0, %v1610_v61, %v1612_v56  ;;  %v7638_v18 = vsel %vm670_vm1, %v1678_v55, %v5130_v42  ;;  %v5283_v56 = vld [vmem:[%s8913_s4 + $0xb0] sm:$0xff]   ;;  %v5284_v12 = vld [vmem:[%s8913_s4 + $0xe8] sm:$0xff]  }
 0x2c4   :  { %v5140_v50 = vunpack.i.h.bf16 %v5138_v59  ;;  %v5139_v2 = vunpack.i.l.bf16 %v5138_v59  ;;  %4596 = vmatprep.mubr.msk.bf16.mxu1 %vm7594_vm4, %v4595_v47  ;;  %9190 = vst [vmem:[#allocation15_spill] sm:$0xff] %v7638_v18  ;;  %v1824_v55 = vrot.slane %v7381_v9, 7  ;;  %v1631_v40 = vmul.f32 %v9164_v3, %v7629_v31 }
 0x2c5   :  { %2399 = vmatmul.mubr.bf16.vlgmr.msra.gmra.mxu1 %v2014_v49  ;;  %v1681_v49 = vmul.f32 %v9160_v15, %v1613_v21 }
 0x2c6   :  { %v7632_v10 = vsel %vm670_vm1, %v1628_v19, %v5139_v2  ;;  %v7635_v25 = vsel %vm670_vm1, %v1629_v41, %v5140_v50  ;;  %v7641_v17 = vsel %vm670_vm1, %v1679_v16, %v5139_v2  ;;  %2406 = vmatprep.mubr.bf16.mxu1 %v2020_v20  ;;  %4884 = vmatpush3.bf16.msra.mxu1 %v5281_v58  ;;  %v1822_v41 = vrot.slane %v7374_v26, 7 }
 0x2c7   :  { %v5133_v33 = vpop.permute.xlu0 %5132  ;;  %9191 = vst [vmem:[#allocation16_spill] sm:$0xff] %v7641_v17  ;;  %v1630_v16 = vmul.f32 %v9162_v11, %v1613_v21  ;;  %4885 = vmatprep.subr.bf16.mxu1 %v5282_v44  ;;  %v1680_v58 = vmul.f32 %v9159_v29, %v7565_v6 }
 0x2c8   :  { %v5135_v61 = vunpack.i.h.bf16 %v5133_v33  ;;  %v5134_v32 = vunpack.i.l.bf16 %v5133_v33  ;;  %v7652_v42 = vpop.permute.xlu1 %5147 }
 0x2c9   :  { %v9012_v47 = vunpack.i.h.bf16 %v7652_v42  ;;  %v5149_v59 = vunpack.i.l.bf16 %v7652_v42 }
 0x2ca   :  { %v1788_v2 = vsel %vm670_vm1, %v9178_v37, %v5134_v32  ;;  %v1789_v20 = vsel %vm670_vm1, %v9180_v28, %v5135_v61  ;;  %4886 = vmatpush3.bf16.msra.mxu1 %v5283_v56  ;;  %v5285_v37 = vld [vmem:[%s8913_s4 + $0xa8] sm:$0xff]   ;;  %v7683_v28 = vsel %vm670_vm1, %v1680_v58, %v5140_v50  ;;  %v9194_v32 = vld [vmem:[#allocation2_spill] sm:$0xff]  ;;  %v9195_v58 = vld [vmem:[#allocation5_spill] sm:$0xff] }
 0x2cb   :  { %v7672_v33 = vsel %vm670_vm1, %v1630_v16, %v5149_v59  ;;  %v7677_v6 = vsel %vm670_vm1, %v1631_v40, %v9012_v47  ;;  %9192 = vst [vmem:[#allocation30_spill] sm:$0xff] %v7683_v28  ;;  %v7686_v21 = vsel %vm670_vm1, %v1681_v49, %v5149_v59  ;;  %vm1280_vm7 = vcmp.ge.f32.partialorder %v9194_v32, 0.0  ;;  %4887 = vmatprep.subr.bf16.mxu1 %v5284_v12  ;;  %v5286_v56 = vld [vmem:[%s8913_s4 + $0xe0] sm:$0xff]  }
 0x2cc   :  { %v5143_v44 = vpop.permute.xlu0 %5142  ;;  %9193 = vst [vmem:[#allocation33_spill] sm:$0xff] %v7686_v21  ;;  %v1344_v16 = vmul.f32 0.2, %v9194_v32  ;;  %v2025_v50 = vpack.c.bf16 %v1789_v20, %v1788_v2  ;;  %vm1281_vm8 = vcmp.ge.f32.partialorder %v9195_v58, 0.0  ;;  %v1345_v59 = vmul.f32 0.2, %v9195_v58 }
 0x2cd   :  { %v1835_v49 = vsel %vm1602_vm0, 0.0, %v1815_v45  ;;  %v5145_v19 = vunpack.i.h.bf16 %v5143_v44  ;;  %v5144_v1 = vunpack.i.l.bf16 %v5143_v44  ;;  %2407 = vmatmul.mubr.bf16.gmra.mxu1 %v2019_v30  ;;  %v1817_v12 = vsel %vm1602_vm0, %v1815_v45, %v1816_v60  ;;  %v9196_v44 = vld [vmem:[#allocation35_spill] sm:$0xff] }
 0x2ce   :  { %v7712_v2 = vsel %vm1602_vm0, %v1816_v60, %v1818_v23  ;;  %2414 = vmatprep.mubr.bf16.mxu1 %v2025_v50  ;;  %v7720_v30 = vsel %vm1274_vm6, %v9181_v7, %v7550_v54  ;;  %v7726_v45 = vsel %vm1275_vm5, %v9182_v38, %v7553_v52  ;;  %4888 = vmatpush3.bf16.msra.mxu1 %v5285_v37  ;;  %v7729_v40 = vmul.f32 0.2, %v9196_v44  ;;  %v5287_v60 = vld [vmem:[%s8913_s4 + $0xa0] sm:$0xff]   ;;  %v5288_v37 = vld [vmem:[%s8913_s4 + $0xd8] sm:$0xff]  }
 0x2cf   :  { %v7714_v20 = vpop.permute.xlu1 %1931  ;;  %v1821_v7 = vsel %vm1602_vm0, %v1818_v23, %v1820_v24  ;;  %v7742_v54 = vsel %vm1280_vm7, %v9194_v32, %v1344_v16  ;;  %v1836_v38 = vmul.f32 %v9155_v53, %v1835_v49  ;;  %4889 = vmatprep.subr.bf16.mxu1 %v5286_v56  ;;  %v7748_v52 = vsel %vm1602_vm0, %v1820_v24, %v1822_v41 }
 0x2d0   :  { %v7754_v50 = vsel %vm1602_vm0, %v1822_v41, %v1824_v55  ;;  %v7759_v32 = vsel %vm1281_vm8, %v9195_v58, %v1345_v59  ;;  %v1837_v16 = vmul.f32 %v9153_v8, %v1817_v12  ;;  %v1838_v56 = vmul.f32 %v9154_v62, %v7712_v2 }
 0x2d1   :  { %v5153_v23 = vpop.permute.xlu0 %5152  ;;  %v7767_v24 = vsel %vm1602_vm0, %v1824_v55, %v1826_v63  ;;  %v1790_v41 = vsel %vm670_vm1, %v9183_v0, %v5144_v1  ;;  %v1791_v61 = vsel %vm670_vm1, %v7253_v57, %v5145_v19  ;;  %v1839_v58 = vmul.f32 %v9159_v29, %v1821_v7  ;;  %v9197_v55 = vld [vmem:[#allocation29_spill] sm:$0xff]  ;;  %v9198_v0 = vld [vmem:[#allocation8_spill] sm:$0xff] }
 0x2d2   :  { %v5155_v47 = vunpack.i.h.bf16 %v5153_v23  ;;  %4890 = vmatpush3.bf16.msra.mxu1 %v5287_v60  ;;  %v1840_v34 = vmul.f32 %v9160_v15, %v7748_v52  ;;  %v7781_v63 = vmul.f32 %v9162_v11, %v7754_v50  ;;  %vm1276_vm9 = vcmp.ge.f32.partialorder %v9197_v55, 0.0  ;;  %v5290_v60 = vld [vmem:[%s8913_s4 + $0xd0] sm:$0xff]  }
 0x2d3   :  { %v5163_v59 = vpop.permute.xlu1 %5162  ;;  %vm1277_vm10 = vcmp.ge.f32.partialorder %v9198_v0, 0.0  ;;  %4891 = vmatprep.subr.bf16.mxu1 %v5288_v37  ;;  %v1340_v28 = vmul.f32 0.2, %v9197_v55  ;;  %v2030_v18 = vpack.c.bf16 %v1791_v61, %v1790_v41  ;;  %v1341_v5 = vmul.f32 0.2, %v9198_v0 }
 0x2d4   :  { %v5165_v57 = vunpack.i.h.bf16 %v5163_v59  ;;  %v5164_v1 = vunpack.i.l.bf16 %v5163_v59  ;;  %v7786_v19 = vsel %vm670_vm1, %v1836_v38, %v5155_v47  ;;  %v1888_v59 = vmul.f32 %v9155_v53, %v1817_v12  ;;  %v5291_v53 = vld [vmem:[%s8913_s4 + $0x90] sm:$0xff]  }
 0x2d5   :  { %v7792_v21 = vpop.permute.xlu0 %5157  ;;  %v5154_v36 = vunpack.i.l.bf16 %v5153_v23  ;;  %v9199_v38 = vpack.c.bf16 %v7635_v25, %v7632_v10  ;;  %v1887_v61 = vmul.f32 %v9157_v43, %v1835_v49  ;;  %v1842_v10 = vmul.f32 %v9164_v3, %v7767_v24  ;;  %v9200_v25 = vld [vmem:[#allocation6_spill] sm:$0xff]  ;;  %v9201_v49 = vld [vmem:[#allocation3_spill] sm:$0xff] }
 0x2d6   :  { %v7802_v37 = vsel %vm670_vm1, %v1837_v16, %v5164_v1  ;;  %v7805_v35 = vsel %vm670_vm1, %v1838_v56, %v5165_v57  ;;  %4892 = vmatpush3.bf16.msra.mxu1 %v5289_v48  ;;  %vm1278_vm11 = vcmp.ge.f32.partialorder %v9200_v25, 0.0  ;;  %v7817_v12 = vsel %vm670_vm1, %v1888_v59, %v5164_v1 }
 0x2d7   :  { %2415 = vmatmul.mubr.bf16.gmra.mxu1 %v9199_v38  ;;  %v5173_v41 = vpop.permute.xlu1 %5172  ;;  %v2039_v17 = vpack.c.bf16 %v7805_v35, %v7802_v37  ;;  %4893 = vmatprep.subr.bf16.mxu1 %v5290_v60  ;;  %v1404_v48 = vsel %vm1276_vm9, %v9197_v55, %v1340_v28  ;;  %vm1279_vm12 = vcmp.ge.f32.partialorder %v9201_v49, 0.0  ;;  %v7827_v3 = vsel %vm670_vm1, %v1887_v61, %v5155_v47 }
 0x2d8   :  { %2422 = vmatprep.mubr.bf16.mxu1 %v2030_v18  ;;  %v5175_v23 = vunpack.i.h.bf16 %v5173_v41  ;;  %v5174_v43 = vunpack.i.l.bf16 %v5173_v41  ;;  %v5292_v18 = vld [vmem:[%s8913_s4 + $0xc8] sm:$0xff]   ;;  %v1405_v56 = vsel %vm1277_vm10, %v9198_v0, %v1341_v5  ;;  %v1342_v1 = vmul.f32 0.2, %v9200_v25 }
 0x2d9   :  { %v7829_v16 = vpop.permute.xlu0 %5167  ;;  %v2037_v60 = vpack.c.bf16 %v7817_v12, %v7827_v3  ;;  %v1890_v59 = vmul.f32 %v9154_v62, %v1821_v7  ;;  %v1991_v28 = vsel %vm670_vm1, %v7312_v22, %v5154_v36  ;;  %v1889_v38 = vmul.f32 %v9153_v8, %v7712_v2  ;;  %v5293_v62 = vld [vmem:[%s8913_s4 + $0x88] sm:$0xff]   ;;  %v5294_v7 = vld [vmem:[%s8913_s4 + $0xc0] sm:$0xff]  }
 0x2da   :  { %v7841_v55 = vsel %vm670_vm1, %v1839_v58, %v5174_v43  ;;  %v7844_v47 = vsel %vm670_vm1, %v1840_v34, %v5175_v23  ;;  %4894 = vmatpush3.bf16.msra.mxu1 %v5291_v53  ;;  %v1343_v22 = vmul.f32 0.2, %v9201_v49  ;;  %v1682_v36 = vmul.f32 %v9162_v11, %v7629_v31 }
 0x2db   :  { %v7848_v5 = vpop.permute.xlu1 %5182  ;;  %v2044_v0 = vpack.c.bf16 %v7844_v47, %v7841_v55  ;;  %v7859_v34 = vsel %vm670_vm1, %v1890_v59, %v5174_v43  ;;  %4895 = vmatprep.subr.bf16.mxu1 %v5292_v18  ;;  %v7867_v58 = vsel %vm670_vm1, %v1889_v38, %v5165_v57  ;;  %v1892_v61 = vmul.f32 %v9160_v15, %v7754_v50  ;;  %v9219_v55 = vld [vmem:[#allocation33_spill] sm:$0xff]  ;;  %v9220_v47 = vld [vmem:[#allocation30_spill] sm:$0xff] }
 0x2dc   :  { %v5185_v8 = vunpack.i.h.bf16 %v7848_v5  ;;  %v5184_v2 = vunpack.i.l.bf16 %v7848_v5  ;;  %v4599_v31 = vpack.c.bf16 %v1991_v28, %v7714_v20  ;;  %v5160_v41 = vunpack.i.h.bf16 %v7792_v21  ;;  %v9203_v20 = vld [vmem:[#allocation9_spill] sm:$0xff]  ;;  %v9216_v5 = vld [vmem:[#allocation16_spill] sm:$0xff] }
 0x2dd   :  { %v5159_v53 = vunpack.i.l.bf16 %v7792_v21  ;;  %v7874_v43 = vpop.permute.xlu0 %5177  ;;  %v9202_v59 = vpack.c.bf16 %v7677_v6, %v7672_v33  ;;  %vm1306_vm14 = vcmp.ge.f32.partialorder %v9203_v20, 0.0  ;;  %v1891_v21 = vmul.f32 %v9159_v29, %v7748_v52  ;;  %v5295_v6 = vld [vmem:[%s8913_s4 + $0x80] sm:$0xff]  }
 0x2de   :  { %v7883_v57 = vsel %vm670_vm1, %v7781_v63, %v5184_v2  ;;  %v7888_v15 = vsel %vm670_vm1, %v1842_v10, %v5185_v8  ;;  %4896 = vmatpush3.bf16.msra.mxu1 %v5293_v62  ;;  %v1370_v63 = vmul.f32 0.2, %v9203_v20  ;;  %v9204_v10 = vld [vmem:[#allocation20_spill] sm:$0xff]  ;;  %v7903_v38 = vsel %vm670_vm1, %v1892_v61, %v5184_v2 }
 0x2df   :  { %2423 = vmatmul.mubr.bf16.gmra.mxu1 %v9202_v59  ;;  %v5193_v50 = vpop.permute.xlu1 %5192  ;;  %v2049_v33 = vpack.c.bf16 %v7888_v15, %v7883_v57  ;;  %v1371_v28 = vmul.f32 0.2, %v9204_v10  ;;  %4897 = vmatprep.subr.bf16.mxu1 %v5294_v7  ;;  %vm1307_vm15 = vcmp.ge.f32.partialorder %v9204_v10, 0.0  ;;  %v7907_v39 = vsel %vm670_vm1, %v1891_v21, %v5175_v23 }
 0x2e0   :  { %4600 = vmatprep.mubr.msk.bf16.mxu1 %vm7594_vm4, %v4599_v31  ;;  %v5195_v29 = vunpack.i.h.bf16 %v5193_v50  ;;  %v5194_v52 = vunpack.i.l.bf16 %v5193_v50  ;;  %v1992_v31 = vsel %vm670_vm1, %v7316_v13, %v5159_v53  ;;  %v1993_v59 = vsel %vm670_vm1, %v7341_v51, %v5160_v41 }
 0x2e1   :  { %v5188_v62 = vpop.permute.xlu0 %5187  ;;  %v1406_v2 = vsel %vm1278_vm11, %v9200_v25, %v1342_v1  ;;  %v2047_v61 = vpack.c.bf16 %v7903_v38, %v7907_v39  ;;  %v1407_v51 = vsel %vm1279_vm12, %v9201_v49, %v1343_v22  ;;  %v1434_v25 = vsel %vm1306_vm14, %v9203_v20, %v1370_v63  ;;  %v9206_v22 = vld [vmem:[#allocation21_spill] sm:$0xff] }
 0x2e2   :  { %v5190_v7 = vunpack.i.h.bf16 %v5188_v62  ;;  %v5189_v50 = vunpack.i.l.bf16 %v5188_v62  ;;  %v7919_v18 = vsel %vm670_vm1, %v1404_v48, %v5194_v52  ;;  %v7922_v23 = vsel %vm670_vm1, %v1405_v56, %v5195_v29  ;;  %4898 = vmatpush3.bf16.msra.mxu1 %v5295_v6  ;;  %v9208_v62 = vld [vmem:[#allocation23_spill] sm:$0xff] }
 0x2e3   :  { %v5203_v21 = vpop.permute.xlu1 %5202  ;;  %v2021_v13 = vpack.c.bf16 %v7922_v23, %v7919_v18  ;;  %v1435_v48 = vsel %vm1307_vm15, %v9204_v10, %v1371_v28  ;;  %v9205_v53 = vunpack.i.h.bf16 %v7652_v42  ;;  %vm1308_vm13 = vcmp.ge.f32.partialorder %v9206_v22, 0.0 }
 0x2e4   :  { %v7937_v56 = vsel %vm670_vm1, %v7720_v30, %v5189_v50  ;;  %v7941_v1 = vsel %vm670_vm1, %v7726_v45, %v5190_v7  ;;  %v5204_v41 = vunpack.i.l.bf16 %v5203_v21  ;;  %v5170_v20 = vunpack.i.h.bf16 %v7829_v16  ;;  %v9209_v7 = vld [vmem:[#allocation24_spill] sm:$0xff] }
 0x2e5   :  { %v7946_v49 = vsel %vm670_vm1, %v1682_v36, %v9205_v53  ;;  %v5169_v6 = vunpack.i.l.bf16 %v7829_v16  ;;  %v2016_v30 = vpack.c.bf16 %v7941_v1, %v7937_v56  ;;  %v5198_v63 = vpop.permute.xlu0 %5197  ;;  %v2040_v10 = vpack.c.bf16 %v1993_v59, %v1992_v31 }
 0x2e6   :  { %v5205_v28 = vunpack.i.h.bf16 %v5203_v21  ;;  %v5200_v45 = vunpack.i.h.bf16 %v5198_v63  ;;  %v5199_v29 = vunpack.i.l.bf16 %v5198_v63  ;;  %v9207_v42 = vpack.c.bf16 %v7786_v19, %v7585_v27 }
 0x2e7   :  { %v7958_v36 = vsel %vm670_vm1, %v7527_v46, %v5204_v41  ;;  %v5208_v52 = vpop.permute.xlu1 %5207  ;;  %vm1310_vm2 = vcmp.ge.f32.partialorder %v9208_v62, 0.0  ;;  %vm1311_vm4 = vcmp.ge.f32.partialorder %v9209_v7, 0.0  ;;  %v1374_v31 = vmul.f32 0.2, %v9208_v62 }
 0x2e8   :  { %2431 = vmatmul.mubr.bf16.gmra.mxu1 %v9207_v42  ;;  %v2032_v16 = vpack.c.bf16 %v7958_v36, %v7946_v49  ;;  %v5210_v59 = vunpack.i.h.bf16 %v5208_v52  ;;  %v5209_v50 = vunpack.i.l.bf16 %v5208_v52  ;;  %v7966_v27 = vsel %vm670_vm1, %v1406_v2, %v5199_v29 }
 0x2e9   :  { %2438 = vmatprep.mubr.bf16.mxu1 %v2040_v10  ;;  %v7969_v19 = vsel %vm670_vm1, %v1407_v51, %v5200_v45  ;;  %v1763_v46 = vpop.permute.xlu0 %1762  ;;  %v1994_v21 = vsel %vm670_vm1, %v7347_v4, %v5169_v6  ;;  %v1995_v41 = vsel %vm670_vm1, %v7374_v26, %v5170_v20  ;;  %v1375_v63 = vmul.f32 0.2, %v9209_v7  ;;  %v9210_v20 = vld [vmem:[#allocation22_spill] sm:$0xff] }
 0x2ea   :  { %v2026_v53 = vpack.c.bf16 %v7969_v19, %v7966_v27  ;;  %v1798_v10 = vsel %vm670_vm1, %v7742_v54, %v5205_v28  ;;  %v1799_v2 = vsel %vm670_vm1, %v7759_v32, %v1763_v46  ;;  %v1998_v51 = vsel %vm670_vm1, %v1434_v25, %v5209_v50 }
 0x2eb   :  { %v1999_v45 = vsel %vm670_vm1, %v1435_v48, %v5210_v59  ;;  %v2031_v29 = vpack.c.bf16 %v1799_v2, %v1798_v10  ;;  %v5218_v4 = vpop.permute.xlu1 %5217  ;;  %v1372_v26 = vmul.f32 0.2, %v9206_v22  ;;  %v1373_v42 = vmul.f32 0.2, %v9210_v20 }
 0x2ec   :  { %v2036_v6 = vpack.c.bf16 %v1999_v45, %v1998_v51  ;;  %v5220_v52 = vunpack.i.h.bf16 %v5218_v4  ;;  %v5219_v27 = vunpack.i.l.bf16 %v5218_v4  ;;  %vm1309_vm6 = vcmp.ge.f32.partialorder %v9210_v20, 0.0 }
 0x2ed   :  { %v1438_v54 = vsel %vm1310_vm2, %v9208_v62, %v1374_v31  ;;  %v5180_v32 = vunpack.i.h.bf16 %v7874_v43  ;;  %v5179_v25 = vunpack.i.l.bf16 %v7874_v43  ;;  %v5213_v48 = vpop.permute.xlu0 %5212  ;;  %v2045_v28 = vpack.c.bf16 %v1995_v41, %v1994_v21  ;;  %v9211_v41 = vld [vmem:[#allocation25_spill] sm:$0xff] }
 0x2ee   :  { %v1439_v59 = vsel %vm1311_vm4, %v9209_v7, %v1375_v63  ;;  %v5215_v50 = vunpack.i.h.bf16 %v5213_v48  ;;  %v5214_v19 = vunpack.i.l.bf16 %v5213_v48  ;;  %v2002_v46 = vsel %vm670_vm1, %v1438_v54, %v5219_v27 }
 0x2ef   :  { %v2003_v62 = vsel %vm670_vm1, %v1439_v59, %v5220_v52  ;;  %v1436_v43 = vsel %vm1308_vm13, %v9206_v22, %v1372_v26  ;;  %v1437_v31 = vsel %vm1309_vm6, %v9210_v20, %v1373_v42  ;;  %v1376_v7 = vmul.f32 0.2, %v9211_v41 }
 0x2f0   :  { %2439 = vmatmul.mubr.bf16.gmra.mxu1 %v2039_v17  ;;  %v2046_v21 = vpack.c.bf16 %v2003_v62, %v2002_v46  ;;  %vm1313_vm5 = vcmp.ge.f32.partialorder %v9196_v44, 0.0  ;;  %v2000_v63 = vsel %vm670_vm1, %v1436_v43, %v5214_v19  ;;  %v2001_v35 = vsel %vm670_vm1, %v1437_v31, %v5215_v50  ;;  %v1970_v17 = vpop.permute.xlu1 %1969 }
 0x2f1   :  { %2446 = vmatprep.mubr.bf16.mxu1 %v2045_v28  ;;  %vm1312_vm7 = vcmp.ge.f32.partialorder %v9211_v41, 0.0  ;;  %v5223_v37 = vpop.permute.xlu0 %5222  ;;  %v2041_v10 = vpack.c.bf16 %v2001_v35, %v2000_v63  ;;  %v1893_v2 = vmul.f32 %v9162_v11, %v7767_v24  ;;  %v1996_v45 = vsel %vm670_vm1, %v7381_v9, %v5179_v25  ;;  %v9212_v11 = vld [vmem:[#allocation14_spill] sm:$0xff] }
 0x2f2   :  { %v5225_v22 = vunpack.i.h.bf16 %v5223_v37  ;;  %v5224_v51 = vunpack.i.l.bf16 %v5223_v37  ;;  %v1997_v4 = vsel %vm670_vm1, %v7419_v14, %v5180_v32  ;;  %v1441_v26 = vsel %vm1313_vm5, %v9196_v44, %v7729_v40  ;;  %v9213_v14 = vld [vmem:[#allocation11_spill] sm:$0xff]  ;;  %v9214_v40 = vld [vmem:[#allocation13_spill] sm:$0xff] }
 0x2f3   :  { %v1440_v20 = vsel %vm1312_vm7, %v9211_v41, %v1376_v7  ;;  %v2005_v42 = vsel %vm670_vm1, %v1441_v26, %v1970_v17  ;;  %v2012_v52 = vsel %vm670_vm1, %v1893_v2, %v5185_v8  ;;  %v2050_v9 = vpack.c.bf16 %v1997_v4, %v1996_v45  ;;  %v9217_v8 = vld [vmem:[#allocation15_spill] sm:$0xff] }
 0x2f4   :  { %v2013_v24 = vsel %vm670_vm1, %v9212_v11, %v5224_v51  ;;  %v2004_v27 = vsel %vm670_vm1, %v1440_v20, %v5225_v22  ;;  %v9215_v44 = vpack.c.bf16 %v9213_v14, %v9214_v40  ;;  %v9218_v32 = vpack.c.bf16 %v9216_v5, %v9217_v8 }
 0x2f5   :  { %v2052_v54 = vpack.c.bf16 %v2013_v24, %v2012_v52  ;;  %v2051_v25 = vpack.c.bf16 %v2005_v42, %v2004_v27  ;;  %v9222_v57 = vpack.c.bf16 %v7859_v34, %v7867_v58 }
 0x2f8   :  { %2447 = vmatmul.mubr.bf16.gmra.mxu1 %v2044_v0  ;;  %v9221_v0 = vpack.c.bf16 %v9219_v55, %v9220_v47 }
 0x2f9   :  { %2454 = vmatprep.mubr.bf16.mxu1 %v2050_v9 }
 0x300   :  { %2455 = vmatmul.mubr.bf16.gmra.mxu1 %v2049_v33  ;;  %v5053_v42 = vpop.f32.mrf.mxu0 }
 0x301   :  { %2495 = vmatprep.mubr.bf16.mxu1 %v9215_v44 }
 0x302   :  { %v2594_v27 = vpop.f32.mrf.mxu0 }
 0x304   :  { %v5054_v14 = vpop.f32.mrf.mxu0 }
 0x306   :  { %v2597_v55 = vpop.f32.mrf.mxu0 }
 0x308   :  { %2496 = vmatmul.mubr.bf16.vlgmr.msra.gmra.mxu1 %v2016_v30 }
 0x309   :  { %2503 = vmatprep.mubr.bf16.mxu1 %v9218_v32 }
 0x310   :  { %2504 = vmatmul.mubr.bf16.gmra.mxu1 %v2021_v13 }
 0x311   :  { %2511 = vmatprep.mubr.bf16.mxu1 %v9221_v0 }
 0x318   :  { %2512 = vmatmul.mubr.bf16.gmra.mxu1 %v2026_v53 }
 0x319   :  { %2519 = vmatprep.mubr.bf16.mxu1 %v2032_v16 }
 0x320   :  { %2520 = vmatmul.mubr.bf16.gmra.mxu1 %v2031_v29 }
 0x321   :  { %2527 = vmatprep.mubr.bf16.mxu1 %v2037_v60 }
 0x328   :  { %2528 = vmatmul.mubr.bf16.gmra.mxu1 %v2036_v6 }
 0x329   :  { %2535 = vmatprep.mubr.bf16.mxu1 %v9222_v57 }
 0x330   :  { %2536 = vmatmul.mubr.bf16.gmra.mxu1 %v2041_v10 }
 0x331   :  { %2543 = vmatprep.mubr.bf16.mxu1 %v2047_v61 }
 0x338   :  { %2544 = vmatmul.mubr.bf16.gmra.mxu1 %v2046_v21 }
 0x339   :  { %2551 = vmatprep.mubr.bf16.mxu1 %v2052_v54 }
 0x340   :  { %2552 = vmatmul.mubr.bf16.gmra.mxu1 %v2051_v25 }
 0x385   :  { %v4835_v18 = vpop.f32.mrf.mxu1 }
 0x387   :  { %v4836_v15 = vpop.f32.mrf.mxu1 }
 0x388   :  { %v4837_v33 = vadd.f32 %v4836_v15, %v4835_v18 }
 0x389   :  { %v4838_v23 = vpop.f32.mrf.mxu1 }
 0x38b   :  { %v4839_v13 = vpop.f32.mrf.mxu1 }
 0x38c   :  { %v4840_v12 = vadd.f32 %v4839_v13, %v4838_v23 }
 0x38d   :  { %v4841_v3 = vpop.f32.mrf.mxu1 }
 0x38f   :  { %v4842_v60 = vpop.f32.mrf.mxu1 }
 0x390   :  { %v4843_v56 = vadd.f32 %v4842_v60, %v4841_v3  ;;  %v5057_v3 = vpop.f32.mrf.mxu0 }
 0x391   :  { %v4844_v1 = vpop.f32.mrf.mxu1 }
 0x393   :  { %v4845_v34 = vpop.f32.mrf.mxu1 }
 0x394   :  { %v8058_v58 = vadd.f32 %v4845_v34, %v4844_v1 }
 0x397   :  { %v4847_v49 = vpop.f32.mrf.mxu1 }
 0x399   :  { %v4848_v30 = vpop.f32.mrf.mxu1 }
 0x39a   :  { %v8060_v38 = vadd.f32 %v4848_v30, %v4847_v49  ;;  %v2610_v30 = vpop.f32.mrf.mxu0 }
 0x39b   :  { %v4850_v39 = vpop.f32.mrf.mxu1 }
 0x39d   :  { %v4851_v61 = vpop.f32.mrf.mxu1 }
 0x39e   :  { %v8062_v36 = vadd.f32 %v4851_v61, %v4850_v39 }
 0x39f   :  { %v4853_v16 = vpop.f32.mrf.mxu1 }
 0x3a1   :  { %v4854_v53 = vpop.f32.mrf.mxu1 }
 0x3a2   :  { %v8064_v29 = vadd.f32 %v4854_v53, %v4853_v16 }
 0x3a3   :  { %v4856_v6 = vpop.f32.mrf.mxu1 }
 0x3a5   :  { %v4857_v48 = vpop.f32.mrf.mxu1 }
 0x3a6   :  { %v8066_v28 = vadd.f32 %v4857_v48, %v4856_v6  ;;  %v5058_v48 = vpop.f32.mrf.mxu0 }
 0x3a8   :  { %v4859_v59 = vpop.f32.mrf.mxu1 }
 0x3aa   :  { %v4860_v50 = vpop.f32.mrf.mxu1 }
 0x3ab   :  { %v8068_v19 = vadd.f32 %v4860_v50, %v4859_v59 }
 0x3ac   :  { %v4862_v46 = vpop.f32.mrf.mxu1 }
 0x3ae   :  { %v4863_v62 = vpop.f32.mrf.mxu1 }
 0x3af   :  { %v8070_v43 = vadd.f32 %v4863_v62, %v4862_v46 }
 0x3b0   :  { %v4865_v31 = vpop.f32.mrf.mxu1 }
 0x3b2   :  { %v4866_v21 = vpop.f32.mrf.mxu1 }
 0x3b3   :  { %v8072_v41 = vadd.f32 %v4866_v21, %v4865_v31  ;;  %v2613_v21 = vpop.f32.mrf.mxu0 }
 0x3b4   :  { %v4868_v7 = vpop.f32.mrf.mxu1 }
 0x3b6   :  { %v4869_v63 = vpop.f32.mrf.mxu1 }
 0x3b7   :  { %v8074_v35 = vadd.f32 %v4869_v63, %v4868_v7 }
 0x3b8   :  { %v4871_v17 = vpop.f32.mrf.mxu1 }
 0x3ba   :  { %v4872_v37 = vpop.f32.mrf.mxu1 }
 0x3bb   :  { %v8076_v10 = vadd.f32 %v4872_v37, %v4871_v17 }
 0x3bc   :  { %v4874_v2 = vpop.f32.mrf.mxu1 }
 0x3be   :  { %v4875_v22 = vpop.f32.mrf.mxu1 }
 0x3bf   :  { %v8078_v51 = vadd.f32 %v4875_v22, %v4874_v2  ;;  %v5061_v22 = vpop.f32.mrf.mxu0 }
 0x3c0   :  { %v4877_v45 = vpop.f32.mrf.mxu1 }
 0x3c2   :  { %v4878_v4 = vpop.f32.mrf.mxu1 }
 0x3c3   :  { %v8080_v26 = vadd.f32 %v4878_v4, %v4877_v45 }
 0x3c4   :  { %v4880_v20 = vpop.f32.mrf.mxu1 }
 0x3c6   :  { %v4881_v52 = vpop.f32.mrf.mxu1 }
 0x3c7   :  { %v8082_v11 = vadd.f32 %v4881_v52, %v4880_v20 }
 0x3c8   :  { %v4899_v24 = vpop.f32.mrf.mxu1 }
 0x3ca   :  { %v4900_v9 = vpop.f32.mrf.mxu1 }
 0x3cb   :  { %v4901_v54 = vadd.f32 %v4900_v9, %v4899_v24  ;;  %v2626_v24 = vpop.f32.mrf.mxu0 }
 0x3cc   :  { %v4902_v25 = vpop.f32.mrf.mxu1 }
 0x3cd   :  { %v2498_v44 = vadd.f32 %v4901_v54, %v4837_v33 }
 0x3ce   :  { %v4903_v40 = vpop.f32.mrf.mxu1 }
 0x3cf   :  { %v4904_v5 = vadd.f32 %v4903_v40, %v4902_v25  ;;  %v8084_v0 = vadd.f32 %v2594_v27, %v2498_v44  ;;  %v5062_v40 = vpop.f32.mrf.mxu0 }
 0x3d0   :  { %v4905_v8 = vpop.f32.mrf.mxu1 }
 0x3d1   :  { %v2501_v32 = vadd.f32 %v4904_v5, %v4840_v12 }
 0x3d2   :  { %v4906_v47 = vpop.f32.mrf.mxu1 }
 0x3d3   :  { %v8086_v57 = vadd.f32 %v2597_v55, %v2501_v32  ;;  %v4907_v18 = vadd.f32 %v4906_v47, %v4905_v8  ;;  %v2629_v47 = vpop.f32.mrf.mxu0 }
 0x3d4   :  { %v4908_v15 = vpop.f32.mrf.mxu1 }
 0x3d5   :  { %v2659_v23 = vadd.f32 %v8086_v57, %v8084_v0  ;;  %v2506_v13 = vadd.f32 %v4907_v18, %v4843_v56 }
 0x3d6   :  { %v4909_v60 = vpop.f32.mrf.mxu1 }
 0x3d7   :  { %v8090_v1 = vadd.f32 %v5053_v42, %v2506_v13  ;;  %v4910_v33 = vadd.f32 %v4909_v60, %v4908_v15  ;;  %v5065_v60 = vpop.f32.mrf.mxu0 }
 0x3d8   :  { %v4911_v34 = vpop.f32.mrf.mxu1 }
 0x3d9   :  { %v2660_v12 = vadd.f32 %v2659_v23, %v8090_v1  ;;  %v2509_v49 = vadd.f32 %v4910_v33, %v8058_v58 }
 0x3da   :  { %v4912_v39 = vpop.f32.mrf.mxu1 }
 0x3db   :  { %v8094_v61 = vadd.f32 %v5054_v14, %v2509_v49  ;;  %v4913_v16 = vadd.f32 %v4912_v39, %v4911_v34  ;;  %v2642_v39 = vpop.f32.mrf.mxu0 }
 0x3dc   :  { %v4914_v53 = vpop.f32.mrf.mxu1 }
 0x3dd   :  { %v2661_v6 = vadd.f32 %v2660_v12, %v8094_v61  ;;  %v2514_v56 = vadd.f32 %v4913_v16, %v8060_v38 }
 0x3de   :  { %v4915_v59 = vpop.f32.mrf.mxu1 }
 0x3df   :  { %v8098_v50 = vadd.f32 %v2610_v30, %v2514_v56  ;;  %v4916_v46 = vadd.f32 %v4915_v59, %v4914_v53  ;;  %v8129_v56 = vld [vmem:[%s8916_s10] sm:$0xff]  }
 0x3e0   :  { %v4917_v62 = vpop.f32.mrf.mxu1  ;;  %5075 = vmatprep.mubr.msk.bf16.mxu0 %vm670_vm1, %v8129_v56 }
 0x3e1   :  { %v2662_v31 = vadd.f32 %v2661_v6, %v8098_v50  ;;  %v2517_v58 = vadd.f32 %v4916_v46, %v8062_v36  ;;  %v5066_v46 = vpop.f32.mrf.mxu0 }
 0x3e2   :  { %v4918_v7 = vpop.f32.mrf.mxu1 }
 0x3e3   :  { %v8102_v63 = vadd.f32 %v2613_v21, %v2517_v58  ;;  %v4919_v17 = vadd.f32 %v4918_v7, %v4917_v62 }
 0x3e4   :  { %v4920_v37 = vpop.f32.mrf.mxu1 }
 0x3e5   :  { %v2663_v2 = vadd.f32 %v2662_v31, %v8102_v63  ;;  %v2522_v38 = vadd.f32 %v4919_v17, %v8064_v29  ;;  %v2645_v17 = vpop.f32.mrf.mxu0 }
 0x3e6   :  { %v4921_v45 = vpop.f32.mrf.mxu1 }
 0x3e7   :  { %v8106_v4 = vadd.f32 %v5057_v3, %v2522_v38  ;;  %v4922_v20 = vadd.f32 %v4921_v45, %v4920_v37 }
 0x3e8   :  { %v4923_v42 = vpop.f32.mrf.mxu1 }
 0x3e9   :  { %v2664_v52 = vadd.f32 %v2663_v2, %v8106_v4  ;;  %v2525_v36 = vadd.f32 %v4922_v20, %v8066_v28 }
 0x3ea   :  { %v4924_v27 = vpop.f32.mrf.mxu1 }
 0x3eb   :  { %v8110_v9 = vadd.f32 %v5058_v48, %v2525_v36  ;;  %v4925_v54 = vadd.f32 %v4924_v27, %v4923_v42 }
 0x3ec   :  { %v4926_v25 = vpop.f32.mrf.mxu1 }
 0x3ed   :  { %v2665_v14 = vadd.f32 %v2664_v52, %v8110_v9  ;;  %v2530_v29 = vadd.f32 %v4925_v54, %v8068_v19 }
 0x3ee   :  { %v4927_v44 = vpop.f32.mrf.mxu1 }
 0x3ef   :  { %v8114_v5 = vadd.f32 %v2626_v24, %v2530_v29  ;;  %v4928_v8 = vadd.f32 %v4927_v44, %v4926_v25  ;;  %v5303_v44 = vld [vmem:[%s8917_s7 + $0x70] ss:$8 sps:$4 sm:$0xff]  }
 0x3f0   :  { %v4929_v32 = vpop.f32.mrf.mxu1 }
 0x3f1   :  { %v2666_v55 = vadd.f32 %v2665_v14, %v8114_v5  ;;  %v2533_v28 = vadd.f32 %v4928_v8, %v8070_v43 }
 0x3f2   :  { %v4930_v18 = vpop.f32.mrf.mxu1 }
 0x3f3   :  { %v8118_v15 = vadd.f32 %v2629_v47, %v2533_v28  ;;  %v4931_v23 = vadd.f32 %v4930_v18, %v4929_v32  ;;  %v5311_v32 = vld [vmem:[%s8917_s7 + $0x64] ss:$8 sps:$4 sm:$0xff]   ;;  %v5317_v28 = vld [vmem:[%s8917_s7 + $0x54] ss:$8 sps:$4 sm:$0xff]  }
 0x3f4   :  { %v4932_v13 = vpop.f32.mrf.mxu1 }
 0x3f5   :  { %v2667_v3 = vadd.f32 %v2666_v55, %v8118_v15  ;;  %v2538_v19 = vadd.f32 %v4931_v23, %v8072_v41 }
 0x3f6   :  { %v4933_v33 = vpop.f32.mrf.mxu1 }
 0x3f7   :  { %v8122_v34 = vadd.f32 %v5061_v22, %v2538_v19  ;;  %v4934_v12 = vadd.f32 %v4933_v33, %v4932_v13 }
 0x3f8   :  { %v4935_v49 = vpop.f32.mrf.mxu1 }
 0x3f9   :  { %v2668_v30 = vadd.f32 %v2667_v3, %v8122_v34  ;;  %v2541_v43 = vadd.f32 %v4934_v12, %v8074_v35 }
 0x3fa   :  { %v4936_v16 = vpop.f32.mrf.mxu1 }
 0x3fb   :  { %v2638_v53 = vadd.f32 %v5062_v40, %v2541_v43  ;;  %v4937_v6 = vadd.f32 %v4936_v16, %v4935_v49  ;;  %v5321_v49 = vld [vmem:[%s8917_s7 + $0x40] ss:$8 sps:$4 sm:$0xff]   ;;  %v5327_v16 = vld [vmem:[%s8917_s7 + $0x30] ss:$8 sps:$4 sm:$0xff]  }
 0x3fc   :  { %v4938_v41 = vpop.f32.mrf.mxu1 }
 0x3fd   :  { %v2669_v48 = vadd.f32 %v2668_v30, %v2638_v53  ;;  %v2546_v59 = vadd.f32 %v4937_v6, %v8076_v10  ;;  %v5329_v30 = vld [vmem:[%s8917_s7 + $0x34] ss:$8 sps:$4 sm:$0xff]  }
 0x3fe   :  { %v4939_v62 = vpop.f32.mrf.mxu1 }
 0x3ff   :  { %v2643_v31 = vadd.f32 %v2642_v39, %v2546_v59  ;;  %v4940_v35 = vadd.f32 %v4939_v62, %v4938_v41  ;;  %v5335_v41 = vld [vmem:[%s8917_s7 + $0x24] ss:$8 sps:$4 sm:$0xff]  }
 0x400   :  { %v4941_v58 = vpop.f32.mrf.mxu1 }
 0x401   :  { %v2670_v21 = vadd.f32 %v2669_v48, %v2643_v31  ;;  %v2549_v7 = vadd.f32 %v4940_v35, %v8078_v51  ;;  %v5341_v35 = vld [vmem:[%s8917_s7 + $0x14] ss:$8 sps:$4 sm:$0xff]  }
 0x402   :  { %v4942_v37 = vpop.f32.mrf.mxu1 }
 0x403   :  { %v2646_v2 = vadd.f32 %v2645_v17, %v2549_v7  ;;  %v4943_v38 = vadd.f32 %v4942_v37, %v4941_v58  ;;  %v5339_v7 = vld [vmem:[%s8917_s7 + $0x10] ss:$8 sps:$4 sm:$0xff]   ;;  %v5347_v17 = vld [vmem:[%s8917_s7 + $0x4] ss:$8 sps:$4 sm:$0xff]  }
 0x404   :  { %v4944_v22 = vpop.f32.mrf.mxu1 }
 0x405   :  { %v2671_v45 = vadd.f32 %v2670_v21, %v2646_v2  ;;  %v2554_v20 = vadd.f32 %v4943_v38, %v8080_v26  ;;  %v5305_v26 = vld [vmem:[%s8917_s7 + $0x74] ss:$8 sps:$4 sm:$0xff]  }
 0x406   :  { %v4945_v10 = vpop.f32.mrf.mxu1  ;;  %4022 = vmatprep.subr.bf16.mxu1 %v5305_v26 }
 0x407   :  { %v2651_v42 = vadd.f32 %v5065_v60, %v2554_v20  ;;  %v4946_v52 = vadd.f32 %v4945_v10, %v4944_v22  ;;  %4023 = vmatpush1.bf16.msra.mxu1 %v5303_v44  ;;  %v5353_v20 = vld [vmem:[%s8917_s7 + $0xf4] ss:$8 sps:$4 sm:$0xff]  }
 0x408   :  { %4024 = vmatprep.subr.bf16.mxu1 %v5311_v32 }
 0x409   :  { %v2672_v36 = vadd.f32 %v2671_v45, %v2651_v42  ;;  %v2557_v24 = vadd.f32 %v4946_v52, %v8082_v11  ;;  %v5309_v11 = vld [vmem:[%s8917_s7 + $0x60] ss:$8 sps:$4 sm:$0xff]  }
 0x40a   :  { %v5345_v45 = vld [vmem:[%s8917_s7] ss:$8 sps:$4 sm:$0xff]  }
 0x40b   :  { %v2654_v27 = vadd.f32 %v5066_v46, %v2557_v24  ;;  %4025 = vmatpush1.bf16.msra.mxu1 %v5309_v11  ;;  %v5333_v46 = vld [vmem:[%s8917_s7 + $0x20] ss:$8 sps:$4 sm:$0xff]   ;;  %v5351_v24 = vld [vmem:[%s8917_s7 + $0xf0] ss:$8 sps:$4 sm:$0xff]  }
 0x40c   :  { %4026 = vmatprep.subr.bf16.mxu1 %v5317_v28 }
 0x40d   :  { %v2673_v54 = vadd.f32 %v2672_v36, %v2654_v27 }
 0x40f   :  { %v2674_v25 = vrot.slane %v2673_v54, 4 }
 0x411   :  { %v2675_v14 = vadd.f32 %v2674_v25, %v2673_v54 }
 0x413   :  { %v2676_v29 = vrot.slane %v2675_v14, 2 }
 0x415   :  { %v2677_v51 = vadd.f32 %v2676_v29, %v2675_v14  ;;  %v5357_v14 = vld [vmem:[%s8917_s7 + $0xe0] ss:$8 sps:$4 sm:$0xff]  }
 0x417   :  { %v2678_v40 = vrot.slane %v2677_v51, 1 }
 0x419   :  { %v2679_v8 = vadd.f32 %v2678_v40, %v2677_v51  ;;  %v5365_v40 = vld [vmem:[%s8917_s7 + $0xd4] ss:$8 sps:$4 sm:$0xff]  }
 0x41b   :  { %v2681_v55 = vmul.f32 0.0078125, %v2679_v8  ;;  %v5363_v8 = vld [vmem:[%s8917_s7 + $0xd0] ss:$8 sps:$4 sm:$0xff]  }
 0x41d   :  { %v8153_v47 = vsub.f32 %v8084_v0, %v2681_v55  ;;  %v8156_v18 = vsub.f32 %v8086_v57, %v2681_v55  ;;  %v8159_v23 = vsub.f32 %v8090_v1, %v2681_v55  ;;  %v8162_v13 = vsub.f32 %v8094_v61, %v2681_v55  ;;  %v5315_v57 = vld [vmem:[%s8917_s7 + $0x50] ss:$8 sps:$4 sm:$0xff]  }
 0x41e   :  { %v8165_v3 = vsub.f32 %v8098_v50, %v2681_v55  ;;  %v8168_v19 = vsub.f32 %v8102_v63, %v2681_v55  ;;  %v8171_v60 = vsub.f32 %v8106_v4, %v2681_v55  ;;  %v8174_v0 = vsub.f32 %v8110_v9, %v2681_v55  ;;  %v5323_v4 = vld [vmem:[%s8917_s7 + $0x44] ss:$8 sps:$4 sm:$0xff]   ;;  %4027 = vmatpush1.bf16.msra.mxu1 %v5315_v57 }
 0x41f   :  { %v8180_v1 = vsub.f32 %v8114_v5, %v2681_v55  ;;  %v8183_v61 = vsub.f32 %v8118_v15, %v2681_v55  ;;  %v8186_v50 = vsub.f32 %v8122_v34, %v2681_v55  ;;  %v8188_v63 = vsub.f32 %v2638_v53, %v2681_v55  ;;  %4028 = vmatprep.subr.bf16.mxu1 %v5323_v4 }
 0x420   :  { %v8193_v9 = vsub.f32 %v2643_v31, %v2681_v55  ;;  %v8195_v33 = vsub.f32 %v2646_v2, %v2681_v55  ;;  %v8197_v12 = vsub.f32 %v2651_v42, %v2681_v55  ;;  %v8199_v5 = vsub.f32 %v2654_v27, %v2681_v55  ;;  %v5359_v27 = vld [vmem:[%s8917_s7 + $0xe4] ss:$8 sps:$4 sm:$0xff]  }
 0x421   :  { %v2698_v15 = vmul.f32 %v8153_v47, %v8153_v47  ;;  %v2699_v34 = vmul.f32 %v8156_v18, %v8156_v18  ;;  %v2700_v43 = vmul.f32 %v8159_v23, %v8159_v23  ;;  %v2701_v53 = vmul.f32 %v8162_v13, %v8162_v13 }
 0x422   :  { %4029 = vmatpush1.bf16.msra.mxu1 %v5321_v49  ;;  %v2702_v48 = vmul.f32 %v8165_v3, %v8165_v3  ;;  %v2703_v62 = vmul.f32 %v8168_v19, %v8168_v19  ;;  %v2704_v58 = vmul.f32 %v8171_v60, %v8171_v60  ;;  %v2705_v37 = vmul.f32 %v8174_v0, %v8174_v0 }
 0x423   :  { %v2714_v39 = vadd.f32 %v2699_v34, %v2698_v15  ;;  %4030 = vmatprep.subr.bf16.mxu1 %v5329_v30  ;;  %v2706_v38 = vmul.f32 %v8180_v1, %v8180_v1  ;;  %v2707_v10 = vmul.f32 %v8183_v61, %v8183_v61  ;;  %v2708_v52 = vmul.f32 %v8186_v50, %v8186_v50 }
 0x424   :  { %v2709_v54 = vmul.f32 %v8188_v63, %v8188_v63  ;;  %v2710_v29 = vmul.f32 %v8193_v9, %v8193_v9  ;;  %v2711_v44 = vmul.f32 %v8195_v33, %v8195_v33  ;;  %v2712_v11 = vmul.f32 %v8197_v12, %v8197_v12 }
 0x425   :  { %v2715_v6 = vadd.f32 %v2714_v39, %v2700_v43  ;;  %v2713_v55 = vmul.f32 %v8199_v5, %v8199_v5 }
 0x426   :  { %4031 = vmatpush1.bf16.msra.mxu1 %v5327_v16 }
 0x427   :  { %v2716_v59 = vadd.f32 %v2715_v6, %v2701_v53  ;;  %4032 = vmatprep.subr.bf16.mxu1 %v5335_v41  ;;  %v8283_v6 = vld [vmem:[%s8918_s5] ss:$0 sm:$0xff] }
 0x429   :  { %v2717_v31 = vadd.f32 %v2716_v59, %v2702_v48 }
 0x42a   :  { %4033 = vmatpush1.bf16.msra.mxu1 %v5333_v46 }
 0x42b   :  { %v2718_v21 = vadd.f32 %v2717_v31, %v2703_v62  ;;  %4034 = vmatprep.subr.bf16.mxu1 %v5341_v35  ;;  %v8296_v62 = vld [vmem:[%s8919_s6] ss:$0 sm:$0xff] }
 0x42d   :  { %v2719_v2 = vadd.f32 %v2718_v21, %v2704_v58 }
 0x42e   :  { %4035 = vmatpush1.bf16.msra.mxu1 %v5339_v7 }
 0x42f   :  { %v2720_v22 = vadd.f32 %v2719_v2, %v2705_v37  ;;  %4036 = vmatprep.subr.bf16.mxu1 %v5347_v17 }
 0x431   :  { %v2721_v42 = vadd.f32 %v2720_v22, %v2706_v38 }
 0x432   :  { %4037 = vmatpush1.bf16.msra.mxu1 %v5345_v45 }
 0x433   :  { %v2722_v36 = vadd.f32 %v2721_v42, %v2707_v10  ;;  %4038 = vmatprep.subr.bf16.mxu1 %v5353_v20 }
 0x435   :  { %v2723_v25 = vadd.f32 %v2722_v36, %v2708_v52 }
 0x436   :  { %4039 = vmatpush2.bf16.msra.mxu1 %v5351_v24 }
 0x437   :  { %v2724_v51 = vadd.f32 %v2723_v25, %v2709_v54  ;;  %4040 = vmatprep.subr.bf16.mxu1 %v5359_v27 }
 0x439   :  { %v2725_v26 = vadd.f32 %v2724_v51, %v2710_v29 }
 0x43a   :  { %4041 = vmatpush2.bf16.msra.mxu1 %v5357_v14 }
 0x43b   :  { %v2726_v32 = vadd.f32 %v2725_v26, %v2711_v44  ;;  %4042 = vmatprep.subr.bf16.mxu1 %v5365_v40 }
 0x43d   :  { %v2727_v28 = vadd.f32 %v2726_v32, %v2712_v11 }
 0x43e   :  { %4043 = vmatpush2.bf16.msra.mxu1 %v5363_v8 }
 0x43f   :  { %v2728_v57 = vadd.f32 %v2727_v28, %v2713_v55 }
 0x441   :  { %v2729_v4 = vrot.slane %v2728_v57, 4 }
 0x443   :  { %v2730_v15 = vadd.f32 %v2729_v4, %v2728_v57 }
 0x445   :  { %v2731_v34 = vrot.slane %v2730_v15, 2 }
 0x447   :  { %v2732_v49 = vadd.f32 %v2731_v34, %v2730_v15 }
 0x449   :  { %v2733_v30 = vrot.slane %v2732_v49, 1 }
 0x44b   :  { %v2734_v43 = vadd.f32 %v2733_v30, %v2732_v49 }
 0x44d   :  { %v2735_v39 = vmul.f32 0.0078125, %v2734_v43 }
 0x44f   :  { %v2736_v16 = vadd.f32 1e-05, %v2735_v39 }
 0x451   :  { %5518 = vrsqrt.f32 %v2736_v16 }
 0x45e   :  { %v8278_v53 = vpop.eup %5518 }
 0x45f   :  { %v2753_v41 = vmul.f32 %v8278_v53, %v8199_v5  ;;  %v2744_v48 = vmul.f32 %v8278_v53, %v8171_v60  ;;  %v2745_v59 = vmul.f32 %v8278_v53, %v8174_v0  ;;  %v2742_v46 = vmul.f32 %v8278_v53, %v8165_v3 }
 0x460   :  { %v2743_v31 = vmul.f32 %v8278_v53, %v8168_v19  ;;  %v2740_v5 = vmul.f32 %v8278_v53, %v8159_v23  ;;  %v2741_v60 = vmul.f32 %v8278_v53, %v8162_v13  ;;  %v2738_v0 = vmul.f32 %v8278_v53, %v8153_v47 }
 0x461   :  { %v2775_v35 = vmul.f32 %v8283_v6, %v2753_v41  ;;  %v2766_v3 = vmul.f32 %v8283_v6, %v2744_v48  ;;  %v2767_v58 = vmul.f32 %v8283_v6, %v2745_v59  ;;  %v2764_v21 = vmul.f32 %v8283_v6, %v2742_v46 }
 0x462   :  { %v2765_v7 = vmul.f32 %v8283_v6, %v2743_v31  ;;  %v2762_v19 = vmul.f32 %v8283_v6, %v2740_v5  ;;  %v2763_v23 = vmul.f32 %v8283_v6, %v2741_v60  ;;  %v2739_v13 = vmul.f32 %v8278_v53, %v8156_v18 }
 0x463   :  { %v2788_v17 = vadd.f32 %v8296_v62, %v2766_v3  ;;  %v2789_v47 = vadd.f32 %v8296_v62, %v2767_v58  ;;  %v2786_v37 = vadd.f32 %v8296_v62, %v2764_v21  ;;  %v2760_v2 = vmul.f32 %v8283_v6, %v2738_v0 }
 0x464   :  { %v2787_v38 = vadd.f32 %v8296_v62, %v2765_v7  ;;  %v2784_v22 = vadd.f32 %v8296_v62, %v2762_v19  ;;  %v2785_v45 = vadd.f32 %v8296_v62, %v2763_v23  ;;  %v2761_v20 = vmul.f32 %v8283_v6, %v2739_v13 }
 0x465   :  { %vm2804_vm8 = vcmp.ge.f32.partialorder %v2788_v17, 0.0  ;;  %vm2805_vm9 = vcmp.ge.f32.partialorder %v2789_v47, 0.0  ;;  %v2820_v10 = vmul.f32 0.2, %v2788_v17  ;;  %v2821_v18 = vmul.f32 0.2, %v2789_v47 }
 0x466   :  { %vm2802_vm10 = vcmp.ge.f32.partialorder %v2786_v37, 0.0  ;;  %vm2803_vm11 = vcmp.ge.f32.partialorder %v2787_v38, 0.0  ;;  %v2818_v42 = vmul.f32 0.2, %v2786_v37  ;;  %v2819_v52 = vmul.f32 0.2, %v2787_v38 }
 0x467   :  { %v2836_v36 = vsel %vm2804_vm8, %v2788_v17, %v2820_v10  ;;  %v2837_v24 = vsel %vm2805_vm9, %v2789_v47, %v2821_v18  ;;  %vm2800_vm12 = vcmp.ge.f32.partialorder %v2784_v22, 0.0  ;;  %vm2801_vm14 = vcmp.ge.f32.partialorder %v2785_v45, 0.0  ;;  %v5299_v18 = vld [vmem:[%s8916_s10 + $0x18] sm:$0xff]  }
 0x468   :  { %v2849_v27 = vpack.c.bf16 %v2837_v24, %v2836_v36  ;;  %v2834_v54 = vsel %vm2802_vm10, %v2786_v37, %v2818_v42  ;;  %v2835_v25 = vsel %vm2803_vm11, %v2787_v38, %v2819_v52  ;;  %v2816_v14 = vmul.f32 0.2, %v2784_v22  ;;  %v5297_v37 = vld [vmem:[%s8916_s10 + $0x8] sm:$0xff]   ;;  %v5302_v36 = vld [vmem:[%s8917_s7 + $0x174] ss:$8 sps:$4 sm:$0xff]  }
 0x469   :  { %v2848_v29 = vpack.c.bf16 %v2835_v25, %v2834_v54  ;;  %v2817_v51 = vmul.f32 0.2, %v2785_v45  ;;  %v2782_v40 = vadd.f32 %v8296_v62, %v2760_v2  ;;  %v2783_v44 = vadd.f32 %v8296_v62, %v2761_v20  ;;  %v5300_v24 = vld [vmem:[%s8917_s7 + $0x170] ss:$8 sps:$4 sm:$0xff]   ;;  %v5314_v54 = vld [vmem:[%s8917_s7 + $0x154] ss:$8 sps:$4 sm:$0xff]  }
 0x46a   :  { %5067 = vmatprep.subr.bf16.mxu0 %v2849_v27  ;;  %v2832_v26 = vsel %vm2800_vm12, %v2784_v22, %v2816_v14  ;;  %v2752_v8 = vmul.f32 %v8278_v53, %v8197_v12  ;;  %v2797_v11 = vadd.f32 %v8296_v62, %v2775_v35  ;;  %v2750_v32 = vmul.f32 %v8278_v53, %v8193_v9  ;;  %v5298_v22 = vld [vmem:[%s8916_s10 + $0x10] sm:$0xff]   ;;  %v5320_v14 = vld [vmem:[%s8917_s7 + $0x144] ss:$8 sps:$4 sm:$0xff]  }
 0x46b   :  { %5068 = vmatpush3.bf16.msra.mxu0 %v2849_v27  ;;  %v2833_v55 = vsel %vm2801_vm14, %v2785_v45, %v2817_v51  ;;  %vm2798_vm15 = vcmp.ge.f32.partialorder %v2782_v40, 0.0  ;;  %vm2799_vm13 = vcmp.ge.f32.partialorder %v2783_v44, 0.0  ;;  %v2814_v28 = vmul.f32 0.2, %v2782_v40  ;;  %v5308_v27 = vld [vmem:[%s8917_s7 + $0x164] ss:$8 sps:$4 sm:$0xff]  }
 0x46c   :  { %5069 = vmatprep.subr.bf16.mxu0 %v2848_v29  ;;  %v2847_v57 = vpack.c.bf16 %v2833_v55, %v2832_v26  ;;  %v2815_v4 = vmul.f32 0.2, %v2783_v44  ;;  %v2774_v15 = vmul.f32 %v8283_v6, %v2752_v8  ;;  %vm2813_vm2 = vcmp.ge.f32.partialorder %v2797_v11, 0.0  ;;  %v5312_v25 = vld [vmem:[%s8917_s7 + $0x150] ss:$8 sps:$4 sm:$0xff]  }
 0x46d   :  { %v2830_v34 = vsel %vm2798_vm15, %v2782_v40, %v2814_v28  ;;  %v2829_v49 = vmul.f32 0.2, %v2797_v11  ;;  %v2751_v12 = vmul.f32 %v8278_v53, %v8195_v33  ;;  %v2772_v30 = vmul.f32 %v8283_v6, %v2750_v32  ;;  %v5326_v51 = vld [vmem:[%s8917_s7 + $0x134] ss:$8 sps:$4 sm:$0xff]   ;;  %v5324_v40 = vld [vmem:[%s8917_s7 + $0x130] ss:$8 sps:$4 sm:$0xff]  }
 0x46e   :  { %v2831_v43 = vsel %vm2799_vm13, %v2783_v44, %v2815_v4  ;;  %v2796_v9 = vadd.f32 %v8296_v62, %v2774_v15  ;;  %v2748_v39 = vmul.f32 %v8278_v53, %v8186_v50  ;;  %v2749_v16 = vmul.f32 %v8278_v53, %v8188_v63  ;;  %v5332_v44 = vld [vmem:[%s8917_s7 + $0x124] ss:$8 sps:$4 sm:$0xff]   ;;  %v5330_v26 = vld [vmem:[%s8917_s7 + $0x120] ss:$8 sps:$4 sm:$0xff]   ;;  %v5338_v8 = vld [vmem:[%s8917_s7 + $0x114] ss:$8 sps:$4 sm:$0xff]  }
 0x46f   :  { %5070 = vmatpush3.bf16.msra.mxu0 %v2848_v29  ;;  %v2846_v41 = vpack.c.bf16 %v2831_v43, %v2830_v34  ;;  %v2845_v48 = vsel %vm2813_vm2, %v2797_v11, %v2829_v49  ;;  %v2773_v59 = vmul.f32 %v8283_v6, %v2751_v12  ;;  %v2794_v46 = vadd.f32 %v8296_v62, %v2772_v30  ;;  %v5318_v29 = vld [vmem:[%s8917_s7 + $0x140] ss:$8 sps:$4 sm:$0xff]   ;;  %v5336_v11 = vld [vmem:[%s8917_s7 + $0x110] ss:$8 sps:$4 sm:$0xff]   ;;  %v5344_v32 = vld [vmem:[%s8917_s7 + $0x104] ss:$8 sps:$4 sm:$0xff]  }
 0x470   :  { %5071 = vmatprep.subr.bf16.mxu0 %v2847_v57  ;;  %vm2812_vm4 = vcmp.ge.f32.partialorder %v2796_v9, 0.0  ;;  %v2828_v33 = vmul.f32 0.2, %v2796_v9  ;;  %v2770_v31 = vmul.f32 %v8283_v6, %v2748_v39  ;;  %v2771_v5 = vmul.f32 %v8283_v6, %v2749_v16  ;;  %v5342_v55 = vld [vmem:[%s8917_s7 + $0x100] ss:$8 sps:$4 sm:$0xff]  }
 0x471   :  { %v2795_v60 = vadd.f32 %v8296_v62, %v2773_v59  ;;  %vm2810_vm6 = vcmp.ge.f32.partialorder %v2794_v46, 0.0  ;;  %v2826_v50 = vmul.f32 0.2, %v2794_v46  ;;  %v2746_v63 = vmul.f32 %v8278_v53, %v8180_v1  ;;  %v5350_v28 = vld [vmem:[%s8917_s7 + $0x1f4] ss:$8 sps:$4 sm:$0xff]  }
 0x472   :  { %v2844_v0 = vsel %vm2812_vm4, %v2796_v9, %v2828_v33  ;;  %v2792_v35 = vadd.f32 %v8296_v62, %v2770_v31  ;;  %v2793_v3 = vadd.f32 %v8296_v62, %v2771_v5  ;;  %v2747_v58 = vmul.f32 %v8278_v53, %v8183_v61  ;;  %v5356_v4 = vld [vmem:[%s8917_s7 + $0x1e4] ss:$8 sps:$4 sm:$0xff]   ;;  %v5354_v15 = vld [vmem:[%s8917_s7 + $0x1e0] ss:$8 sps:$4 sm:$0xff]   ;;  %v5362_v34 = vld [vmem:[%s8917_s7 + $0x1d4] ss:$8 sps:$4 sm:$0xff]  }
 0x473   :  { %5072 = vmatpush3.bf16.msra.mxu0 %v2847_v57  ;;  %v2853_v21 = vpack.c.bf16 %v2845_v48, %v2844_v0  ;;  %vm2811_vm5 = vcmp.ge.f32.partialorder %v2795_v60, 0.0  ;;  %v2827_v7 = vmul.f32 0.2, %v2795_v60  ;;  %v2842_v19 = vsel %vm2810_vm6, %v2794_v46, %v2826_v50  ;;  %v5348_v57 = vld [vmem:[%s8917_s7 + $0x1f0] ss:$8 sps:$4 sm:$0xff]  }
 0x474   :  { %5073 = vmatprep.subr.bf16.mxu0 %v2846_v41  ;;  %vm2808_vm7 = vcmp.ge.f32.partialorder %v2792_v35, 0.0  ;;  %vm2809_vm8 = vcmp.ge.f32.partialorder %v2793_v3, 0.0  ;;  %v2824_v23 = vmul.f32 0.2, %v2792_v35  ;;  %v2825_v13 = vmul.f32 0.2, %v2793_v3 }
 0x475   :  { %v2843_v17 = vsel %vm2811_vm5, %v2795_v60, %v2827_v7  ;;  %v2768_v1 = vmul.f32 %v8283_v6, %v2746_v63  ;;  %v2769_v47 = vmul.f32 %v8283_v6, %v2747_v58  ;;  %v5360_v49 = vld [vmem:[%s8917_s7 + $0x1d0] ss:$8 sps:$4 sm:$0xff]   ;;  %v5368_v12 = vld [vmem:[%s8917_s7 + $0x1c4] ss:$8 sps:$4 sm:$0xff]   ;;  %v5366_v30 = vld [vmem:[%s8917_s7 + $0x1c0] ss:$8 sps:$4 sm:$0xff]  }
 0x476   :  { %v2852_v61 = vpack.c.bf16 %v2843_v17, %v2842_v19  ;;  %v2840_v53 = vsel %vm2808_vm7, %v2792_v35, %v2824_v23  ;;  %v2841_v2 = vsel %vm2809_vm8, %v2793_v3, %v2825_v13  ;;  %v5369_v43 = vld [vmem:[%s8917_s7 + $0xc0] ss:$8 sps:$4 sm:$0xff]   ;;  %v5371_v9 = vld [vmem:[%s8917_s7 + $0xc4] ss:$8 sps:$4 sm:$0xff]   ;;  %v5372_v39 = vld [vmem:[%s8917_s7 + $0x1b0] ss:$8 sps:$4 sm:$0xff]  }
 0x477   :  { %5074 = vmatpush3.bf16.msra.mxu0 %v2846_v41  ;;  %v2851_v38 = vpack.c.bf16 %v2841_v2, %v2840_v53  ;;  %v2790_v45 = vadd.f32 %v8296_v62, %v2768_v1  ;;  %v2791_v20 = vadd.f32 %v8296_v62, %v2769_v47  ;;  %v5374_v16 = vld [vmem:[%s8917_s7 + $0x1b4] ss:$8 sps:$4 sm:$0xff]   ;;  %4044 = vmatprep.subr.bf16.mxu1 %v5371_v9  ;;  %v5375_v41 = vld [vmem:[%s8917_s7 + $0xb0] ss:$8 sps:$4 sm:$0xff]   ;;  %v5378_v59 = vld [vmem:[%s8917_s7 + $0x1a0] ss:$8 sps:$4 sm:$0xff]  }
 0x478   :  { %5083 = vmatprep.subr.bf16.mxu0 %v2853_v21  ;;  %4045 = vmatpush2.bf16.msra.mxu1 %v5369_v43  ;;  %v5377_v48 = vld [vmem:[%s8917_s7 + $0xb4] ss:$8 sps:$4 sm:$0xff]   ;;  %v5380_v46 = vld [vmem:[%s8917_s7 + $0x1a4] ss:$8 sps:$4 sm:$0xff]   ;;  %v5381_v33 = vld [vmem:[%s8917_s7 + $0xa0] ss:$8 sps:$4 sm:$0xff]  }
 0x479   :  { %v2822_v6 = vmul.f32 0.2, %v2790_v45  ;;  %v2823_v10 = vmul.f32 0.2, %v2791_v20  ;;  %vm2806_vm9 = vcmp.ge.f32.partialorder %v2790_v45, 0.0  ;;  %vm2807_vm10 = vcmp.ge.f32.partialorder %v2791_v20, 0.0  ;;  %4046 = vmatprep.subr.bf16.mxu1 %v5377_v48 }
 0x47a   :  { %5076 = vmatmul.mubr.msk.bf16.vlgmr.msra.gmra.mxu0 %vm670_vm1, %v5297_v37  ;;  %v5383_v31 = vld [vmem:[%s8917_s7 + $0xa4] ss:$8 sps:$4 sm:$0xff]   ;;  %v5384_v5 = vld [vmem:[%s8917_s7 + $0x190] ss:$8 sps:$4 sm:$0xff]   ;;  %v5386_v60 = vld [vmem:[%s8917_s7 + $0x194] ss:$8 sps:$4 sm:$0xff]  }
 0x47b   :  { %5084 = vmatpush3.bf16.msra.mxu0 %v2853_v21  ;;  %5079 = vmatprep.mubr.msk.bf16.mxu0 %vm670_vm1, %v5298_v22  ;;  %v2838_v42 = vsel %vm2806_vm9, %v2790_v45, %v2822_v6  ;;  %v2839_v52 = vsel %vm2807_vm10, %v2791_v20, %v2823_v10  ;;  %v5387_v50 = vld [vmem:[%s8917_s7 + $0x90] ss:$8 sps:$4 sm:$0xff]   ;;  %v5389_v63 = vld [vmem:[%s8917_s7 + $0x94] ss:$8 sps:$4 sm:$0xff]   ;;  %v5390_v0 = vld [vmem:[%s8917_s7 + $0x180] ss:$8 sps:$4 sm:$0xff]  }
 0x47c   :  { %5085 = vmatprep.subr.bf16.mxu0 %v2852_v61  ;;  %v2850_v62 = vpack.c.bf16 %v2839_v52, %v2838_v42  ;;  %4047 = vmatpush2.bf16.msra.mxu1 %v5375_v41  ;;  %v5392_v35 = vld [vmem:[%s8917_s7 + $0x184] ss:$8 sps:$4 sm:$0xff]   ;;  %v5393_v3 = vld [vmem:[%s8917_s7 + $0x80] ss:$8 sps:$4 sm:$0xff]   ;;  %v5398_v21 = vld [vmem:[%s8917_s7 + $0x374] ss:$8 sps:$4 sm:$0xff]  }
 0x47d   :  { %4048 = vmatprep.subr.bf16.mxu1 %v5383_v31  ;;  %v5395_v58 = vld [vmem:[%s8917_s7 + $0x84] ss:$8 sps:$4 sm:$0xff]   ;;  %v5401_v7 = vld [vmem:[%s8917_s7 + $0x274] ss:$8 sps:$4 sm:$0xff]   ;;  %v9225_v53 = vmov 0.0   ;;  %vm3067_vm12 = vcmask 1043456  }
 0x47e   :  { %v9223_v19 = vld [vmem:[#allocation10_spill] sm:$0xff]  ;;  %v9224_v13 = vld [vmem:[#allocation7_spill] sm:$0xff]  ;;  %vm3056_vm14 = vcmask 1044480   ;;  %vm4769_vm15 = vmneg %vm3067_vm12  ;;  %vm4447_vm9 = vcmask 0  }
 0x47f   :  { %5086 = vmatpush3.bf16.msra.mxu0 %v2852_v61  ;;  %v3035_v23 = vand.u32 3, %v9223_v19  ;;  %v3028_v17 = vand.u32 3, %v9224_v13  ;;  %vm8551_vm13 = vmpackc.low %vm5534_vm3, %vm4769_vm15  ;;  %v5404_v9 = vld [vmem:[%s8917_s7 + $0x364] ss:$8 sps:$4 sm:$0xff]   ;;  %v5408_v19 = vld [vmem:[%s8917_s7 + $0x350] ss:$8 sps:$4 sm:$0xff]  }
 0x480   :  { %5087 = vmatprep.subr.bf16.mxu0 %v2851_v38  ;;  %4049 = vmatpush2.bf16.msra.mxu1 %v5381_v33 }
 0x481   :  { %4050 = vmatprep.subr.bf16.mxu1 %v5389_v63  ;;  %vm3049_vm11 = vcmp.ne.s32.totalorder %v3035_v23, 0  ;;  %v5410_v63 = vld [vmem:[%s8917_s7 + $0x354] ss:$8 sps:$4 sm:$0xff]  }
 0x482   :  { %5080 = vmatmul.mubr.msk.bf16.gmra.mxu0 %vm670_vm1, %v5299_v18  ;;  %v8518_v45 = vsel %vm3049_vm11, 1.0, %v9225_v53  ;;  %v5413_v23 = vld [vmem:[%s8917_s7 + $0x254] ss:$8 sps:$4 sm:$0xff]  }
 0x483   :  { %5088 = vmatpush3.bf16.msra.mxu0 %v2851_v38  ;;  %5091 = vmatprep.mubr.msk.bf16.mxu0 %vm670_vm1, %v8129_v56  ;;  %v5306_v56 = vld [vmem:[%s8917_s7 + $0x160] ss:$8 sps:$4 sm:$0xff]  }
 0x484   :  { %5089 = vmatprep.subr.bf16.mxu0 %v2850_v62  ;;  %4051 = vmatpush2.bf16.msra.mxu1 %v5387_v50 }
 0x485   :  { %4052 = vmatprep.subr.bf16.mxu1 %v5395_v58  ;;  %v5405_v58 = vld [vmem:[%s8917_s7 + $0x260] ss:$8 sps:$4 sm:$0xff]  }
 0x487   :  { %5090 = vmatpush3.bf16.msra.mxu0 %v2850_v62 }
 0x488   :  { %4075 = vmatprep.subr.bf16.mxu0 %v5302_v36  ;;  %4053 = vmatpush2.bf16.msra.mxu1 %v5393_v3 }
 0x489   :  { %4128 = vmatprep.subr.bf16.mxu1 %v5401_v7 }
 0x48a   :  { %5092 = vmatmul.mubr.msk.bf16.vlgmr.msra.gmra.mxu0 %vm670_vm1, %v5297_v37 }
 0x48b   :  { %5095 = vmatprep.mubr.msk.bf16.mxu0 %vm670_vm1, %v5298_v22  ;;  %4076 = vmatpush1.bf16.msra.mxu0 %v5300_v24 }
 0x48c   :  { %4077 = vmatprep.subr.bf16.mxu0 %v5308_v27 }
 0x48f   :  { %4078 = vmatpush1.bf16.msra.mxu0 %v5306_v56 }
 0x490   :  { %4079 = vmatprep.subr.bf16.mxu0 %v5314_v54 }
 0x492   :  { %5096 = vmatmul.mubr.msk.bf16.gmra.mxu0 %vm670_vm1, %v5299_v18  ;;  %vm3048_vm1 = vcmp.ne.s32.totalorder %v3028_v17, 0 }
 0x493   :  { %4080 = vmatpush1.bf16.msra.mxu0 %v5312_v25  ;;  %v8513_v2 = vsel %vm3048_vm1, 1.0, %v9225_v53 }
 0x494   :  { %4081 = vmatprep.subr.bf16.mxu0 %v5320_v14 }
 0x497   :  { %4082 = vmatpush1.bf16.msra.mxu0 %v5318_v29 }
 0x498   :  { %4083 = vmatprep.subr.bf16.mxu0 %v5326_v51 }
 0x49b   :  { %4084 = vmatpush1.bf16.msra.mxu0 %v5324_v40 }
 0x49c   :  { %4085 = vmatprep.subr.bf16.mxu0 %v5332_v44 }
 0x49f   :  { %4086 = vmatpush1.bf16.msra.mxu0 %v5330_v26 }
 0x4a0   :  { %4087 = vmatprep.subr.bf16.mxu0 %v5338_v8 }
 0x4a3   :  { %4088 = vmatpush1.bf16.msra.mxu0 %v5336_v11 }
 0x4a4   :  { %4089 = vmatprep.subr.bf16.mxu0 %v5344_v32  ;;  %v5440_v32 = vld [vmem:[%s8917_s7 + $0x304] ss:$8 sps:$4 sm:$0xff]  }
 0x4a7   :  { %4090 = vmatpush1.bf16.msra.mxu0 %v5342_v55 }
 0x4a8   :  { %4091 = vmatprep.subr.bf16.mxu0 %v5350_v28 }
 0x4ab   :  { %4092 = vmatpush2.bf16.msra.mxu0 %v5348_v57 }
 0x4ac   :  { %4093 = vmatprep.subr.bf16.mxu0 %v5356_v4 }
 0x4af   :  { %4094 = vmatpush2.bf16.msra.mxu0 %v5354_v15  ;;  %v5396_v15 = vld [vmem:[%s8917_s7 + $0x370] ss:$8 sps:$4 sm:$0xff]  }
 0x4b0   :  { %4095 = vmatprep.subr.bf16.mxu0 %v5362_v34 }
 0x4b3   :  { %4096 = vmatpush2.bf16.msra.mxu0 %v5360_v49 }
 0x4b4   :  { %4097 = vmatprep.subr.bf16.mxu0 %v5368_v12 }
 0x4b7   :  { %4098 = vmatpush2.bf16.msra.mxu0 %v5366_v30 }
 0x4b8   :  { %4099 = vmatprep.subr.bf16.mxu0 %v5374_v16 }
 0x4bb   :  { %4100 = vmatpush2.bf16.msra.mxu0 %v5372_v39 }
 0x4bc   :  { %4101 = vmatprep.subr.bf16.mxu0 %v5380_v46 }
 0x4bf   :  { %4102 = vmatpush2.bf16.msra.mxu0 %v5378_v59  ;;  %v5399_v59 = vld [vmem:[%s8917_s7 + $0x270] ss:$8 sps:$4 sm:$0xff]  }
 0x4c0   :  { %4103 = vmatprep.subr.bf16.mxu0 %v5386_v60  ;;  %v5407_v60 = vld [vmem:[%s8917_s7 + $0x264] ss:$8 sps:$4 sm:$0xff]  }
 0x4c3   :  { %4104 = vmatpush2.bf16.msra.mxu0 %v5384_v5  ;;  %v5402_v5 = vld [vmem:[%s8917_s7 + $0x360] ss:$8 sps:$4 sm:$0xff]  }
 0x4c4   :  { %4105 = vmatprep.subr.bf16.mxu0 %v5392_v35 }
 0x4c7   :  { %4106 = vmatpush2.bf16.msra.mxu0 %v5390_v0 }
 0x4c8   :  { %4181 = vmatprep.subr.bf16.mxu0 %v5398_v21 }
 0x53a   :  { %v8505_v1 = vpop.f32.mrf.mxu0 }
 0x53b   :  { %v3082_v47 = vrot.slane %v8505_v1, 7 }
 0x53c   :  { %v8508_v37 = vpop.f32.mrf.mxu0 }
 0x53d   :  { %v3087_v38 = vsel %vm1602_vm0, 0.0, %v3082_v47 }
 0x53e   :  { %v8510_v61 = vpop.f32.mrf.mxu0  ;;  %v3088_v18 = vmul.f32 %v8513_v2, %v3087_v38 }
 0x53f   :  { %v3083_v22 = vrot.slane %v8510_v61, 7 }
 0x540   :  { %v8520_v20 = vpop.f32.mrf.mxu0 }
 0x541   :  { %v3084_v6 = vsel %vm1602_vm0, %v3082_v47, %v3083_v22  ;;  %v3144_v10 = vpack.c.bf16 %v8520_v20, %v8508_v37  ;;  %v5416_v47 = vld [vmem:[%s8917_s7 + $0x344] ss:$8 sps:$4 sm:$0xff]   ;;  %v5498_v37 = vld [vmem:[%s8917_s7 + $0x450] ss:$8 sps:$4 sm:$0xff]  }
 0x542   :  { %v8526_v42 = vpop.f32.mrf.mxu0  ;;  %v3089_v52 = vmul.f32 %v8518_v45, %v3084_v6  ;;  %v5503_v20 = vld [vmem:[%s8917_s7 + $0x444] ss:$8 sps:$4 sm:$0xff]  }
 0x543   :  { %v3057_v62 = vrot.slane %v8526_v42, 3  ;;  %v3090_v36 = vrot.slane %v8526_v42, 7  ;;  %v3074_v25 = vrot.slane %v8526_v42, 4 }
 0x544   :  { %v8531_v24 = vpop.f32.mrf.mxu0  ;;  %v3143_v27 = vpack.c.bf16 %v3089_v52, %v3088_v18  ;;  %v5411_v18 = vld [vmem:[%s8917_s7 + $0x250] ss:$8 sps:$4 sm:$0xff]  }
 0x545   :  { %v3095_v56 = vsel %vm1602_vm0, 0.0, %v3090_v36  ;;  %v3062_v54 = vsel %vm3056_vm14, 0.0, %v3057_v62  ;;  %v3068_v8 = vrot.slane %v8531_v24, 4 }
 0x546   :  { %v8538_v14 = vmul.f32 %v8513_v2, %v3095_v56  ;;  %v8540_v29 = vpop.f32.mrf.mxu0  ;;  %4107 = vmatprep.mubr.bf16.mxu0 %v3143_v27  ;;  %v3063_v34 = vmul.f32 %v8513_v2, %v3062_v54  ;;  %v5419_v27 = vld [vmem:[%s8917_s7 + $0x244] ss:$8 sps:$4 sm:$0xff]  }
 0x547   :  { %v3058_v51 = vrot.slane %v8540_v29, 3  ;;  %v3075_v40 = vrot.slane %v8540_v29, 4  ;;  %v3091_v44 = vrot.slane %v8540_v29, 7  ;;  %v3148_v26 = vpack.c.bf16 %v8540_v29, %v8526_v42 }
 0x548   :  { %v8548_v11 = vpop.f32.mrf.mxu0 }
 0x549   :  { %v3059_v55 = vsel %vm3056_vm14, %v3057_v62, %v3058_v51  ;;  %v3076_v28 = vsel %vm3067_vm12, %v3074_v25, %v3075_v40  ;;  %v3092_v57 = vsel %vm1602_vm0, %v3090_v36, %v3091_v44  ;;  %v3069_v4 = vrot.slane %v8548_v11, 4  ;;  %v5414_v36 = vld [vmem:[%s8917_s7 + $0x340] ss:$8 sps:$4 sm:$0xff]   ;;  %v5422_v51 = vld [vmem:[%s8917_s7 + $0x334] ss:$8 sps:$4 sm:$0xff]  }
 0x54a   :  { %v3064_v49 = vmul.f32 %v8518_v45, %v3059_v55  ;;  %v8565_v12 = vmul.f32 %v8518_v45, %v3092_v57  ;;  %v4779_v30 = vpack.c.bf16 %v3076_v28, %v3074_v25  ;;  %v8567_v43 = vpop.f32.mrf.mxu0 }
 0x54b   :  { %v3070_v39 = vsel %vm3067_vm12, %v3068_v8, %v3069_v4  ;;  %v3124_v16 = vrot.slane %v8567_v43, 7  ;;  %v5417_v4 = vld [vmem:[%s8917_s7 + $0x240] ss:$8 sps:$4 sm:$0xff]  }
 0x54c   :  { %v4771_v41 = vpack.c.bf16 %v3070_v39, %v3068_v8  ;;  %v8574_v48 = vpop.f32.mrf.mxu0  ;;  %4780 = vmatmul.mubr.msk.bf16.vlgmr.msra.gmra.mxu0 %vm8551_vm13, %v4779_v30  ;;  %v3140_v46 = vpack.c.bf16 %v3064_v49, %v3063_v34  ;;  %v3146_v33 = vpack.c.bf16 %v8565_v12, %v8538_v14  ;;  %v5420_v49 = vld [vmem:[%s8917_s7 + $0x330] ss:$8 sps:$4 sm:$0xff]   ;;  %v5495_v14 = vld [vmem:[%s8917_s7 + $0x460] ss:$8 sps:$4 sm:$0xff]   ;;  %v5500_v12 = vld [vmem:[%s8917_s7 + $0x454] ss:$8 sps:$4 sm:$0xff]  }
 0x54d   :  { %v3129_v31 = vsel %vm1602_vm0, 0.0, %v3124_v16  ;;  %4182 = vmatpush1.bf16.msra.mxu0 %v5396_v15 }
 0x54e   :  { %v8590_v50 = vpop.f32.mrf.mxu0  ;;  %4772 = vmatprep.mubr.msk.bf16.mxu1 %vm8551_vm13, %v4771_v41  ;;  %4183 = vmatprep.subr.bf16.mxu0 %v5404_v9  ;;  %v3130_v35 = vmul.f32 %v8513_v2, %v3129_v31  ;;  %v5425_v41 = vld [vmem:[%s8917_s7 + $0x234] ss:$8 sps:$4 sm:$0xff]   ;;  %v3147_v31 = vpack.c.bf16 %v8548_v11, %v8531_v24  ;;  %v5426_v24 = vld [vmem:[%s8917_s7 + $0x320] ss:$8 sps:$4 sm:$0xff]  }
 0x54f   :  { %v3125_v0 = vrot.slane %v8590_v50, 7  ;;  %4055 = vmatmul.mubr.bf16.vlgmr.msra.gmra.mxu1 %v3140_v46 }
 0x550   :  { %4129 = vmatpush1.bf16.msra.mxu1 %v5399_v59  ;;  %v8599_v3 = vpop.f32.mrf.mxu0 }
 0x551   :  { %v3126_v21 = vsel %vm1602_vm0, %v3124_v16, %v3125_v0  ;;  %v3153_v7 = vpack.c.bf16 %v8599_v3, %v8574_v48  ;;  %4184 = vmatpush1.bf16.msra.mxu0 %v5402_v5  ;;  %4130 = vmatprep.subr.bf16.mxu1 %v5407_v60  ;;  %v5423_v0 = vld [vmem:[%s8917_s7 + $0x230] ss:$8 sps:$4 sm:$0xff]   ;;  %v5509_v48 = vld [vmem:[%s8917_s7 + $0x424] ss:$8 sps:$4 sm:$0xff]   ;;  %v5507_v3 = vld [vmem:[%s8917_s7 + $0x420] ss:$8 sps:$4 sm:$0xff]  }
 0x552   :  { %v8613_v17 = vpop.f32.mrf.mxu0  ;;  %4185 = vmatprep.subr.bf16.mxu0 %v5410_v63  ;;  %v3131_v53 = vmul.f32 %v8518_v45, %v3126_v21  ;;  %v5434_v21 = vld [vmem:[%s8917_s7 + $0x314] ss:$8 sps:$4 sm:$0xff]  }
 0x553   :  { %v3100_v38 = vrot.slane %v8613_v17, 3  ;;  %v3132_v22 = vrot.slane %v8613_v17, 7  ;;  %v3116_v62 = vrot.slane %v8613_v17, 4 }
 0x554   :  { %4131 = vmatpush1.bf16.msra.mxu1 %v5405_v58  ;;  %v8621_v6 = vpop.f32.mrf.mxu0  ;;  %v3152_v52 = vpack.c.bf16 %v3131_v53, %v3130_v35  ;;  %v3145_v58 = vpack.c.bf16 %v8510_v61, %v8505_v1  ;;  %v5432_v1 = vld [vmem:[%s8917_s7 + $0x310] ss:$8 sps:$4 sm:$0xff]   ;;  %v5437_v61 = vld [vmem:[%s8917_s7 + $0x214] ss:$8 sps:$4 sm:$0xff]   ;;  %v5443_v53 = vld [vmem:[%s8917_s7 + $0x204] ss:$8 sps:$4 sm:$0xff]  }
 0x555   :  { %4186 = vmatpush1.bf16.msra.mxu0 %v5408_v19  ;;  %4132 = vmatprep.subr.bf16.mxu1 %v5413_v23  ;;  %v3105_v56 = vsel %vm3056_vm14, 0.0, %v3100_v38  ;;  %v3110_v54 = vrot.slane %v8621_v6, 4  ;;  %v3137_v40 = vsel %vm1602_vm0, 0.0, %v3132_v22  ;;  %v5429_v19 = vld [vmem:[%s8917_s7 + $0x220] ss:$8 sps:$4 sm:$0xff]  }
 0x556   :  { %v8635_v25 = vpop.f32.mrf.mxu0  ;;  %4187 = vmatprep.subr.bf16.mxu0 %v5416_v47  ;;  %4117 = vmatprep.mubr.bf16.mxu0 %v3152_v52  ;;  %v3106_v15 = vmul.f32 %v8513_v2, %v3105_v56  ;;  %v8659_v39 = vmul.f32 %v8513_v2, %v3137_v40  ;;  %v5428_v2 = vld [vmem:[%s8917_s7 + $0x324] ss:$8 sps:$4 sm:$0xff]   ;;  %v5435_v23 = vld [vmem:[%s8917_s7 + $0x210] ss:$8 sps:$4 sm:$0xff]   ;;  %v5438_v47 = vld [vmem:[%s8917_s7 + $0x300] ss:$8 sps:$4 sm:$0xff]  }
 0x557   :  { %v3101_v44 = vrot.slane %v8635_v25, 3  ;;  %v3117_v8 = vrot.slane %v8635_v25, 4  ;;  %v3133_v55 = vrot.slane %v8635_v25, 7  ;;  %v3157_v28 = vpack.c.bf16 %v8635_v25, %v8613_v17  ;;  %v5449_v52 = vld [vmem:[%s8917_s7 + $0x2f4] ss:$8 sps:$4 sm:$0xff]  }
 0x558   :  { %4133 = vmatpush1.bf16.msra.mxu1 %v5411_v18  ;;  %v8646_v57 = vpop.f32.mrf.mxu0  ;;  %v5444_v18 = vld [vmem:[%s8917_s7 + $0x3f0] ss:$8 sps:$4 sm:$0xff]   ;;  %v5455_v56 = vld [vmem:[%s8917_s7 + $0x2e4] ss:$8 sps:$4 sm:$0xff]  }
 0x559   :  { %v3111_v34 = vrot.slane %v8646_v57, 4  ;;  %4188 = vmatpush1.bf16.msra.mxu0 %v5414_v36  ;;  %4134 = vmatprep.subr.bf16.mxu1 %v5419_v27  ;;  %v3118_v30 = vsel %vm3067_vm12, %v3116_v62, %v3117_v8  ;;  %v3102_v9 = vsel %vm3056_vm14, %v3100_v38, %v3101_v44  ;;  %v3134_v46 = vsel %vm1602_vm0, %v3132_v22, %v3133_v55  ;;  %v5446_v38 = vld [vmem:[%s8917_s7 + $0x3f4] ss:$8 sps:$4 sm:$0xff]   ;;  %v5441_v22 = vld [vmem:[%s8917_s7 + $0x200] ss:$8 sps:$4 sm:$0xff]  }
 0x55a   :  { %4189 = vmatprep.subr.bf16.mxu0 %v5422_v51  ;;  %v4783_v16 = vpack.c.bf16 %v3118_v30, %v3116_v62  ;;  %v3107_v59 = vmul.f32 %v8518_v45, %v3102_v9  ;;  %v8673_v60 = vmul.f32 %v8518_v45, %v3134_v46  ;;  %v5431_v45 = vld [vmem:[%s8917_s7 + $0x224] ss:$8 sps:$4 sm:$0xff]   ;;  %v5447_v36 = vld [vmem:[%s8917_s7 + $0x2f0] ss:$8 sps:$4 sm:$0xff]   ;;  %v5450_v27 = vld [vmem:[%s8917_s7 + $0x3e0] ss:$8 sps:$4 sm:$0xff]  }
 0x55b   :  { %v3112_v5 = vsel %vm3067_vm12, %v3110_v54, %v3111_v34  ;;  %v5452_v62 = vld [vmem:[%s8917_s7 + $0x3e4] ss:$8 sps:$4 sm:$0xff]   ;;  %v5453_v51 = vld [vmem:[%s8917_s7 + $0x2e0] ss:$8 sps:$4 sm:$0xff]   ;;  %v5456_v40 = vld [vmem:[%s8917_s7 + $0x3d0] ss:$8 sps:$4 sm:$0xff]  }
 0x55c   :  { %v4775_v63 = vpack.c.bf16 %v3112_v5, %v3110_v54  ;;  %4135 = vmatpush1.bf16.msra.mxu1 %v5417_v4  ;;  %4784 = vmatmul.mubr.msk.bf16.gmra.mxu0 %vm8551_vm13, %v4783_v16  ;;  %v3149_v35 = vpack.c.bf16 %v3107_v59, %v3106_v15  ;;  %v3155_v11 = vpack.c.bf16 %v8673_v60, %v8659_v39  ;;  %v5458_v54 = vld [vmem:[%s8917_s7 + $0x3d4] ss:$8 sps:$4 sm:$0xff]   ;;  %v5464_v8 = vld [vmem:[%s8917_s7 + $0x3c4] ss:$8 sps:$4 sm:$0xff]   ;;  %v5459_v55 = vld [vmem:[%s8917_s7 + $0x2d0] ss:$8 sps:$4 sm:$0xff]  }
 0x55d   :  { %4190 = vmatpush1.bf16.msra.mxu0 %v5420_v49  ;;  %4213 = vmatprep.mubr.bf16.mxu0 %v3147_v31  ;;  %v5461_v44 = vld [vmem:[%s8917_s7 + $0x2d4] ss:$8 sps:$4 sm:$0xff]   ;;  %v5462_v4 = vld [vmem:[%s8917_s7 + $0x3c0] ss:$8 sps:$4 sm:$0xff]   ;;  %v5467_v15 = vld [vmem:[%s8917_s7 + $0x2c4] ss:$8 sps:$4 sm:$0xff]  }
 0x55e   :  { %4776 = vmatprep.mubr.msk.bf16.mxu1 %vm8551_vm13, %v4775_v63  ;;  %4136 = vmatprep.subr.bf16.mxu1 %v5425_v41  ;;  %v5470_v34 = vld [vmem:[%s8917_s7 + $0x3b4] ss:$8 sps:$4 sm:$0xff]   ;;  %v5465_v49 = vld [vmem:[%s8917_s7 + $0x2c0] ss:$8 sps:$4 sm:$0xff]   ;;  %v5468_v30 = vld [vmem:[%s8917_s7 + $0x3b0] ss:$8 sps:$4 sm:$0xff]  }
 0x55f   :  { %4065 = vmatmul.mubr.bf16.gmra.mxu1 %v3149_v35  ;;  %4191 = vmatprep.subr.bf16.mxu0 %v5428_v2  ;;  %v5473_v9 = vld [vmem:[%s8917_s7 + $0x2b4] ss:$8 sps:$4 sm:$0xff]   ;;  %v5476_v16 = vld [vmem:[%s8917_s7 + $0x3a4] ss:$8 sps:$4 sm:$0xff]   ;;  %v5471_v41 = vld [vmem:[%s8917_s7 + $0x2b0] ss:$8 sps:$4 sm:$0xff]  }
 0x560   :  { %4137 = vmatpush1.bf16.msra.mxu1 %v5423_v0  ;;  %4160 = vmatprep.mubr.bf16.mxu1 %v3145_v58  ;;  %v5474_v59 = vld [vmem:[%s8917_s7 + $0x3a0] ss:$8 sps:$4 sm:$0xff]   ;;  %v5479_v46 = vld [vmem:[%s8917_s7 + $0x2a4] ss:$8 sps:$4 sm:$0xff]   ;;  %v5482_v31 = vld [vmem:[%s8917_s7 + $0x394] ss:$8 sps:$4 sm:$0xff]  }
 0x561   :  { %4192 = vmatpush1.bf16.msra.mxu0 %v5426_v24  ;;  %4138 = vmatprep.subr.bf16.mxu1 %v5431_v45  ;;  %v5477_v5 = vld [vmem:[%s8917_s7 + $0x2a0] ss:$8 sps:$4 sm:$0xff]   ;;  %v5480_v2 = vld [vmem:[%s8917_s7 + $0x390] ss:$8 sps:$4 sm:$0xff]   ;;  %v5485_v63 = vld [vmem:[%s8917_s7 + $0x294] ss:$8 sps:$4 sm:$0xff]  }
 0x562   :  { %4193 = vmatprep.subr.bf16.mxu0 %v5434_v21  ;;  %v5488_v0 = vld [vmem:[%s8917_s7 + $0x384] ss:$8 sps:$4 sm:$0xff]   ;;  %v5483_v35 = vld [vmem:[%s8917_s7 + $0x290] ss:$8 sps:$4 sm:$0xff]   ;;  %v5486_v24 = vld [vmem:[%s8917_s7 + $0x380] ss:$8 sps:$4 sm:$0xff]  }
 0x563   :  { %v5491_v45 = vld [vmem:[%s8917_s7 + $0x284] ss:$8 sps:$4 sm:$0xff]   ;;  %v5489_v58 = vld [vmem:[%s8917_s7 + $0x280] ss:$8 sps:$4 sm:$0xff]   ;;  %v5494_v21 = vld [vmem:[%s8917_s7 + $0x474] ss:$8 sps:$4 sm:$0xff]  }
 0x564   :  { %4139 = vmatpush1.bf16.msra.mxu1 %v5429_v19  ;;  %v3156_v19 = vpack.c.bf16 %v8646_v57, %v8621_v6  ;;  %v5510_v6 = vld [vmem:[%s8917_s7 + $0x410] ss:$8 sps:$4 sm:$0xff]   ;;  %v5515_v57 = vld [vmem:[%s8917_s7 + $0x404] ss:$8 sps:$4 sm:$0xff]   ;;  %v5513_v39 = vld [vmem:[%s8917_s7 + $0x400] ss:$8 sps:$4 sm:$0xff]  }
 0x565   :  { %4194 = vmatpush1.bf16.msra.mxu0 %v5432_v1  ;;  %4140 = vmatprep.subr.bf16.mxu1 %v5437_v61  ;;  %v5492_v1 = vld [vmem:[%s8917_s7 + $0x470] ss:$8 sps:$4 sm:$0xff]   ;;  %v5497_v61 = vld [vmem:[%s8917_s7 + $0x464] ss:$8 sps:$4 sm:$0xff]  }
 0x566   :  { %4195 = vmatprep.subr.bf16.mxu0 %v5440_v32  ;;  %v3154_v32 = vpack.c.bf16 %v8590_v50, %v8567_v43  ;;  %v5535_v43 = vmov 0   ;;  %v5504_v50 = vld [vmem:[%s8917_s7 + $0x430] ss:$8 sps:$4 sm:$0xff]  }
 0x568   :  { %4141 = vmatpush1.bf16.msra.mxu1 %v5435_v23 }
 0x569   :  { %4196 = vmatpush1.bf16.msra.mxu0 %v5438_v47  ;;  %4142 = vmatprep.subr.bf16.mxu1 %v5443_v53 }
 0x56a   :  { %4197 = vmatprep.subr.bf16.mxu0 %v5446_v38 }
 0x56c   :  { %4143 = vmatpush1.bf16.msra.mxu1 %v5441_v22 }
 0x56d   :  { %4198 = vmatpush2.bf16.msra.mxu0 %v5444_v18  ;;  %4144 = vmatprep.subr.bf16.mxu1 %v5449_v52 }
 0x56e   :  { %4199 = vmatprep.subr.bf16.mxu0 %v5452_v62 }
 0x570   :  { %4145 = vmatpush2.bf16.msra.mxu1 %v5447_v36 }
 0x571   :  { %4200 = vmatpush2.bf16.msra.mxu0 %v5450_v27  ;;  %4146 = vmatprep.subr.bf16.mxu1 %v5455_v56 }
 0x572   :  { %4201 = vmatprep.subr.bf16.mxu0 %v5458_v54 }
 0x574   :  { %4147 = vmatpush2.bf16.msra.mxu1 %v5453_v51 }
 0x575   :  { %4202 = vmatpush2.bf16.msra.mxu0 %v5456_v40  ;;  %4148 = vmatprep.subr.bf16.mxu1 %v5461_v44 }
 0x576   :  { %4203 = vmatprep.subr.bf16.mxu0 %v5464_v8 }
 0x578   :  { %4149 = vmatpush2.bf16.msra.mxu1 %v5459_v55 }
 0x579   :  { %4204 = vmatpush2.bf16.msra.mxu0 %v5462_v4  ;;  %4150 = vmatprep.subr.bf16.mxu1 %v5467_v15 }
 0x57a   :  { %4205 = vmatprep.subr.bf16.mxu0 %v5470_v34 }
 0x57c   :  { %4151 = vmatpush2.bf16.msra.mxu1 %v5465_v49 }
 0x57d   :  { %4206 = vmatpush2.bf16.msra.mxu0 %v5468_v30  ;;  %4152 = vmatprep.subr.bf16.mxu1 %v5473_v9 }
 0x57e   :  { %4207 = vmatprep.subr.bf16.mxu0 %v5476_v16 }
 0x580   :  { %4153 = vmatpush2.bf16.msra.mxu1 %v5471_v41 }
 0x581   :  { %4208 = vmatpush2.bf16.msra.mxu0 %v5474_v59  ;;  %4154 = vmatprep.subr.bf16.mxu1 %v5479_v46 }
 0x582   :  { %4209 = vmatprep.subr.bf16.mxu0 %v5482_v31 }
 0x584   :  { %4155 = vmatpush2.bf16.msra.mxu1 %v5477_v5 }
 0x585   :  { %4210 = vmatpush2.bf16.msra.mxu0 %v5480_v2  ;;  %4156 = vmatprep.subr.bf16.mxu1 %v5485_v63 }
 0x586   :  { %4211 = vmatprep.subr.bf16.mxu0 %v5488_v0 }
 0x588   :  { %4157 = vmatpush2.bf16.msra.mxu1 %v5483_v35 }
 0x589   :  { %4212 = vmatpush2.bf16.msra.mxu0 %v5486_v24  ;;  %4158 = vmatprep.subr.bf16.mxu1 %v5491_v45 }
 0x58c   :  { %4159 = vmatpush2.bf16.msra.mxu1 %v5489_v58  ;;  %4214 = vmatmul.mubr.bf16.vlgmr.msra.gmra.mxu0 %v3146_v33  ;;  %v5506_v33 = vld [vmem:[%s8917_s7 + $0x434] ss:$8 sps:$4 sm:$0xff]  }
 0x58d   :  { %4223 = vmatprep.mubr.bf16.mxu0 %v3156_v19  ;;  %4234 = vmatprep.subr.bf16.mxu1 %v5494_v21 }
 0x58f   :  { %4161 = vmatmul.mubr.bf16.vlgmr.msra.gmra.mxu1 %v3144_v10  ;;  %v5501_v10 = vld [vmem:[%s8917_s7 + $0x440] ss:$8 sps:$4 sm:$0xff]  }
 0x590   :  { %4170 = vmatprep.mubr.bf16.mxu1 %v3154_v32  ;;  %4235 = vmatpush1.bf16.msra.mxu1 %v5492_v1 }
 0x591   :  { %4236 = vmatprep.subr.bf16.mxu1 %v5497_v61 }
 0x594   :  { %4224 = vmatmul.mubr.bf16.gmra.mxu0 %v3155_v11  ;;  %4237 = vmatpush1.bf16.msra.mxu1 %v5495_v14 }
 0x595   :  { %4238 = vmatprep.subr.bf16.mxu1 %v5500_v12 }
 0x597   :  { %4171 = vmatmul.mubr.bf16.gmra.mxu1 %v3153_v7  ;;  %v5512_v7 = vld [vmem:[%s8917_s7 + $0x414] ss:$8 sps:$4 sm:$0xff]  }
 0x598   :  { %4239 = vmatpush1.bf16.msra.mxu1 %v5498_v37  ;;  %4266 = vmatprep.mubr.bf16.mxu1 %v5535_v43 }
 0x599   :  { %4240 = vmatprep.subr.bf16.mxu1 %v5503_v20 }
 0x59c   :  { %4241 = vmatpush1.bf16.msra.mxu1 %v5501_v10 }
 0x59d   :  { %4242 = vmatprep.subr.bf16.mxu1 %v5506_v33 }
 0x5a0   :  { %4243 = vmatpush1.bf16.msra.mxu1 %v5504_v50 }
 0x5a1   :  { %4244 = vmatprep.subr.bf16.mxu1 %v5509_v48 }
 0x5a4   :  { %4245 = vmatpush1.bf16.msra.mxu1 %v5507_v3 }
 0x5a5   :  { %4246 = vmatprep.subr.bf16.mxu1 %v5512_v7 }
 0x5a8   :  { %4247 = vmatpush1.bf16.msra.mxu1 %v5510_v6 }
 0x5a9   :  { %4248 = vmatprep.subr.bf16.mxu1 %v5515_v57 }
 0x5ac   :  { %4249 = vmatpush1.bf16.msra.mxu1 %v5513_v39 }
 0x5af   :  { %4267 = vmatmul.mubr.bf16.vlgmr.msra.gmra.mxu1 %v3148_v26 }
 0x5b0   :  { %4276 = vmatprep.mubr.bf16.mxu1 %v5535_v43 }
 0x5b7   :  { %4277 = vmatmul.mubr.bf16.gmra.mxu1 %v3157_v28 }
 0x60c   :  { %v4109_v53 = vpop.f32.mrf.mxu0 }
 0x60e   :  { %v4111_v22 = vpop.f32.mrf.mxu0 }
 0x60f   :  { %v4056_v60 = vpop.f32.mrf.mxu1 }
 0x610   :  { %v4113_v52 = vpop.f32.mrf.mxu0  ;;  %v4110_v30 = vadd.f32 %v4109_v53, %v4056_v60 }
 0x611   :  { %v4058_v11 = vpop.f32.mrf.mxu1 }
 0x612   :  { %v4115_v36 = vpop.f32.mrf.mxu0  ;;  %v4112_v31 = vadd.f32 %v4111_v22, %v4058_v11 }
 0x613   :  { %v4060_v23 = vpop.f32.mrf.mxu1 }
 0x614   :  { %v4114_v49 = vadd.f32 %v4113_v52, %v4060_v23 }
 0x615   :  { %v4062_v47 = vpop.f32.mrf.mxu1 }
 0x616   :  { %v4116_v41 = vadd.f32 %v4115_v36, %v4062_v47 }
 0x61c   :  { %v4119_v56 = vpop.f32.mrf.mxu0 }
 0x61e   :  { %v4121_v29 = vpop.f32.mrf.mxu0 }
 0x61f   :  { %v4066_v38 = vpop.f32.mrf.mxu1 }
 0x620   :  { %v4123_v54 = vpop.f32.mrf.mxu0  ;;  %v4120_v59 = vadd.f32 %v4119_v56, %v4066_v38 }
 0x621   :  { %v4068_v18 = vpop.f32.mrf.mxu1 }
 0x622   :  { %v4125_v17 = vpop.f32.mrf.mxu0  ;;  %v4122_v5 = vadd.f32 %v4121_v29, %v4068_v18 }
 0x623   :  { %v4070_v62 = vpop.f32.mrf.mxu1 }
 0x624   :  { %v4124_v19 = vadd.f32 %v4123_v54, %v4070_v62 }
 0x625   :  { %v4072_v27 = vpop.f32.mrf.mxu1 }
 0x626   :  { %v4126_v61 = vadd.f32 %v4125_v17, %v4072_v27 }
 0x64c   :  { %v4215_v28 = vpop.f32.mrf.mxu0 }
 0x64e   :  { %v4217_v44 = vpop.f32.mrf.mxu0 }
 0x64f   :  { %v4162_v42 = vpop.f32.mrf.mxu1 }
 0x650   :  { %v4219_v55 = vpop.f32.mrf.mxu0  ;;  %v4163_v2 = vadd.f32 %v4162_v42, %v4110_v30 }
 0x651   :  { %v4164_v26 = vpop.f32.mrf.mxu1 }
 0x652   :  { %v4221_v15 = vpop.f32.mrf.mxu0  ;;  %v4165_v24 = vadd.f32 %v4164_v26, %v4112_v31  ;;  %v4216_v32 = vadd.f32 %v4215_v28, %v4163_v2 }
 0x653   :  { %v4166_v51 = vpop.f32.mrf.mxu1 }
 0x654   :  { %v4225_v9 = vpop.f32.mrf.mxu0  ;;  %v4167_v46 = vadd.f32 %v4166_v51, %v4114_v49  ;;  %v4218_v33 = vadd.f32 %v4217_v44, %v4165_v24 }
 0x655   :  { %v4168_v25 = vpop.f32.mrf.mxu1 }
 0x656   :  { %v4169_v0 = vadd.f32 %v4168_v25, %v4116_v41  ;;  %v4227_v45 = vpop.f32.mrf.mxu0  ;;  %v4220_v1 = vadd.f32 %v4219_v55, %v4167_v46 }
 0x657   :  { %v4172_v40 = vpop.f32.mrf.mxu1 }
 0x658   :  { %v4173_v35 = vadd.f32 %v4172_v40, %v4120_v59  ;;  %v4222_v20 = vadd.f32 %v4221_v15, %v4169_v0  ;;  %v4229_v43 = vpop.f32.mrf.mxu0 }
 0x659   :  { %v4174_v8 = vpop.f32.mrf.mxu1 }
 0x65a   :  { %v4175_v58 = vadd.f32 %v4174_v8, %v4122_v5  ;;  %v4226_v10 = vadd.f32 %v4225_v9, %v4173_v35  ;;  %v4231_v53 = vpop.f32.mrf.mxu0 }
 0x65b   :  { %v4176_v4 = vpop.f32.mrf.mxu1 }
 0x65c   :  { %v4177_v12 = vadd.f32 %v4176_v4, %v4124_v19  ;;  %v4228_v48 = vadd.f32 %v4227_v45, %v4175_v58 }
 0x65d   :  { %v4178_v34 = vpop.f32.mrf.mxu1 }
 0x65e   :  { %v4179_v3 = vadd.f32 %v4178_v34, %v4126_v61  ;;  %v4230_v47 = vadd.f32 %v4229_v43, %v4177_v12 }
 0x660   :  { %v4232_v62 = vadd.f32 %v4231_v53, %v4179_v3  ;;  %v4361_v53 = vsub.s32 0, %v9224_v13 }
 0x66f   :  { %v4268_v16 = vpop.f32.mrf.mxu1 }
 0x670   :  { %v4269_v7 = vadd.f32 %v4268_v16, %v4216_v32 }
 0x671   :  { %v4270_v63 = vpop.f32.mrf.mxu1 }
 0x672   :  { %v4271_v60 = vadd.f32 %v4270_v63, %v4218_v33 }
 0x673   :  { %v4272_v21 = vpop.f32.mrf.mxu1 }
 0x674   :  { %v4273_v37 = vadd.f32 %v4272_v21, %v4220_v1 }
 0x675   :  { %v4274_v14 = vpop.f32.mrf.mxu1 }
 0x676   :  { %v4275_v6 = vadd.f32 %v4274_v14, %v4222_v20  ;;  %v4289_v11 = vadd.f32 %v4273_v37, %v4269_v7 }
 0x677   :  { %v4278_v50 = vpop.f32.mrf.mxu1 }
 0x678   :  { %v4279_v57 = vadd.f32 %v4278_v50, %v4226_v10  ;;  %v4298_v22 = vadd.f32 %v4275_v6, %v4271_v60 }
 0x679   :  { %v4280_v39 = vpop.f32.mrf.mxu1 }
 0x67a   :  { %v4281_v23 = vadd.f32 %v4280_v39, %v4228_v48  ;;  %v4290_v18 = vadd.f32 %v4289_v11, %v4279_v57 }
 0x67b   :  { %v4282_v38 = vpop.f32.mrf.mxu1 }
 0x67c   :  { %v4283_v52 = vadd.f32 %v4282_v38, %v4230_v47  ;;  %v4299_v27 = vadd.f32 %v4298_v22, %v4281_v23  ;;  %v4287_v38 = vld [vmem:[%s8920_s8] sm:$0x3] }
 0x67d   :  { %v4284_v36 = vpop.f32.mrf.mxu1  ;;  %v4288_v22 = vld [vmem:[%s8921_s9] sm:$0x3] }
 0x67e   :  { %v4291_v56 = vadd.f32 %v4290_v18, %v4283_v52  ;;  %v4285_v42 = vadd.f32 %v4284_v36, %v4232_v62  ;;  %v4365_v18 = vsub.s32 1, %v9224_v13  ;;  %v4381_v36 = vrot.slane %v4288_v22, %v4361_v53 }
 0x680   :  { %v4292_v29 = vrot.slane %v4291_v56, 4  ;;  %v4300_v26 = vadd.f32 %v4299_v27, %v4285_v42 }
 0x682   :  { %v4293_v54 = vadd.f32 %v4292_v29, %v4291_v56  ;;  %v4301_v51 = vrot.slane %v4300_v26, 4 }
 0x684   :  { %v4294_v17 = vrot.slane %v4293_v54, 2  ;;  %v4302_v25 = vadd.f32 %v4301_v51, %v4300_v26  ;;  %v4366_v26 = vrot.slane %v4287_v38, %v4365_v18 }
 0x686   :  { %v4295_v28 = vadd.f32 %v4294_v17, %v4293_v54  ;;  %v4303_v40 = vrot.slane %v4302_v25, 2  ;;  %v4385_v54 = vrot.slane %v4288_v22, %v4365_v18 }
 0x688   :  { %v4296_v44 = vrot.slane %v4295_v28, 1  ;;  %v4304_v8 = vadd.f32 %v4303_v40, %v4302_v25 }
 0x68a   :  { %v4297_v55 = vadd.f32 %v4296_v44, %v4295_v28  ;;  %v4305_v4 = vrot.slane %v4304_v8, 1 }
 0x68c   :  { %v4308_v15 = vmul.f32 0.03125, %v4297_v55  ;;  %v4306_v34 = vadd.f32 %v4305_v4, %v4304_v8 }
 0x68e   :  { %v4310_v49 = vsub.f32 %v4269_v7, %v4308_v15  ;;  %v4312_v30 = vsub.f32 %v4273_v37, %v4308_v15  ;;  %v4314_v9 = vsub.f32 %v4279_v57, %v4308_v15  ;;  %v4309_v16 = vmul.f32 0.03125, %v4306_v34 }
 0x68f   :  { %v4316_v41 = vsub.f32 %v4283_v52, %v4308_v15  ;;  %v4362_v52 = vrot.slane %v4287_v38, %v4361_v53 }
 0x690   :  { %v4318_v59 = vmul.f32 %v4310_v49, %v4310_v49  ;;  %v4320_v46 = vmul.f32 %v4312_v30, %v4312_v30  ;;  %v4311_v31 = vsub.f32 %v4271_v60, %v4309_v16  ;;  %v4313_v5 = vsub.f32 %v4275_v6, %v4309_v16 }
 0x691   :  { %v4315_v2 = vsub.f32 %v4281_v23, %v4309_v16  ;;  %v4322_v63 = vmul.f32 %v4314_v9, %v4314_v9  ;;  %v4317_v35 = vsub.f32 %v4285_v42, %v4309_v16  ;;  %v4324_v58 = vmul.f32 %v4316_v41, %v4316_v41 }
 0x692   :  { %v4326_v0 = vadd.f32 %v4320_v46, %v4318_v59  ;;  %v4319_v24 = vmul.f32 %v4311_v31, %v4311_v31  ;;  %v4321_v45 = vmul.f32 %v4313_v5, %v4313_v5 }
 0x693   :  { %v4323_v19 = vmul.f32 %v4315_v2, %v4315_v2  ;;  %v4325_v32 = vmul.f32 %v4317_v35, %v4317_v35 }
 0x694   :  { %v4327_v21 = vadd.f32 %v4326_v0, %v4322_v63  ;;  %v4335_v1 = vadd.f32 %v4321_v45, %v4319_v24 }
 0x696   :  { %v4328_v61 = vadd.f32 %v4327_v21, %v4324_v58  ;;  %v4336_v14 = vadd.f32 %v4335_v1, %v4323_v19  ;;  %v4450_v58 = vld [vmem:[%s8922_s11 + $0x8] sm:$0xff]  ;;  %v4451_v1 = vld [vmem:[%s8922_s11 + $0x10] sm:$0xff] }
 0x698   :  { %v4329_v12 = vrot.slane %v4328_v61, 4  ;;  %v4337_v37 = vadd.f32 %v4336_v14, %v4325_v32 }
 0x69a   :  { %v4330_v20 = vadd.f32 %v4329_v12, %v4328_v61  ;;  %v4338_v10 = vrot.slane %v4337_v37, 4 }
 0x69c   :  { %v4331_v43 = vrot.slane %v4330_v20, 2  ;;  %v4339_v33 = vadd.f32 %v4338_v10, %v4337_v37 }
 0x69e   :  { %v4332_v50 = vadd.f32 %v4331_v43, %v4330_v20  ;;  %v4340_v48 = vrot.slane %v4339_v33, 2  ;;  %v4452_v43 = vld [vmem:[%s8922_s11 + $0x18] sm:$0xff] }
 0x6a0   :  { %v4333_v3 = vrot.slane %v4332_v50, 1  ;;  %v4341_v7 = vadd.f32 %v4340_v48, %v4339_v33 }
 0x6a2   :  { %v4334_v6 = vadd.f32 %v4333_v3, %v4332_v50  ;;  %v4342_v57 = vrot.slane %v4341_v7, 1 }
 0x6a4   :  { %v4344_v39 = vmul.f32 0.03125, %v4334_v6  ;;  %v4343_v60 = vadd.f32 %v4342_v57, %v4341_v7 }
 0x6a6   :  { %v4346_v11 = vadd.f32 1e-05, %v4344_v39  ;;  %v4345_v23 = vmul.f32 0.03125, %v4343_v60 }
 0x6a8   :  { %5520 = vrsqrt.f32 %v4346_v11  ;;  %v4347_v47 = vadd.f32 1e-05, %v4345_v23 }
 0x6aa   :  { %5522 = vrsqrt.f32 %v4347_v47 }
 0x6b5   :  { %v5521_v62 = vpop.eup %5520 }
 0x6b6   :  { %v4350_v27 = vmul.f32 %v5521_v62, %v4310_v49  ;;  %v4354_v56 = vmul.f32 %v5521_v62, %v4314_v9  ;;  %v4356_v42 = vmul.f32 %v5521_v62, %v4316_v41  ;;  %v4352_v29 = vmul.f32 %v5521_v62, %v4312_v30 }
 0x6b7   :  { %v5523_v51 = vpop.eup %5522 }
 0x6b8   :  { %v4375_v17 = vmul.f32 %v4362_v52, %v4356_v42  ;;  %v4373_v25 = vmul.f32 %v4362_v52, %v4354_v56  ;;  %v4369_v28 = vmul.f32 %v4362_v52, %v4350_v27  ;;  %v4371_v40 = vmul.f32 %v4362_v52, %v4352_v29 }
 0x6b9   :  { %v4351_v44 = vmul.f32 %v5523_v51, %v4311_v31  ;;  %v4355_v8 = vmul.f32 %v5523_v51, %v4315_v2  ;;  %v4357_v55 = vmul.f32 %v5523_v51, %v4317_v35  ;;  %v4353_v4 = vmul.f32 %v5523_v51, %v4313_v5  ;;  %v4449_v31 = vld [vmem:[%s8922_s11] sm:$0xff] }
 0x6ba   :  { %v4394_v15 = vadd.f32 %v4381_v36, %v4375_v17  ;;  %v4392_v13 = vadd.f32 %v4381_v36, %v4373_v25  ;;  %v4388_v34 = vadd.f32 %v4381_v36, %v4369_v28  ;;  %v4390_v46 = vadd.f32 %v4381_v36, %v4371_v40 }
 0x6bb   :  { %v4376_v16 = vmul.f32 %v4366_v26, %v4357_v55  ;;  %v4374_v59 = vmul.f32 %v4366_v26, %v4355_v8  ;;  %v4370_v49 = vmul.f32 %v4366_v26, %v4351_v44  ;;  %v4372_v9 = vmul.f32 %v4366_v26, %v4353_v4 }
 0x6bc   :  { %vm4400_vm0 = vcmp.ge.f32.partialorder %v4392_v13, 0.0  ;;  %v4408_v30 = vmul.f32 0.2, %v4392_v13  ;;  %v4410_v41 = vmul.f32 0.2, %v4394_v15  ;;  %vm4402_vm3 = vcmp.ge.f32.partialorder %v4394_v15, 0.0 }
 0x6bd   :  { %v4395_v63 = vadd.f32 %v4385_v54, %v4376_v16  ;;  %v4393_v0 = vadd.f32 %v4385_v54, %v4374_v59  ;;  %v4389_v24 = vadd.f32 %v4385_v54, %v4370_v49  ;;  %v4391_v5 = vadd.f32 %v4385_v54, %v4372_v9 }
 0x6be   :  { %v4416_v45 = vsel %vm4400_vm0, %v4392_v13, %v4408_v30  ;;  %v4418_v21 = vsel %vm4402_vm3, %v4394_v15, %v4410_v41  ;;  %vm4396_vm6 = vcmp.ge.f32.partialorder %v4388_v34, 0.0  ;;  %vm4398_vm7 = vcmp.ge.f32.partialorder %v4390_v46, 0.0 }
 0x6bf   :  { %vm4401_vm2 = vcmp.ge.f32.partialorder %v4393_v0, 0.0  ;;  %v4409_v2 = vmul.f32 0.2, %v4393_v0  ;;  %v4411_v35 = vmul.f32 0.2, %v4395_v63  ;;  %vm4403_vm4 = vcmp.ge.f32.partialorder %v4395_v63, 0.0 }
 0x6c0   :  { %vm4397_vm5 = vcmp.ge.f32.partialorder %v4389_v24, 0.0  ;;  %v4404_v61 = vmul.f32 0.2, %v4388_v34  ;;  %v4405_v32 = vmul.f32 0.2, %v4389_v24  ;;  %v4453_v14 = vmul.f32 %v4449_v31, %v4416_v45 }
 0x6c1   :  { %v4417_v19 = vsel %vm4401_vm2, %v4393_v0, %v4409_v2  ;;  %v4406_v37 = vmul.f32 0.2, %v4390_v46  ;;  %v4407_v20 = vmul.f32 0.2, %v4391_v5  ;;  %v4419_v10 = vsel %vm4403_vm4, %v4395_v63, %v4411_v35 }
 0x6c2   :  { %v4454_v12 = vmul.f32 %v4450_v58, %v4417_v19  ;;  %vm4399_vm8 = vcmp.ge.f32.partialorder %v4391_v5, 0.0  ;;  %v4412_v33 = vsel %vm4396_vm6, %v4388_v34, %v4404_v61  ;;  %v4413_v50 = vsel %vm4397_vm5, %v4389_v24, %v4405_v32 }
 0x6c3   :  { %v4455_v48 = vmul.f32 %v4451_v1, %v4418_v21  ;;  %v4414_v7 = vsel %vm4398_vm7, %v4390_v46, %v4406_v37  ;;  %v4424_v6 = vmul.f32 %v4449_v31, %v4412_v33  ;;  %v4425_v57 = vmul.f32 %v4450_v58, %v4413_v50 }
 0x6c4   :  { %v4457_v3 = vadd.f32 %v4454_v12, %v4453_v14  ;;  %v4456_v39 = vmul.f32 %v4452_v43, %v4419_v10  ;;  %v4415_v11 = vsel %vm4399_vm8, %v4391_v5, %v4407_v20  ;;  %v4426_v23 = vmul.f32 %v4451_v1, %v4414_v7 }
 0x6c5   :  { %v4428_v47 = vadd.f32 %v4425_v57, %v4424_v6  ;;  %v4427_v38 = vmul.f32 %v4452_v43, %v4415_v11 }
 0x6c6   :  { %v4458_v60 = vadd.f32 %v4457_v3, %v4455_v48 }
 0x6c7   :  { %v4429_v22 = vadd.f32 %v4428_v47, %v4426_v23 }
 0x6c8   :  { %v4459_v53 = vadd.f32 %v4458_v60, %v4456_v39 }
 0x6c9   :  { %v4430_v18 = vadd.f32 %v4429_v22, %v4427_v38 }
 0x6ca   :  { %4460 = vadd.xlane.f32.xlu1 %v4459_v53 }
 0x6cb   :  { %4431 = vadd.xlane.f32.xlu0 %v4430_v18 }
 0x753   :  { %v4461_v52 = vpop.xlane.xlu1 %4460 }
 0x754   :  { %v4462_v62 = vrot.slane %v4461_v52, 4  ;;  %v4432_v27 = vpop.xlane.xlu0 %4431 }
 0x755   :  { %v4433_v56 = vrot.slane %v4432_v27, 4 }
 0x756   :  { %v4463_v36 = vadd.f32 %v4462_v62, %v4461_v52 }
 0x757   :  { %v4434_v29 = vadd.f32 %v4433_v56, %v4432_v27 }
 0x758   :  { %v4464_v42 = vrot.slane %v4463_v36, 2 }
 0x759   :  { %v4435_v54 = vrot.slane %v4434_v29, 2 }
 0x75a   :  { %v4465_v26 = vadd.f32 %v4464_v42, %v4463_v36 }
 0x75b   :  { %v4436_v17 = vadd.f32 %v4435_v54, %v4434_v29 }
 0x75c   :  { %v4466_v51 = vrot.slane %v4465_v26, 1 }
 0x75d   :  { %v4437_v25 = vrot.slane %v4436_v17, 1 }
 0x75e   :  { %v4467_v28 = vadd.f32 %v4466_v51, %v4465_v26 }
 0x75f   :  { %v4438_v40 = vadd.f32 %v4437_v25, %v4436_v17 }
 0x761   :  { %5103 = vpush %v4438_v40 }
 0x762   :  { %5105 = vpush %v4467_v28 }
 0x792   :  { %s5104_s11 = spop %5103 }
 0x793   :  { %v4440_v44 = vstv %s5104_s11  ;;  %s5106_s25 = spop %5105 }
 0x794   :  { %v4441_v8 = vsub.f32 0.0, %v4440_v44  ;;  %v4469_v55 = vstv %s5106_s25 }
 0x795   :  { %v4470_v4 = vsub.f32 0.0, %v4469_v55 }
 0x796   :  { %v4442_v15 = vmul.f32 1.442695, %v4441_v8 }
 0x797   :  { %v4471_v13 = vmul.f32 1.442695, %v4470_v4 }
 0x798   :  { %5524 = vpow2.f32 %v4442_v15 }
 0x799   :  { %5526 = vpow2.f32 %v4471_v13 }
 0x7a5   :  { %v5525_v34 = vpop.eup %5524 }
 0x7a6   :  { %v5527_v16 = vpop.eup %5526  ;;  %v4444_v59 = vadd.f32 1.0, %v5525_v34 }
 0x7a7   :  { %v4473_v49 = vadd.f32 1.0, %v5527_v16 }
 0x7a8   :  { %5528 = vrcp.f32 %v4444_v59 }
 0x7a9   :  { %5530 = vrcp.f32 %v4473_v49 }
 0x7b5   :  { %v5529_v9 = vpop.eup %5528 }
 0x7b6   :  { %v5531_v30 = vpop.eup %5530  ;;  %4448 = vst.msk [vmem:[%s8923_s12] sm:$0x1] %vm4447_vm9, %v5529_v9 }
 0x7b7   :  { %4476 = vst.msk [vmem:[%s8923_s12 + $0x1] sm:$0x1] %vm4447_vm9, %v5531_v30 }

</bundles_post_ra>
